<compile_context>
chip_gen: v7x
topology: tpu7x:2x2x1
jax: 0.10.0
libtpu: 0.0.40
codegen_flags: <defaults>
</compile_context>

<pallas_src>
import numpy as np
import jax
import jax.numpy as jnp
from jax.experimental import pallas as pl
from jax.experimental.pallas import tpu as pltpu

KS = 5  # conv kernel size

# rows/cols of the 32x32 layer-1 conv output that MaxPool2d(kernel_size=2,
# stride=4) actually reads (pool output i <- conv rows 4i, 4i+1).
_L1_SEL = np.array([4 * i + d for i in range(8) for d in range(2)], np.int32)


# ------------------------------------------------------------- in-kernel helpers
def _pool2x2(r, tmp_ref, w_valid):
    """2x2 / stride-2 max-pool of r (H, W, C) over its first w_valid columns.

    H-pooling happens on the value (leading-dim reshape + max); W-pooling goes
    through a tiny VMEM scratch so the stride-2 column selection is a plain
    strided ref read.
    """
    h, w, c = r.shape
    rh = jnp.max(r.reshape(h // 2, 2, w, c), axis=1)                  # (h/2, w, c)
    tmp_ref[...] = rh
    return jnp.maximum(tmp_ref[:, pl.ds(0, w_valid // 2, 2), :],
                       tmp_ref[:, pl.ds(1, w_valid // 2, 2), :])


def _conv5x5(src_ref, lhs_ref, w_ref, b_ref, *, ho, wo):
    """5x5 stride-1 'same' conv + folded-BN bias + ReLU on a padded VMEM input.

    src_ref : (ho+4, wo+4, cin) f32   zero-padded input (VMEM scratch)
    lhs_ref : ((ho+4)*wo, 5*cin) f32  packed-LHS scratch (dw taps folded into K)
    w_ref   : (5, 5*cin, cout) bf16   weights, K ordered (dw, cin), BN folded in
    b_ref   : (1, cout) f32           folded BN bias
    returns : (ho, wo, cout) f32      ReLU(conv + bias)
    """
    hp, _, cin = src_ref.shape
    cout = w_ref.shape[-1]
    # One unaligned W-shift per dw (hoisted out of the dh loop); the 5 taps are
    # packed along the lane (K) dim of lhs_ref so each dh is one deep-K matmul.
    for dw in range(KS):
        lhs_ref[:, pl.ds(dw * cin, cin)] = (
            src_ref[:, pl.ds(dw, wo), :].reshape(hp * wo, cin))
    acc = jnp.zeros((ho * wo, cout), jnp.float32)
    for dh in range(KS):                                   # 5 MXU matmuls, K = 5*cin
        lhs = lhs_ref[pl.ds(dh * wo, ho * wo), :].astype(jnp.bfloat16)
        acc += jnp.dot(lhs, w_ref[dh], preferred_element_type=jnp.float32)
    r = jnp.maximum(acc + b_ref[...], 0.0)
    return r.reshape(ho, wo, cout)


# ------------------------------------------------------------------- fused kernel
def _convnet_kernel(l1_ref, w1_ref, b1_ref, w2_ref, b2_ref, w3_ref, b3_ref,
                    w4_ref, b4_ref, wh_ref, bh_ref, o_ref,
                    a1p, a2p, a3p, lhs2, lhs3, lhs4, t1, t2, t4):
    f32 = jnp.float32

    # layer 1: wrapper-im2col'd LHS -> one (256,128)x(128,32) matmul + bias/ReLU,
    # then a 2x2/stride-2 pool over the 16x16 positions MaxPool2d(2, s=4) reads.
    acc1 = jnp.dot(l1_ref[...], w1_ref[...], preferred_element_type=f32)
    r1 = jnp.maximum(acc1 + b1_ref[...], 0.0).reshape(16, 16, 32)
    a1p[...] = jnp.zeros(a1p.shape, f32)
    a1p[pl.ds(2, 8), pl.ds(2, 8), :] = _pool2x2(r1, t1, 16)           # (8,8,32)

    # layer 2: 8x8x32 -> conv/BN/ReLU -> pool(2,2) -> 4x4x64
    r2 = _conv5x5(a1p, lhs2, w2_ref, b2_ref, ho=8, wo=8)              # (8,8,64)
    a2p[...] = jnp.zeros(a2p.shape, f32)
    a2p[pl.ds(2, 4), pl.ds(2, 4), :] = _pool2x2(r2, t2, 8)            # (4,4,64)

    # layer 3: 4x4x64 -> conv/BN/ReLU -> 4x4x64 (computed 8 wide; columns 4..7
    # are scratch work and are dropped before they can reach layer 4).
    r3 = _conv5x5(a2p, lhs3, w3_ref, b3_ref, ho=4, wo=8)              # (4,8,64)
    a3p[...] = jnp.zeros(a3p.shape, f32)
    a3p[pl.ds(2, 4), pl.ds(2, 4), :] = r3[:, :4, :]                   # (4,4,64)

    # layer 4: 4x4x64 -> conv/BN/ReLU -> pool(2,2) -> 2x2x32
    r4 = _conv5x5(a3p, lhs4, w4_ref, b4_ref, ho=4, wo=8)              # (4,8,32)
    p4 = _pool2x2(r4, t4, 4)                                          # (2,2,32)

    # head: AdaptiveAvgPool2d((1,49)) + flatten + Linear is linear in p4, so it
    # was folded at init into a single (2,2,32) weight plus the fc bias.
    y = jnp.sum(p4 * wh_ref[...])
    o_ref[...] = bh_ref[...] + y


def _const_spec(a):
    return pl.BlockSpec(a.shape, lambda i, _n=a.ndim: (0,) * _n)


def _convnet_pallas(l1_lhs, p):
    n = l1_lhs.shape[0]
    out = pl.pallas_call(
        _convnet_kernel,
        out_shape=jax.ShapeDtypeStruct((n, 1, 128), jnp.float32),
        grid=(n,),
        in_specs=[
            pl.BlockSpec((None, 256, 128), lambda i: (i, 0, 0)),
            _const_spec(p["w1"]), _const_spec(p["b1"]),
            _const_spec(p["w2"]), _const_spec(p["b2"]),
            _const_spec(p["w3"]), _const_spec(p["b3"]),
            _const_spec(p["w4"]), _const_spec(p["b4"]),
            _const_spec(p["wh"]), _const_spec(p["bh"]),
        ],
        out_specs=pl.BlockSpec((None, 1, 128), lambda i: (i, 0, 0)),
        scratch_shapes=[
            pltpu.VMEM((12, 12, 32), jnp.float32),   # a1p : padded layer-2 input
            pltpu.VMEM((8, 12, 64), jnp.float32),    # a2p : padded layer-3 input
            pltpu.VMEM((8, 12, 64), jnp.float32),    # a3p : padded layer-4 input
            pltpu.VMEM((96, 160), jnp.float32),      # lhs2: packed layer-2 LHS
            pltpu.VMEM((64, 320), jnp.float32),      # lhs3: packed layer-3 LHS
            pltpu.VMEM((64, 320), jnp.float32),      # lhs4: packed layer-4 LHS
            pltpu.VMEM((8, 16, 32), jnp.float32),    # t1  : W-pool scratch, layer 1
            pltpu.VMEM((4, 8, 64), jnp.float32),     # t2  : W-pool scratch, layer 2
            pltpu.VMEM((2, 8, 32), jnp.float32),     # t4  : W-pool scratch, layer 4
        ],
        compiler_params=pltpu.CompilerParams(
            dimension_semantics=("parallel",)),
    )(l1_lhs, p["w1"], p["b1"], p["w2"], p["b2"], p["w3"], p["b3"],
      p["w4"], p["b4"], p["wh"], p["bh"])
    return out[:, 0, 0]


# ------------------------------------------------------------------ forward pass
def convnet_forward(prep, x_nchw):
    n = x_nchw.shape[0]
    x = jnp.transpose(x_nchw, (0, 2, 3, 1)).astype(jnp.float32)      # NHWC (N,32,32,3)
    xp = jnp.pad(x, ((0, 0), (2, 2), (2, 2), (0, 0)))                # (N,36,36,3)
    # layer-1 im2col (K = 5*5*3 = 75), restricted to the 16x16 conv outputs the
    # first max-pool reads; K zero-padded to 128 and cast to bf16 for the MXU.
    patches = jnp.concatenate(
        [xp[:, dh:dh + 32, dw:dw + 32, :]
         for dh in range(KS) for dw in range(KS)], axis=-1)          # (N,32,32,75)
    patches = patches[:, _L1_SEL][:, :, _L1_SEL]                     # (N,16,16,75)
    l1_lhs = jnp.pad(patches.reshape(n, 16 * 16, 75),
                     ((0, 0), (0, 0), (0, 128 - 75))).astype(jnp.bfloat16)
    return _convnet_pallas(l1_lhs, prep)


# ---------------------------------------------------------------- param handling
def _fold_conv_bn(w, b, gamma, beta, mean, var, eps=1e-5):
    """Fold eval-mode BatchNorm into the conv weights / bias."""
    scale = gamma / jnp.sqrt(var + eps)                              # (cout,)
    return w * scale, (b - mean) * scale + beta


def _adaptive_w_proj(w_in, w_out):
    """PyTorch AdaptiveAvgPool width-projection matrix (w_in, w_out)."""
    p = np.zeros((w_in, w_out), np.float32)
    for j in range(w_out):
        lo = (j * w_in) // w_out
        hi = -(-((j + 1) * w_in) // w_out)                           # ceil
        p[lo:hi, j] = 1.0 / (hi - lo)
    return jnp.asarray(p)


def prepare_params(params):
    """One-time (outside jit) weight prep: BN folding, tap-major K layout,
    bf16 casts, and folding of the linear head (adaptive avg-pool + fc)."""
    prep = {}
    w, bias = _fold_conv_bn(**params["l1"])                          # (5,5,3,32)
    prep["w1"] = jnp.pad(w.reshape(75, 32),
                         ((0, 128 - 75), (0, 0))).astype(jnp.bfloat16)
    prep["b1"] = bias.reshape(1, 32).astype(jnp.float32)
    for name, i in (("l2", 2), ("l3", 3), ("l4", 4)):
        w, bias = _fold_conv_bn(**params[name])                      # (5,5,cin,cout)
        kh, kw, cin, cout = w.shape
        prep[f"w{i}"] = w.reshape(kh, kw * cin, cout).astype(jnp.bfloat16)
        prep[f"b{i}"] = bias.reshape(1, cout).astype(jnp.float32)
    # head: y = fc(flatten(AdaptiveAvgPool2d((1,49))(a4))) collapses to a single
    # (2,2,32) weight (the 0.5 is the H-mean) plus the fc bias.
    proj = _adaptive_w_proj(2, 7 * 7)                                # (2,49)
    fcw = params["fc_w"][:, 0].reshape(32, 7 * 7)                    # [c, j]
    wh = 0.5 * jnp.einsum("wj,cj->wc", proj, fcw)                    # (2,32)
    prep["wh"] = jnp.tile(wh[None], (2, 1, 1)).astype(jnp.float32)   # (2,2,32)
    prep["bh"] = jnp.full((1, 128), params["fc_b"][0], jnp.float32)
    return prep


def init_params(key):
    params = {}
    for name, cin, cout in (("l1", 3, 32), ("l2", 32, 64),
                            ("l3", 64, 64), ("l4", 64, 32)):
        key, kw, kb, kg, kbe, km, kv = jax.random.split(key, 7)
        params[name] = dict(
            w=jax.random.normal(kw, (5, 5, cin, cout), jnp.float32) * 0.05,
            b=jax.random.normal(kb, (cout,), jnp.float32) * 0.05,
            gamma=1.0 + 0.1 * jax.random.normal(kg, (cout,), jnp.float32),
            beta=0.1 * jax.random.normal(kbe, (cout,), jnp.float32),
            mean=0.1 * jax.random.normal(km, (cout,), jnp.float32),
            var=jax.random.uniform(kv, (cout,), jnp.float32, minval=0.5, maxval=1.5),
        )
    key, kfw, kfb = jax.random.split(key, 3)
    params["fc_w"] = jax.random.normal(kfw, (7 * 7 * 32, 1), jnp.float32) * 0.02
    params["fc_b"] = jax.random.normal(kfb, (1,), jnp.float32) * 0.02
    return params


if __name__ == "__main__":
    x = jax.random.normal(jax.random.PRNGKey(0), (2, 3, 32, 32), jnp.float32)
    params = init_params(jax.random.PRNGKey(1))
    prep = prepare_params(params)        # BN / head folding once, outside the jit
    fwd = jax.jit(convnet_forward)
    y = jax.block_until_ready(fwd(prep, x))
    assert y.shape == (2,) and y.dtype == jnp.float32
    assert bool(jnp.all(jnp.isfinite(y)))
    print("KERNEL_OK")
</pallas_src>

<mosaic_0001>
module attributes {stable_mosaic.version = 11 : i64} {
  func.func @_convnet_kernel(%arg0: i32, %arg1: memref<1x256x128xbf16, #tpu.memory_space<vmem>>, %arg2: memref<128x32xbf16, #tpu.memory_space<vmem>>, %arg3: memref<1x32xf32, #tpu.memory_space<vmem>>, %arg4: memref<5x160x64xbf16, #tpu.memory_space<vmem>>, %arg5: memref<1x64xf32, #tpu.memory_space<vmem>>, %arg6: memref<5x320x64xbf16, #tpu.memory_space<vmem>>, %arg7: memref<1x64xf32, #tpu.memory_space<vmem>>, %arg8: memref<5x320x32xbf16, #tpu.memory_space<vmem>>, %arg9: memref<1x32xf32, #tpu.memory_space<vmem>>, %arg10: memref<2x2x32xf32, #tpu.memory_space<vmem>>, %arg11: memref<1x128xf32, #tpu.memory_space<vmem>>, %arg12: memref<1x1x128xf32, #tpu.memory_space<vmem>>, %arg13: memref<12x12x32xf32, #tpu.memory_space<vmem>>, %arg14: memref<8x12x64xf32, #tpu.memory_space<vmem>>, %arg15: memref<8x12x64xf32, #tpu.memory_space<vmem>>, %arg16: memref<96x160xf32, #tpu.memory_space<vmem>>, %arg17: memref<64x320xf32, #tpu.memory_space<vmem>>, %arg18: memref<64x320xf32, #tpu.memory_space<vmem>>, %arg19: memref<8x16x32xf32, #tpu.memory_space<vmem>>, %arg20: memref<4x8x64xf32, #tpu.memory_space<vmem>>, %arg21: memref<2x8x32xf32, #tpu.memory_space<vmem>>) attributes {dimension_semantics = [#tpu.dimension_semantics<parallel>], iteration_bounds = array<i64: 2>, scalar_prefetch = 0 : i64, scratch_operands = 9 : i64, tpu.core_type = #tpu.core_type<tc>, window_params = [{transform_indices = @transform_0, window_bounds = array<i64: 1, 256, 128>}, {pipeline_mode = #tpu.pipeline_mode<synchronous>, transform_indices = @transform_1, window_bounds = array<i64: 128, 32>}, {pipeline_mode = #tpu.pipeline_mode<synchronous>, transform_indices = @transform_2, window_bounds = array<i64: 1, 32>}, {pipeline_mode = #tpu.pipeline_mode<synchronous>, transform_indices = @transform_3, window_bounds = array<i64: 5, 160, 64>}, {pipeline_mode = #tpu.pipeline_mode<synchronous>, transform_indices = @transform_4, window_bounds = array<i64: 1, 64>}, {pipeline_mode = #tpu.pipeline_mode<synchronous>, transform_indices = @transform_5, window_bounds = array<i64: 5, 320, 64>}, {pipeline_mode = #tpu.pipeline_mode<synchronous>, transform_indices = @transform_6, window_bounds = array<i64: 1, 64>}, {pipeline_mode = #tpu.pipeline_mode<synchronous>, transform_indices = @transform_7, window_bounds = array<i64: 5, 320, 32>}, {pipeline_mode = #tpu.pipeline_mode<synchronous>, transform_indices = @transform_8, window_bounds = array<i64: 1, 32>}, {pipeline_mode = #tpu.pipeline_mode<synchronous>, transform_indices = @transform_9, window_bounds = array<i64: 2, 2, 32>}, {pipeline_mode = #tpu.pipeline_mode<synchronous>, transform_indices = @transform_10, window_bounds = array<i64: 1, 128>}, {transform_indices = @transform_11, window_bounds = array<i64: 1, 1, 128>}]} {
    %c0 = arith.constant 0 : index
    %c0_0 = arith.constant 0 : index
    %c0_1 = arith.constant 0 : index
    %0 = vector.load %arg1[%c0, %c0_0, %c0_1] : memref<1x256x128xbf16, #tpu.memory_space<vmem>>, vector<1x256x128xbf16>
    %1 = vector.shape_cast %0 : vector<1x256x128xbf16> to vector<256x128xbf16>
    %c0_2 = arith.constant 0 : index
    %c0_3 = arith.constant 0 : index
    %2 = vector.load %arg2[%c0_2, %c0_3] : memref<128x32xbf16, #tpu.memory_space<vmem>>, vector<128x32xbf16>
    %cst = arith.constant dense<0.000000e+00> : vector<256x32xf32>
    %3 = tpu.matmul %1, %2, %cst {dimension_numbers = #tpu.dot_dimension_numbers<[1], [0], [0], [1], [0, 0, 1, 1], [], []>} : vector<256x128xbf16>, vector<128x32xbf16>, vector<256x32xf32> -> vector<256x32xf32>
    %c0_4 = arith.constant 0 : index
    %c0_5 = arith.constant 0 : index
    %4 = vector.load %arg3[%c0_4, %c0_5] : memref<1x32xf32, #tpu.memory_space<vmem>>, vector<1x32xf32>
    %5 = vector.broadcast %4 : vector<1x32xf32> to vector<256x32xf32>
    %6 = arith.addf %3, %5 : vector<256x32xf32>
    %cst_6 = arith.constant 0.000000e+00 : f32
    %7 = vector.broadcast %cst_6 : f32 to vector<256x32xf32>
    %8 = arith.maximumf %6, %7 : vector<256x32xf32>
    %9 = vector.shape_cast %8 : vector<256x32xf32> to vector<16x16x32xf32>
    %cst_7 = arith.constant 0.000000e+00 : f32
    %10 = vector.broadcast %cst_7 : f32 to vector<12x12x32xf32>
    %c0_8 = arith.constant 0 : index
    %c0_9 = arith.constant 0 : index
    %c0_10 = arith.constant 0 : index
    %11 = vector.load %arg13[%c0_8, %c0_9, %c0_10] : memref<12x12x32xf32, #tpu.memory_space<vmem>>, vector<12x12x32xf32>
    tpu.vector_store %arg13[%c0_8, %c0_9, %c0_10], %10 {strides = array<i32>} : memref<12x12x32xf32, #tpu.memory_space<vmem>>, vector<12x12x32xf32>,
    %12 = vector.shape_cast %9 : vector<16x16x32xf32> to vector<8x2x16x32xf32>
    %cst_11 = arith.constant dense<0xFF800000> : vector<8x16x32xf32>
    %13 = vector.multi_reduction <maximumf>, %12, %cst_11 [1] : vector<8x2x16x32xf32> to vector<8x16x32xf32>
    %c0_12 = arith.constant 0 : index
    %c0_13 = arith.constant 0 : index
    %c0_14 = arith.constant 0 : index
    %14 = vector.load %arg19[%c0_12, %c0_13, %c0_14] : memref<8x16x32xf32, #tpu.memory_space<vmem>>, vector<8x16x32xf32>
    tpu.vector_store %arg19[%c0_12, %c0_13, %c0_14], %13 {strides = array<i32>} : memref<8x16x32xf32, #tpu.memory_space<vmem>>, vector<8x16x32xf32>,
    %c0_15 = arith.constant 0 : index
    %c0_16 = arith.constant 0 : index
    %c0_17 = arith.constant 0 : index
    %15 = tpu.strided_load %arg19[%c0_15, %c0_16, %c0_17] {strides = array<i32: 1, 2, 1>} : memref<8x16x32xf32, #tpu.memory_space<vmem>>, vector<8x8x32xf32>
    %c0_18 = arith.constant 0 : index
    %c1 = arith.constant 1 : index
    %c0_19 = arith.constant 0 : index
    %16 = tpu.strided_load %arg19[%c0_18, %c1, %c0_19] {strides = array<i32: 1, 2, 1>} : memref<8x16x32xf32, #tpu.memory_space<vmem>>, vector<8x8x32xf32>
    %17 = arith.maximumf %15, %16 : vector<8x8x32xf32>
    %c2 = arith.constant 2 : index
    %c2_20 = arith.constant 2 : index
    %c0_21 = arith.constant 0 : index
    %18 = vector.load %arg13[%c2, %c2_20, %c0_21] : memref<12x12x32xf32, #tpu.memory_space<vmem>>, vector<8x8x32xf32>
    tpu.vector_store %arg13[%c2, %c2_20, %c0_21], %17 {strides = array<i32>} : memref<12x12x32xf32, #tpu.memory_space<vmem>>, vector<8x8x32xf32>,
    %c0_22 = arith.constant 0 : index
    %c0_23 = arith.constant 0 : index
    %c0_24 = arith.constant 0 : index
    %19 = vector.load %arg13[%c0_22, %c0_23, %c0_24] : memref<12x12x32xf32, #tpu.memory_space<vmem>>, vector<12x8x32xf32>
    %20 = vector.shape_cast %19 : vector<12x8x32xf32> to vector<96x32xf32>
    %c0_25 = arith.constant 0 : index
    %c0_26 = arith.constant 0 : index
    %21 = vector.load %arg16[%c0_25, %c0_26] : memref<96x160xf32, #tpu.memory_space<vmem>>, vector<96x32xf32>
    tpu.vector_store %arg16[%c0_25, %c0_26], %20 {strides = array<i32>} : memref<96x160xf32, #tpu.memory_space<vmem>>, vector<96x32xf32>,
    %c0_27 = arith.constant 0 : index
    %c1_28 = arith.constant 1 : index
    %c0_29 = arith.constant 0 : index
    %22 = vector.load %arg13[%c0_27, %c1_28, %c0_29] : memref<12x12x32xf32, #tpu.memory_space<vmem>>, vector<12x8x32xf32>
    %23 = vector.shape_cast %22 : vector<12x8x32xf32> to vector<96x32xf32>
    %c0_30 = arith.constant 0 : index
    %c32 = arith.constant 32 : index
    %24 = vector.load %arg16[%c0_30, %c32] : memref<96x160xf32, #tpu.memory_space<vmem>>, vector<96x32xf32>
    tpu.vector_store %arg16[%c0_30, %c32], %23 {strides = array<i32>} : memref<96x160xf32, #tpu.memory_space<vmem>>, vector<96x32xf32>,
    %c0_31 = arith.constant 0 : index
    %c2_32 = arith.constant 2 : index
    %c0_33 = arith.constant 0 : index
    %25 = vector.load %arg13[%c0_31, %c2_32, %c0_33] : memref<12x12x32xf32, #tpu.memory_space<vmem>>, vector<12x8x32xf32>
    %26 = vector.shape_cast %25 : vector<12x8x32xf32> to vector<96x32xf32>
    %c0_34 = arith.constant 0 : index
    %c64 = arith.constant 64 : index
    %27 = vector.load %arg16[%c0_34, %c64] : memref<96x160xf32, #tpu.memory_space<vmem>>, vector<96x32xf32>
    tpu.vector_store %arg16[%c0_34, %c64], %26 {strides = array<i32>} : memref<96x160xf32, #tpu.memory_space<vmem>>, vector<96x32xf32>,
    %c0_35 = arith.constant 0 : index
    %c3 = arith.constant 3 : index
    %c0_36 = arith.constant 0 : index
    %28 = vector.load %arg13[%c0_35, %c3, %c0_36] : memref<12x12x32xf32, #tpu.memory_space<vmem>>, vector<12x8x32xf32>
    %29 = vector.shape_cast %28 : vector<12x8x32xf32> to vector<96x32xf32>
    %c0_37 = arith.constant 0 : index
    %c96 = arith.constant 96 : index
    %30 = vector.load %arg16[%c0_37, %c96] : memref<96x160xf32, #tpu.memory_space<vmem>>, vector<96x32xf32>
    tpu.vector_store %arg16[%c0_37, %c96], %29 {strides = array<i32>} : memref<96x160xf32, #tpu.memory_space<vmem>>, vector<96x32xf32>,
    %c0_38 = arith.constant 0 : index
    %c4 = arith.constant 4 : index
    %c0_39 = arith.constant 0 : index
    %31 = vector.load %arg13[%c0_38, %c4, %c0_39] : memref<12x12x32xf32, #tpu.memory_space<vmem>>, vector<12x8x32xf32>
    %32 = vector.shape_cast %31 : vector<12x8x32xf32> to vector<96x32xf32>
    %c0_40 = arith.constant 0 : index
    %c128 = arith.constant 128 : index
    %33 = vector.load %arg16[%c0_40, %c128] : memref<96x160xf32, #tpu.memory_space<vmem>>, vector<96x32xf32>
    tpu.vector_store %arg16[%c0_40, %c128], %32 {strides = array<i32>} : memref<96x160xf32, #tpu.memory_space<vmem>>, vector<96x32xf32>,
    %cst_41 = arith.constant 0.000000e+00 : f32
    %34 = vector.broadcast %cst_41 : f32 to vector<64x64xf32>
    %c0_42 = arith.constant 0 : index
    %c0_43 = arith.constant 0 : index
    %35 = vector.load %arg16[%c0_42, %c0_43] : memref<96x160xf32, #tpu.memory_space<vmem>>, vector<64x160xf32>
    %36 = arith.truncf %35 : vector<64x160xf32> to vector<64x160xbf16>
    %c0_44 = arith.constant 0 : index
    %c0_45 = arith.constant 0 : index
    %c0_46 = arith.constant 0 : index
    %37 = vector.load %arg4[%c0_44, %c0_45, %c0_46] : memref<5x160x64xbf16, #tpu.memory_space<vmem>>, vector<1x160x64xbf16>
    %38 = vector.shape_cast %37 : vector<1x160x64xbf16> to vector<160x64xbf16>
    %cst_47 = arith.constant dense<0.000000e+00> : vector<64x64xf32>
    %39 = tpu.matmul %36, %38, %cst_47 {dimension_numbers = #tpu.dot_dimension_numbers<[1], [0], [0], [1], [0, 0, 1, 1], [], []>} : vector<64x160xbf16>, vector<160x64xbf16>, vector<64x64xf32> -> vector<64x64xf32>
    %40 = arith.addf %34, %39 : vector<64x64xf32>
    %c8 = arith.constant 8 : index
    %c0_48 = arith.constant 0 : index
    %41 = vector.load %arg16[%c8, %c0_48] : memref<96x160xf32, #tpu.memory_space<vmem>>, vector<64x160xf32>
    %42 = arith.truncf %41 : vector<64x160xf32> to vector<64x160xbf16>
    %c1_49 = arith.constant 1 : index
    %c0_50 = arith.constant 0 : index
    %c0_51 = arith.constant 0 : index
    %43 = vector.load %arg4[%c1_49, %c0_50, %c0_51] : memref<5x160x64xbf16, #tpu.memory_space<vmem>>, vector<1x160x64xbf16>
    %44 = vector.shape_cast %43 : vector<1x160x64xbf16> to vector<160x64xbf16>
    %cst_52 = arith.constant dense<0.000000e+00> : vector<64x64xf32>
    %45 = tpu.matmul %42, %44, %cst_52 {dimension_numbers = #tpu.dot_dimension_numbers<[1], [0], [0], [1], [0, 0, 1, 1], [], []>} : vector<64x160xbf16>, vector<160x64xbf16>, vector<64x64xf32> -> vector<64x64xf32>
    %46 = arith.addf %40, %45 : vector<64x64xf32>
    %c16 = arith.constant 16 : index
    %c0_53 = arith.constant 0 : index
    %47 = vector.load %arg16[%c16, %c0_53] : memref<96x160xf32, #tpu.memory_space<vmem>>, vector<64x160xf32>
    %48 = arith.truncf %47 : vector<64x160xf32> to vector<64x160xbf16>
    %c2_54 = arith.constant 2 : index
    %c0_55 = arith.constant 0 : index
    %c0_56 = arith.constant 0 : index
    %49 = vector.load %arg4[%c2_54, %c0_55, %c0_56] : memref<5x160x64xbf16, #tpu.memory_space<vmem>>, vector<1x160x64xbf16>
    %50 = vector.shape_cast %49 : vector<1x160x64xbf16> to vector<160x64xbf16>
    %cst_57 = arith.constant dense<0.000000e+00> : vector<64x64xf32>
    %51 = tpu.matmul %48, %50, %cst_57 {dimension_numbers = #tpu.dot_dimension_numbers<[1], [0], [0], [1], [0, 0, 1, 1], [], []>} : vector<64x160xbf16>, vector<160x64xbf16>, vector<64x64xf32> -> vector<64x64xf32>
    %52 = arith.addf %46, %51 : vector<64x64xf32>
    %c24 = arith.constant 24 : index
    %c0_58 = arith.constant 0 : index
    %53 = vector.load %arg16[%c24, %c0_58] : memref<96x160xf32, #tpu.memory_space<vmem>>, vector<64x160xf32>
    %54 = arith.truncf %53 : vector<64x160xf32> to vector<64x160xbf16>
    %c3_59 = arith.constant 3 : index
    %c0_60 = arith.constant 0 : index
    %c0_61 = arith.constant 0 : index
    %55 = vector.load %arg4[%c3_59, %c0_60, %c0_61] : memref<5x160x64xbf16, #tpu.memory_space<vmem>>, vector<1x160x64xbf16>
    %56 = vector.shape_cast %55 : vector<1x160x64xbf16> to vector<160x64xbf16>
    %cst_62 = arith.constant dense<0.000000e+00> : vector<64x64xf32>
    %57 = tpu.matmul %54, %56, %cst_62 {dimension_numbers = #tpu.dot_dimension_numbers<[1], [0], [0], [1], [0, 0, 1, 1], [], []>} : vector<64x160xbf16>, vector<160x64xbf16>, vector<64x64xf32> -> vector<64x64xf32>
    %58 = arith.addf %52, %57 : vector<64x64xf32>
    %c32_63 = arith.constant 32 : index
    %c0_64 = arith.constant 0 : index
    %59 = vector.load %arg16[%c32_63, %c0_64] : memref<96x160xf32, #tpu.memory_space<vmem>>, vector<64x160xf32>
    %60 = arith.truncf %59 : vector<64x160xf32> to vector<64x160xbf16>
    %c4_65 = arith.constant 4 : index
    %c0_66 = arith.constant 0 : index
    %c0_67 = arith.constant 0 : index
    %61 = vector.load %arg4[%c4_65, %c0_66, %c0_67] : memref<5x160x64xbf16, #tpu.memory_space<vmem>>, vector<1x160x64xbf16>
    %62 = vector.shape_cast %61 : vector<1x160x64xbf16> to vector<160x64xbf16>
    %cst_68 = arith.constant dense<0.000000e+00> : vector<64x64xf32>
    %63 = tpu.matmul %60, %62, %cst_68 {dimension_numbers = #tpu.dot_dimension_numbers<[1], [0], [0], [1], [0, 0, 1, 1], [], []>} : vector<64x160xbf16>, vector<160x64xbf16>, vector<64x64xf32> -> vector<64x64xf32>
    %64 = arith.addf %58, %63 : vector<64x64xf32>
    %c0_69 = arith.constant 0 : index
    %c0_70 = arith.constant 0 : index
    %65 = vector.load %arg5[%c0_69, %c0_70] : memref<1x64xf32, #tpu.memory_space<vmem>>, vector<1x64xf32>
    %66 = vector.broadcast %65 : vector<1x64xf32> to vector<64x64xf32>
    %67 = arith.addf %64, %66 : vector<64x64xf32>
    %cst_71 = arith.constant 0.000000e+00 : f32
    %68 = vector.broadcast %cst_71 : f32 to vector<64x64xf32>
    %69 = arith.maximumf %67, %68 : vector<64x64xf32>
    %70 = vector.shape_cast %69 : vector<64x64xf32> to vector<8x8x64xf32>
    %cst_72 = arith.constant 0.000000e+00 : f32
    %71 = vector.broadcast %cst_72 : f32 to vector<8x12x64xf32>
    %c0_73 = arith.constant 0 : index
    %c0_74 = arith.constant 0 : index
    %c0_75 = arith.constant 0 : index
    %72 = vector.load %arg14[%c0_73, %c0_74, %c0_75] : memref<8x12x64xf32, #tpu.memory_space<vmem>>, vector<8x12x64xf32>
    tpu.vector_store %arg14[%c0_73, %c0_74, %c0_75], %71 {strides = array<i32>} : memref<8x12x64xf32, #tpu.memory_space<vmem>>, vector<8x12x64xf32>,
    %73 = vector.shape_cast %70 : vector<8x8x64xf32> to vector<4x2x8x64xf32>
    %cst_76 = arith.constant dense<0xFF800000> : vector<4x8x64xf32>
    %74 = vector.multi_reduction <maximumf>, %73, %cst_76 [1] : vector<4x2x8x64xf32> to vector<4x8x64xf32>
    %c0_77 = arith.constant 0 : index
    %c0_78 = arith.constant 0 : index
    %c0_79 = arith.constant 0 : index
    %75 = vector.load %arg20[%c0_77, %c0_78, %c0_79] : memref<4x8x64xf32, #tpu.memory_space<vmem>>, vector<4x8x64xf32>
    tpu.vector_store %arg20[%c0_77, %c0_78, %c0_79], %74 {strides = array<i32>} : memref<4x8x64xf32, #tpu.memory_space<vmem>>, vector<4x8x64xf32>,
    %c0_80 = arith.constant 0 : index
    %c0_81 = arith.constant 0 : index
    %c0_82 = arith.constant 0 : index
    %76 = tpu.strided_load %arg20[%c0_80, %c0_81, %c0_82] {strides = array<i32: 1, 2, 1>} : memref<4x8x64xf32, #tpu.memory_space<vmem>>, vector<4x4x64xf32>
    %c0_83 = arith.constant 0 : index
    %c1_84 = arith.constant 1 : index
    %c0_85 = arith.constant 0 : index
    %77 = tpu.strided_load %arg20[%c0_83, %c1_84, %c0_85] {strides = array<i32: 1, 2, 1>} : memref<4x8x64xf32, #tpu.memory_space<vmem>>, vector<4x4x64xf32>
    %78 = arith.maximumf %76, %77 : vector<4x4x64xf32>
    %c2_86 = arith.constant 2 : index
    %c2_87 = arith.constant 2 : index
    %c0_88 = arith.constant 0 : index
    %79 = vector.load %arg14[%c2_86, %c2_87, %c0_88] : memref<8x12x64xf32, #tpu.memory_space<vmem>>, vector<4x4x64xf32>
    tpu.vector_store %arg14[%c2_86, %c2_87, %c0_88], %78 {strides = array<i32>} : memref<8x12x64xf32, #tpu.memory_space<vmem>>, vector<4x4x64xf32>,
    %c0_89 = arith.constant 0 : index
    %c0_90 = arith.constant 0 : index
    %c0_91 = arith.constant 0 : index
    %80 = vector.load %arg14[%c0_89, %c0_90, %c0_91] : memref<8x12x64xf32, #tpu.memory_space<vmem>>, vector<8x8x64xf32>
    %81 = vector.shape_cast %80 : vector<8x8x64xf32> to vector<64x64xf32>
    %c0_92 = arith.constant 0 : index
    %c0_93 = arith.constant 0 : index
    %82 = vector.load %arg17[%c0_92, %c0_93] : memref<64x320xf32, #tpu.memory_space<vmem>>, vector<64x64xf32>
    tpu.vector_store %arg17[%c0_92, %c0_93], %81 {strides = array<i32>} : memref<64x320xf32, #tpu.memory_space<vmem>>, vector<64x64xf32>,
    %c0_94 = arith.constant 0 : index
    %c1_95 = arith.constant 1 : index
    %c0_96 = arith.constant 0 : index
    %83 = vector.load %arg14[%c0_94, %c1_95, %c0_96] : memref<8x12x64xf32, #tpu.memory_space<vmem>>, vector<8x8x64xf32>
    %84 = vector.shape_cast %83 : vector<8x8x64xf32> to vector<64x64xf32>
    %c0_97 = arith.constant 0 : index
    %c64_98 = arith.constant 64 : index
    %85 = vector.load %arg17[%c0_97, %c64_98] : memref<64x320xf32, #tpu.memory_space<vmem>>, vector<64x64xf32>
    tpu.vector_store %arg17[%c0_97, %c64_98], %84 {strides = array<i32>} : memref<64x320xf32, #tpu.memory_space<vmem>>, vector<64x64xf32>,
    %c0_99 = arith.constant 0 : index
    %c2_100 = arith.constant 2 : index
    %c0_101 = arith.constant 0 : index
    %86 = vector.load %arg14[%c0_99, %c2_100, %c0_101] : memref<8x12x64xf32, #tpu.memory_space<vmem>>, vector<8x8x64xf32>
    %87 = vector.shape_cast %86 : vector<8x8x64xf32> to vector<64x64xf32>
    %c0_102 = arith.constant 0 : index
    %c128_103 = arith.constant 128 : index
    %88 = vector.load %arg17[%c0_102, %c128_103] : memref<64x320xf32, #tpu.memory_space<vmem>>, vector<64x64xf32>
    tpu.vector_store %arg17[%c0_102, %c128_103], %87 {strides = array<i32>} : memref<64x320xf32, #tpu.memory_space<vmem>>, vector<64x64xf32>,
    %c0_104 = arith.constant 0 : index
    %c3_105 = arith.constant 3 : index
    %c0_106 = arith.constant 0 : index
    %89 = vector.load %arg14[%c0_104, %c3_105, %c0_106] : memref<8x12x64xf32, #tpu.memory_space<vmem>>, vector<8x8x64xf32>
    %90 = vector.shape_cast %89 : vector<8x8x64xf32> to vector<64x64xf32>
    %c0_107 = arith.constant 0 : index
    %c192 = arith.constant 192 : index
    %91 = vector.load %arg17[%c0_107, %c192] : memref<64x320xf32, #tpu.memory_space<vmem>>, vector<64x64xf32>
    tpu.vector_store %arg17[%c0_107, %c192], %90 {strides = array<i32>} : memref<64x320xf32, #tpu.memory_space<vmem>>, vector<64x64xf32>,
    %c0_108 = arith.constant 0 : index
    %c4_109 = arith.constant 4 : index
    %c0_110 = arith.constant 0 : index
    %92 = vector.load %arg14[%c0_108, %c4_109, %c0_110] : memref<8x12x64xf32, #tpu.memory_space<vmem>>, vector<8x8x64xf32>
    %93 = vector.shape_cast %92 : vector<8x8x64xf32> to vector<64x64xf32>
    %c0_111 = arith.constant 0 : index
    %c256 = arith.constant 256 : index
    %94 = vector.load %arg17[%c0_111, %c256] : memref<64x320xf32, #tpu.memory_space<vmem>>, vector<64x64xf32>
    tpu.vector_store %arg17[%c0_111, %c256], %93 {strides = array<i32>} : memref<64x320xf32, #tpu.memory_space<vmem>>, vector<64x64xf32>,
    %cst_112 = arith.constant 0.000000e+00 : f32
    %95 = vector.broadcast %cst_112 : f32 to vector<32x64xf32>
    %c0_113 = arith.constant 0 : index
    %c0_114 = arith.constant 0 : index
    %96 = vector.load %arg17[%c0_113, %c0_114] : memref<64x320xf32, #tpu.memory_space<vmem>>, vector<32x320xf32>
    %97 = arith.truncf %96 : vector<32x320xf32> to vector<32x320xbf16>
    %c0_115 = arith.constant 0 : index
    %c0_116 = arith.constant 0 : index
    %c0_117 = arith.constant 0 : index
    %98 = vector.load %arg6[%c0_115, %c0_116, %c0_117] : memref<5x320x64xbf16, #tpu.memory_space<vmem>>, vector<1x320x64xbf16>
    %99 = vector.shape_cast %98 : vector<1x320x64xbf16> to vector<320x64xbf16>
    %cst_118 = arith.constant dense<0.000000e+00> : vector<32x64xf32>
    %100 = tpu.matmul %97, %99, %cst_118 {dimension_numbers = #tpu.dot_dimension_numbers<[1], [0], [0], [1], [0, 0, 1, 1], [], []>} : vector<32x320xbf16>, vector<320x64xbf16>, vector<32x64xf32> -> vector<32x64xf32>
    %101 = arith.addf %95, %100 : vector<32x64xf32>
    %c8_119 = arith.constant 8 : index
    %c0_120 = arith.constant 0 : index
    %102 = vector.load %arg17[%c8_119, %c0_120] : memref<64x320xf32, #tpu.memory_space<vmem>>, vector<32x320xf32>
    %103 = arith.truncf %102 : vector<32x320xf32> to vector<32x320xbf16>
    %c1_121 = arith.constant 1 : index
    %c0_122 = arith.constant 0 : index
    %c0_123 = arith.constant 0 : index
    %104 = vector.load %arg6[%c1_121, %c0_122, %c0_123] : memref<5x320x64xbf16, #tpu.memory_space<vmem>>, vector<1x320x64xbf16>
    %105 = vector.shape_cast %104 : vector<1x320x64xbf16> to vector<320x64xbf16>
    %cst_124 = arith.constant dense<0.000000e+00> : vector<32x64xf32>
    %106 = tpu.matmul %103, %105, %cst_124 {dimension_numbers = #tpu.dot_dimension_numbers<[1], [0], [0], [1], [0, 0, 1, 1], [], []>} : vector<32x320xbf16>, vector<320x64xbf16>, vector<32x64xf32> -> vector<32x64xf32>
    %107 = arith.addf %101, %106 : vector<32x64xf32>
    %c16_125 = arith.constant 16 : index
    %c0_126 = arith.constant 0 : index
    %108 = vector.load %arg17[%c16_125, %c0_126] : memref<64x320xf32, #tpu.memory_space<vmem>>, vector<32x320xf32>
    %109 = arith.truncf %108 : vector<32x320xf32> to vector<32x320xbf16>
    %c2_127 = arith.constant 2 : index
    %c0_128 = arith.constant 0 : index
    %c0_129 = arith.constant 0 : index
    %110 = vector.load %arg6[%c2_127, %c0_128, %c0_129] : memref<5x320x64xbf16, #tpu.memory_space<vmem>>, vector<1x320x64xbf16>
    %111 = vector.shape_cast %110 : vector<1x320x64xbf16> to vector<320x64xbf16>
    %cst_130 = arith.constant dense<0.000000e+00> : vector<32x64xf32>
    %112 = tpu.matmul %109, %111, %cst_130 {dimension_numbers = #tpu.dot_dimension_numbers<[1], [0], [0], [1], [0, 0, 1, 1], [], []>} : vector<32x320xbf16>, vector<320x64xbf16>, vector<32x64xf32> -> vector<32x64xf32>
    %113 = arith.addf %107, %112 : vector<32x64xf32>
    %c24_131 = arith.constant 24 : index
    %c0_132 = arith.constant 0 : index
    %114 = vector.load %arg17[%c24_131, %c0_132] : memref<64x320xf32, #tpu.memory_space<vmem>>, vector<32x320xf32>
    %115 = arith.truncf %114 : vector<32x320xf32> to vector<32x320xbf16>
    %c3_133 = arith.constant 3 : index
    %c0_134 = arith.constant 0 : index
    %c0_135 = arith.constant 0 : index
    %116 = vector.load %arg6[%c3_133, %c0_134, %c0_135] : memref<5x320x64xbf16, #tpu.memory_space<vmem>>, vector<1x320x64xbf16>
    %117 = vector.shape_cast %116 : vector<1x320x64xbf16> to vector<320x64xbf16>
    %cst_136 = arith.constant dense<0.000000e+00> : vector<32x64xf32>
    %118 = tpu.matmul %115, %117, %cst_136 {dimension_numbers = #tpu.dot_dimension_numbers<[1], [0], [0], [1], [0, 0, 1, 1], [], []>} : vector<32x320xbf16>, vector<320x64xbf16>, vector<32x64xf32> -> vector<32x64xf32>
    %119 = arith.addf %113, %118 : vector<32x64xf32>
    %c32_137 = arith.constant 32 : index
    %c0_138 = arith.constant 0 : index
    %120 = vector.load %arg17[%c32_137, %c0_138] : memref<64x320xf32, #tpu.memory_space<vmem>>, vector<32x320xf32>
    %121 = arith.truncf %120 : vector<32x320xf32> to vector<32x320xbf16>
    %c4_139 = arith.constant 4 : index
    %c0_140 = arith.constant 0 : index
    %c0_141 = arith.constant 0 : index
    %122 = vector.load %arg6[%c4_139, %c0_140, %c0_141] : memref<5x320x64xbf16, #tpu.memory_space<vmem>>, vector<1x320x64xbf16>
    %123 = vector.shape_cast %122 : vector<1x320x64xbf16> to vector<320x64xbf16>
    %cst_142 = arith.constant dense<0.000000e+00> : vector<32x64xf32>
    %124 = tpu.matmul %121, %123, %cst_142 {dimension_numbers = #tpu.dot_dimension_numbers<[1], [0], [0], [1], [0, 0, 1, 1], [], []>} : vector<32x320xbf16>, vector<320x64xbf16>, vector<32x64xf32> -> vector<32x64xf32>
    %125 = arith.addf %119, %124 : vector<32x64xf32>
    %c0_143 = arith.constant 0 : index
    %c0_144 = arith.constant 0 : index
    %126 = vector.load %arg7[%c0_143, %c0_144] : memref<1x64xf32, #tpu.memory_space<vmem>>, vector<1x64xf32>
    %127 = vector.broadcast %126 : vector<1x64xf32> to vector<32x64xf32>
    %128 = arith.addf %125, %127 : vector<32x64xf32>
    %cst_145 = arith.constant 0.000000e+00 : f32
    %129 = vector.broadcast %cst_145 : f32 to vector<32x64xf32>
    %130 = arith.maximumf %128, %129 : vector<32x64xf32>
    %131 = vector.shape_cast %130 : vector<32x64xf32> to vector<4x8x64xf32>
    %cst_146 = arith.constant 0.000000e+00 : f32
    %132 = vector.broadcast %cst_146 : f32 to vector<8x12x64xf32>
    %c0_147 = arith.constant 0 : index
    %c0_148 = arith.constant 0 : index
    %c0_149 = arith.constant 0 : index
    %133 = vector.load %arg15[%c0_147, %c0_148, %c0_149] : memref<8x12x64xf32, #tpu.memory_space<vmem>>, vector<8x12x64xf32>
    tpu.vector_store %arg15[%c0_147, %c0_148, %c0_149], %132 {strides = array<i32>} : memref<8x12x64xf32, #tpu.memory_space<vmem>>, vector<8x12x64xf32>,
    %134 = vector.extract_strided_slice %131 {offsets = [0, 0, 0], sizes = [4, 4, 64], strides = [1, 1, 1]} : vector<4x8x64xf32> to vector<4x4x64xf32>
    %c2_150 = arith.constant 2 : index
    %c2_151 = arith.constant 2 : index
    %c0_152 = arith.constant 0 : index
    %135 = vector.load %arg15[%c2_150, %c2_151, %c0_152] : memref<8x12x64xf32, #tpu.memory_space<vmem>>, vector<4x4x64xf32>
    tpu.vector_store %arg15[%c2_150, %c2_151, %c0_152], %134 {strides = array<i32>} : memref<8x12x64xf32, #tpu.memory_space<vmem>>, vector<4x4x64xf32>,
    %c0_153 = arith.constant 0 : index
    %c0_154 = arith.constant 0 : index
    %c0_155 = arith.constant 0 : index
    %136 = vector.load %arg15[%c0_153, %c0_154, %c0_155] : memref<8x12x64xf32, #tpu.memory_space<vmem>>, vector<8x8x64xf32>
    %137 = vector.shape_cast %136 : vector<8x8x64xf32> to vector<64x64xf32>
    %c0_156 = arith.constant 0 : index
    %c0_157 = arith.constant 0 : index
    %138 = vector.load %arg18[%c0_156, %c0_157] : memref<64x320xf32, #tpu.memory_space<vmem>>, vector<64x64xf32>
    tpu.vector_store %arg18[%c0_156, %c0_157], %137 {strides = array<i32>} : memref<64x320xf32, #tpu.memory_space<vmem>>, vector<64x64xf32>,
    %c0_158 = arith.constant 0 : index
    %c1_159 = arith.constant 1 : index
    %c0_160 = arith.constant 0 : index
    %139 = vector.load %arg15[%c0_158, %c1_159, %c0_160] : memref<8x12x64xf32, #tpu.memory_space<vmem>>, vector<8x8x64xf32>
    %140 = vector.shape_cast %139 : vector<8x8x64xf32> to vector<64x64xf32>
    %c0_161 = arith.constant 0 : index
    %c64_162 = arith.constant 64 : index
    %141 = vector.load %arg18[%c0_161, %c64_162] : memref<64x320xf32, #tpu.memory_space<vmem>>, vector<64x64xf32>
    tpu.vector_store %arg18[%c0_161, %c64_162], %140 {strides = array<i32>} : memref<64x320xf32, #tpu.memory_space<vmem>>, vector<64x64xf32>,
    %c0_163 = arith.constant 0 : index
    %c2_164 = arith.constant 2 : index
    %c0_165 = arith.constant 0 : index
    %142 = vector.load %arg15[%c0_163, %c2_164, %c0_165] : memref<8x12x64xf32, #tpu.memory_space<vmem>>, vector<8x8x64xf32>
    %143 = vector.shape_cast %142 : vector<8x8x64xf32> to vector<64x64xf32>
    %c0_166 = arith.constant 0 : index
    %c128_167 = arith.constant 128 : index
    %144 = vector.load %arg18[%c0_166, %c128_167] : memref<64x320xf32, #tpu.memory_space<vmem>>, vector<64x64xf32>
    tpu.vector_store %arg18[%c0_166, %c128_167], %143 {strides = array<i32>} : memref<64x320xf32, #tpu.memory_space<vmem>>, vector<64x64xf32>,
    %c0_168 = arith.constant 0 : index
    %c3_169 = arith.constant 3 : index
    %c0_170 = arith.constant 0 : index
    %145 = vector.load %arg15[%c0_168, %c3_169, %c0_170] : memref<8x12x64xf32, #tpu.memory_space<vmem>>, vector<8x8x64xf32>
    %146 = vector.shape_cast %145 : vector<8x8x64xf32> to vector<64x64xf32>
    %c0_171 = arith.constant 0 : index
    %c192_172 = arith.constant 192 : index
    %147 = vector.load %arg18[%c0_171, %c192_172] : memref<64x320xf32, #tpu.memory_space<vmem>>, vector<64x64xf32>
    tpu.vector_store %arg18[%c0_171, %c192_172], %146 {strides = array<i32>} : memref<64x320xf32, #tpu.memory_space<vmem>>, vector<64x64xf32>,
    %c0_173 = arith.constant 0 : index
    %c4_174 = arith.constant 4 : index
    %c0_175 = arith.constant 0 : index
    %148 = vector.load %arg15[%c0_173, %c4_174, %c0_175] : memref<8x12x64xf32, #tpu.memory_space<vmem>>, vector<8x8x64xf32>
    %149 = vector.shape_cast %148 : vector<8x8x64xf32> to vector<64x64xf32>
    %c0_176 = arith.constant 0 : index
    %c256_177 = arith.constant 256 : index
    %150 = vector.load %arg18[%c0_176, %c256_177] : memref<64x320xf32, #tpu.memory_space<vmem>>, vector<64x64xf32>
    tpu.vector_store %arg18[%c0_176, %c256_177], %149 {strides = array<i32>} : memref<64x320xf32, #tpu.memory_space<vmem>>, vector<64x64xf32>,
    %cst_178 = arith.constant 0.000000e+00 : f32
    %151 = vector.broadcast %cst_178 : f32 to vector<32x32xf32>
    %c0_179 = arith.constant 0 : index
    %c0_180 = arith.constant 0 : index
    %152 = vector.load %arg18[%c0_179, %c0_180] : memref<64x320xf32, #tpu.memory_space<vmem>>, vector<32x320xf32>
    %153 = arith.truncf %152 : vector<32x320xf32> to vector<32x320xbf16>
    %c0_181 = arith.constant 0 : index
    %c0_182 = arith.constant 0 : index
    %c0_183 = arith.constant 0 : index
    %154 = vector.load %arg8[%c0_181, %c0_182, %c0_183] : memref<5x320x32xbf16, #tpu.memory_space<vmem>>, vector<1x320x32xbf16>
    %155 = vector.shape_cast %154 : vector<1x320x32xbf16> to vector<320x32xbf16>
    %cst_184 = arith.constant dense<0.000000e+00> : vector<32x32xf32>
    %156 = tpu.matmul %153, %155, %cst_184 {dimension_numbers = #tpu.dot_dimension_numbers<[1], [0], [0], [1], [0, 0, 1, 1], [], []>} : vector<32x320xbf16>, vector<320x32xbf16>, vector<32x32xf32> -> vector<32x32xf32>
    %157 = arith.addf %151, %156 : vector<32x32xf32>
    %c8_185 = arith.constant 8 : index
    %c0_186 = arith.constant 0 : index
    %158 = vector.load %arg18[%c8_185, %c0_186] : memref<64x320xf32, #tpu.memory_space<vmem>>, vector<32x320xf32>
    %159 = arith.truncf %158 : vector<32x320xf32> to vector<32x320xbf16>
    %c1_187 = arith.constant 1 : index
    %c0_188 = arith.constant 0 : index
    %c0_189 = arith.constant 0 : index
    %160 = vector.load %arg8[%c1_187, %c0_188, %c0_189] : memref<5x320x32xbf16, #tpu.memory_space<vmem>>, vector<1x320x32xbf16>
    %161 = vector.shape_cast %160 : vector<1x320x32xbf16> to vector<320x32xbf16>
    %cst_190 = arith.constant dense<0.000000e+00> : vector<32x32xf32>
    %162 = tpu.matmul %159, %161, %cst_190 {dimension_numbers = #tpu.dot_dimension_numbers<[1], [0], [0], [1], [0, 0, 1, 1], [], []>} : vector<32x320xbf16>, vector<320x32xbf16>, vector<32x32xf32> -> vector<32x32xf32>
    %163 = arith.addf %157, %162 : vector<32x32xf32>
    %c16_191 = arith.constant 16 : index
    %c0_192 = arith.constant 0 : index
    %164 = vector.load %arg18[%c16_191, %c0_192] : memref<64x320xf32, #tpu.memory_space<vmem>>, vector<32x320xf32>
    %165 = arith.truncf %164 : vector<32x320xf32> to vector<32x320xbf16>
    %c2_193 = arith.constant 2 : index
    %c0_194 = arith.constant 0 : index
    %c0_195 = arith.constant 0 : index
    %166 = vector.load %arg8[%c2_193, %c0_194, %c0_195] : memref<5x320x32xbf16, #tpu.memory_space<vmem>>, vector<1x320x32xbf16>
    %167 = vector.shape_cast %166 : vector<1x320x32xbf16> to vector<320x32xbf16>
    %cst_196 = arith.constant dense<0.000000e+00> : vector<32x32xf32>
    %168 = tpu.matmul %165, %167, %cst_196 {dimension_numbers = #tpu.dot_dimension_numbers<[1], [0], [0], [1], [0, 0, 1, 1], [], []>} : vector<32x320xbf16>, vector<320x32xbf16>, vector<32x32xf32> -> vector<32x32xf32>
    %169 = arith.addf %163, %168 : vector<32x32xf32>
    %c24_197 = arith.constant 24 : index
    %c0_198 = arith.constant 0 : index
    %170 = vector.load %arg18[%c24_197, %c0_198] : memref<64x320xf32, #tpu.memory_space<vmem>>, vector<32x320xf32>
    %171 = arith.truncf %170 : vector<32x320xf32> to vector<32x320xbf16>
    %c3_199 = arith.constant 3 : index
    %c0_200 = arith.constant 0 : index
    %c0_201 = arith.constant 0 : index
    %172 = vector.load %arg8[%c3_199, %c0_200, %c0_201] : memref<5x320x32xbf16, #tpu.memory_space<vmem>>, vector<1x320x32xbf16>
    %173 = vector.shape_cast %172 : vector<1x320x32xbf16> to vector<320x32xbf16>
    %cst_202 = arith.constant dense<0.000000e+00> : vector<32x32xf32>
    %174 = tpu.matmul %171, %173, %cst_202 {dimension_numbers = #tpu.dot_dimension_numbers<[1], [0], [0], [1], [0, 0, 1, 1], [], []>} : vector<32x320xbf16>, vector<320x32xbf16>, vector<32x32xf32> -> vector<32x32xf32>
    %175 = arith.addf %169, %174 : vector<32x32xf32>
    %c32_203 = arith.constant 32 : index
    %c0_204 = arith.constant 0 : index
    %176 = vector.load %arg18[%c32_203, %c0_204] : memref<64x320xf32, #tpu.memory_space<vmem>>, vector<32x320xf32>
    %177 = arith.truncf %176 : vector<32x320xf32> to vector<32x320xbf16>
    %c4_205 = arith.constant 4 : index
    %c0_206 = arith.constant 0 : index
    %c0_207 = arith.constant 0 : index
    %178 = vector.load %arg8[%c4_205, %c0_206, %c0_207] : memref<5x320x32xbf16, #tpu.memory_space<vmem>>, vector<1x320x32xbf16>
    %179 = vector.shape_cast %178 : vector<1x320x32xbf16> to vector<320x32xbf16>
    %cst_208 = arith.constant dense<0.000000e+00> : vector<32x32xf32>
    %180 = tpu.matmul %177, %179, %cst_208 {dimension_numbers = #tpu.dot_dimension_numbers<[1], [0], [0], [1], [0, 0, 1, 1], [], []>} : vector<32x320xbf16>, vector<320x32xbf16>, vector<32x32xf32> -> vector<32x32xf32>
    %181 = arith.addf %175, %180 : vector<32x32xf32>
    %c0_209 = arith.constant 0 : index
    %c0_210 = arith.constant 0 : index
    %182 = vector.load %arg9[%c0_209, %c0_210] : memref<1x32xf32, #tpu.memory_space<vmem>>, vector<1x32xf32>
    %183 = vector.broadcast %182 : vector<1x32xf32> to vector<32x32xf32>
    %184 = arith.addf %181, %183 : vector<32x32xf32>
    %cst_211 = arith.constant 0.000000e+00 : f32
    %185 = vector.broadcast %cst_211 : f32 to vector<32x32xf32>
    %186 = arith.maximumf %184, %185 : vector<32x32xf32>
    %187 = vector.shape_cast %186 : vector<32x32xf32> to vector<4x8x32xf32>
    %188 = vector.shape_cast %187 : vector<4x8x32xf32> to vector<2x2x8x32xf32>
    %cst_212 = arith.constant dense<0xFF800000> : vector<2x8x32xf32>
    %189 = vector.multi_reduction <maximumf>, %188, %cst_212 [1] : vector<2x2x8x32xf32> to vector<2x8x32xf32>
    %c0_213 = arith.constant 0 : index
    %c0_214 = arith.constant 0 : index
    %c0_215 = arith.constant 0 : index
    %190 = vector.load %arg21[%c0_213, %c0_214, %c0_215] : memref<2x8x32xf32, #tpu.memory_space<vmem>>, vector<2x8x32xf32>
    tpu.vector_store %arg21[%c0_213, %c0_214, %c0_215], %189 {strides = array<i32>} : memref<2x8x32xf32, #tpu.memory_space<vmem>>, vector<2x8x32xf32>,
    %c0_216 = arith.constant 0 : index
    %c0_217 = arith.constant 0 : index
    %c0_218 = arith.constant 0 : index
    %191 = tpu.strided_load %arg21[%c0_216, %c0_217, %c0_218] {strides = array<i32: 1, 2, 1>} : memref<2x8x32xf32, #tpu.memory_space<vmem>>, vector<2x2x32xf32>
    %c0_219 = arith.constant 0 : index
    %c1_220 = arith.constant 1 : index
    %c0_221 = arith.constant 0 : index
    %192 = tpu.strided_load %arg21[%c0_219, %c1_220, %c0_221] {strides = array<i32: 1, 2, 1>} : memref<2x8x32xf32, #tpu.memory_space<vmem>>, vector<2x2x32xf32>
    %193 = arith.maximumf %191, %192 : vector<2x2x32xf32>
    %c0_222 = arith.constant 0 : index
    %c0_223 = arith.constant 0 : index
    %c0_224 = arith.constant 0 : index
    %194 = vector.load %arg10[%c0_222, %c0_223, %c0_224] : memref<2x2x32xf32, #tpu.memory_space<vmem>>, vector<2x2x32xf32>
    %195 = arith.mulf %193, %194 : vector<2x2x32xf32>
    %196 = vector.shape_cast %195 : vector<2x2x32xf32> to vector<1x2x2x32xf32>
    %cst_225 = arith.constant dense<0.000000e+00> : vector<1xf32>
    %197 = vector.multi_reduction <add>, %196, %cst_225 [1, 2, 3] : vector<1x2x2x32xf32> to vector<1xf32>
    %198 = vector.shape_cast %197 : vector<1xf32> to vector<1x1x1x1xf32>
    %199 = vector.extract %198[0, 0, 0, 0] : f32 from vector<1x1x1x1xf32>
    %c0_226 = arith.constant 0 : index
    %c0_227 = arith.constant 0 : index
    %200 = vector.load %arg11[%c0_226, %c0_227] : memref<1x128xf32, #tpu.memory_space<vmem>>, vector<1x128xf32>
    %201 = vector.broadcast %199 : f32 to vector<1x128xf32>
    %202 = arith.addf %200, %201 : vector<1x128xf32>
    %c0_228 = arith.constant 0 : index
    %c0_229 = arith.constant 0 : index
    %c0_230 = arith.constant 0 : index
    %203 = vector.load %arg12[%c0_228, %c0_229, %c0_230] : memref<1x1x128xf32, #tpu.memory_space<vmem>>, vector<1x1x128xf32>
    %204 = vector.shape_cast %203 : vector<1x1x128xf32> to vector<1x128xf32>
    %205 = vector.shape_cast %202 : vector<1x128xf32> to vector<1x1x128xf32>
    tpu.vector_store %arg12[%c0_228, %c0_229, %c0_230], %205 {strides = array<i32>} : memref<1x1x128xf32, #tpu.memory_space<vmem>>, vector<1x1x128xf32>,
    return
  }
  func.func @transform_0(%arg0: i32) -> (i32, i32, i32) {
    %c0_i32 = arith.constant 0 : i32
    %c0_i32_0 = arith.constant 0 : i32
    %c0_i32_1 = arith.constant 0 : i32
    return %arg0, %c0_i32, %c0_i32_0 : i32, i32, i32
  }
  func.func @transform_1(%arg0: i32) -> (i32, i32) {
    %c0_i32 = arith.constant 0 : i32
    %c0_i32_0 = arith.constant 0 : i32
    %c0_i32_1 = arith.constant 0 : i32
    return %c0_i32, %c0_i32_0 : i32, i32
  }
  func.func @transform_2(%arg0: i32) -> (i32, i32) {
    %c0_i32 = arith.constant 0 : i32
    %c0_i32_0 = arith.constant 0 : i32
    %c0_i32_1 = arith.constant 0 : i32
    return %c0_i32, %c0_i32_0 : i32, i32
  }
  func.func @transform_3(%arg0: i32) -> (i32, i32, i32) {
    %c0_i32 = arith.constant 0 : i32
    %c0_i32_0 = arith.constant 0 : i32
    %c0_i32_1 = arith.constant 0 : i32
    %c0_i32_2 = arith.constant 0 : i32
    return %c0_i32, %c0_i32_0, %c0_i32_1 : i32, i32, i32
  }
  func.func @transform_4(%arg0: i32) -> (i32, i32) {
    %c0_i32 = arith.constant 0 : i32
    %c0_i32_0 = arith.constant 0 : i32
    %c0_i32_1 = arith.constant 0 : i32
    return %c0_i32, %c0_i32_0 : i32, i32
  }
  func.func @transform_5(%arg0: i32) -> (i32, i32, i32) {
    %c0_i32 = arith.constant 0 : i32
    %c0_i32_0 = arith.constant 0 : i32
    %c0_i32_1 = arith.constant 0 : i32
    %c0_i32_2 = arith.constant 0 : i32
    return %c0_i32, %c0_i32_0, %c0_i32_1 : i32, i32, i32
  }
  func.func @transform_6(%arg0: i32) -> (i32, i32) {
    %c0_i32 = arith.constant 0 : i32
    %c0_i32_0 = arith.constant 0 : i32
    %c0_i32_1 = arith.constant 0 : i32
    return %c0_i32, %c0_i32_0 : i32, i32
  }
  func.func @transform_7(%arg0: i32) -> (i32, i32, i32) {
    %c0_i32 = arith.constant 0 : i32
    %c0_i32_0 = arith.constant 0 : i32
    %c0_i32_1 = arith.constant 0 : i32
    %c0_i32_2 = arith.constant 0 : i32
    return %c0_i32, %c0_i32_0, %c0_i32_1 : i32, i32, i32
  }
  func.func @transform_8(%arg0: i32) -> (i32, i32) {
    %c0_i32 = arith.constant 0 : i32
    %c0_i32_0 = arith.constant 0 : i32
    %c0_i32_1 = arith.constant 0 : i32
    return %c0_i32, %c0_i32_0 : i32, i32
  }
  func.func @transform_9(%arg0: i32) -> (i32, i32, i32) {
    %c0_i32 = arith.constant 0 : i32
    %c0_i32_0 = arith.constant 0 : i32
    %c0_i32_1 = arith.constant 0 : i32
    %c0_i32_2 = arith.constant 0 : i32
    return %c0_i32, %c0_i32_0, %c0_i32_1 : i32, i32, i32
  }
  func.func @transform_10(%arg0: i32) -> (i32, i32) {
    %c0_i32 = arith.constant 0 : i32
    %c0_i32_0 = arith.constant 0 : i32
    %c0_i32_1 = arith.constant 0 : i32
    return %c0_i32, %c0_i32_0 : i32, i32
  }
  func.func @transform_11(%arg0: i32) -> (i32, i32, i32) {
    %c0_i32 = arith.constant 0 : i32
    %c0_i32_0 = arith.constant 0 : i32
    %c0_i32_1 = arith.constant 0 : i32
    return %arg0, %c0_i32, %c0_i32_0 : i32, i32, i32
  }
}

</mosaic_0001>

<bundles_post_ra>
// kernel: convnet_forward.1
= control target key start
LH: loop header
LB: loop body
LE: loop exit
PB: predicated region body
PF: predicated region fallthrough
CT: control target
= control target key end

     0   :  { %s7134_s17 = smov 0   ;;  %s8722_s0 = inlined_call_operand.vmem [shape: bf16[2,256,128], index: 0, kind: input, shape index: {}]   ;;  %s8723_s1 = inlined_call_operand.vmem [shape: bf16[128,32], index: 1, kind: input, shape index: {}]   ;;  %s8724_s2 = inlined_call_operand.vmem [shape: f32[1,32], index: 2, kind: input, shape index: {}]   ;;  %s8725_s3 = inlined_call_operand.vmem [shape: bf16[5,160,64], index: 3, kind: input, shape index: {}]   ;;  %s8726_s4 = inlined_call_operand.vmem [shape: f32[1,64], index: 4, kind: input, shape index: {}]   ;;  %s8727_s5 = inlined_call_operand.vmem [shape: bf16[5,320,64], index: 5, kind: input, shape index: {}]   ;;  %s8728_s6 = inlined_call_operand.vmem [shape: f32[1,64], index: 6, kind: input, shape index: {}]   ;;  %s8729_s7 = inlined_call_operand.vmem [shape: bf16[5,320,32], index: 7, kind: input, shape index: {}]   ;;  %s8730_s8 = inlined_call_operand.vmem [shape: f32[1,32], index: 8, kind: input, shape index: {}]   ;;  %s8731_s9 = inlined_call_operand.vmem [shape: f32[2,2,32], index: 9, kind: input, shape index: {}]   ;;  %s8732_s10 = inlined_call_operand.vmem [shape: f32[1,128], index: 10, kind: input, shape index: {}]   ;;  %s8733_s11 = inlined_call_operand.vmem [shape: f32[2,1,128], index: 11, kind: output, shape index: {}]  }
   0x1 LB: > { %s5440_s18 = sadd.s32 4294967295, %s7067_s17   ;;  %p5444_p0 = scmp.ge.s32.totalorder %s7067_s17, 1  ;;  %s7067_s17 = sphi %s7134_s17, %s21_s17  }
   0x2   : > { %p337_p1 = scmp.lt.s32.totalorder %s7067_s17, 3 }
   0x4   : > { %p338_p2 = pnand %p5444_p0, %p337_p1 }
   0x5   : > { %v6787_v0 = vld [vmem:[%s8723_s1] sm:$0xff] (!%p338_p2)   ;;  %p375_p3 = scmp.lt.s32.totalorder (!%p338_p2), %s5440_s18, 1  ;;  %v6788_v1 = vld [vmem:[%s8723_s1 + $0x8] sm:$0xff] (!%p338_p2)   ;;  %v6789_v2 = vld [vmem:[%s8723_s1 + $0x10] sm:$0xff] (!%p338_p2)   ;;  %vm776_vm0 = vcmask (!%p338_p2), 261120   ;;  %vm778_vm1 = vcmask (!%p338_p2), 257024  }
   0x6   : > { %341 = sbr.rel (%p338_p2) target bundleno = 1894 (0x766), region = 64  ;;  %6532 = vmatprep.subr.bf16.mxu0 (!%p338_p2), %v6787_v0  ;;  %v6790_v3 = vld [vmem:[%s8723_s1 + $0x18] sm:$0xff] (!%p338_p2)   ;;  %v6791_v5 = vld [vmem:[%s8723_s1 + $0x20] sm:$0xff] (!%p338_p2)   ;;  %v6792_v6 = vld [vmem:[%s8723_s1 + $0x28] sm:$0xff] (!%p338_p2)   ;;  %v7069_v24 = vmov (!%p338_p2), 0.0   ;;  %s7070_s22 = smov (!%p338_p2), 32  }
   0x7   : > { %6533 = vmatpush3.bf16.msra.mxu0 (!%p338_p2), %v6787_v0  ;;  %v6793_v7 = vld [vmem:[%s8723_s1 + $0x30] sm:$0xff] (!%p338_p2)   ;;  %v6794_v8 = vld [vmem:[%s8723_s1 + $0x38] sm:$0xff] (!%p338_p2)   ;;  %786 = vst.msk [vmem:[#allocation2 + $0x40] sm:$0xff] (!%p338_p2), %vm776_vm0, %v7069_v24  ;;  %777 = vst.msk [vmem:[#allocation2] sm:$0xff] (!%p338_p2), %vm776_vm0, %v7069_v24  ;;  %s7071_s23 = smov (!%p338_p2), 64   ;;  %s7072_s24 = smov (!%p338_p2), 96  }
   0x8   : > { %6534 = vmatprep.subr.bf16.mxu0 (!%p338_p2), %v6788_v1  ;;  %787 = vst.msk [vmem:[#allocation2 + $0x48] sm:$0xf] (!%p338_p2), %vm778_vm1, %v7069_v24  ;;  %779 = vst.msk [vmem:[#allocation2 + $0x8] sm:$0xf] (!%p338_p2), %vm778_vm1, %v7069_v24  ;;  %v6811_v30 = vld [vmem:[%s8725_s3 + $0x50] sm:$0xff] (!%p338_p2)   ;;  %v7073_v31 = vmov (!%p338_p2), 0  }
   0x9   : > { %780 = vst.msk [vmem:[#allocation2 + $0x10] sm:$0xff] (!%p338_p2), %vm776_vm0, %v7069_v24  ;;  %782 = vst.msk [vmem:[#allocation2 + $0x20] sm:$0xff] (!%p338_p2), %vm776_vm0, %v7069_v24  ;;  %1328 = vmatprep.subr.bf16.mxu1 (!%p338_p2), %v7073_v31  ;;  %v6812_v32 = vld [vmem:[%s8725_s3 + $0x58] sm:$0xff] (!%p338_p2)   ;;  %v6815_v33 = vld [vmem:[%s8725_s3 + $0xa0] sm:$0xff] (!%p338_p2)   ;;  %vm998_vm2 = vcmask (!%p338_p2), 523520   ;;  %vm1144_vm3 = vcmask (!%p338_p2), 1048320  }
   0xa   : > { %781 = vst.msk [vmem:[#allocation2 + $0x18] sm:$0xf] (!%p338_p2), %vm778_vm1, %v7069_v24  ;;  %783 = vst.msk [vmem:[#allocation2 + $0x28] sm:$0xf] (!%p338_p2), %vm778_vm1, %v7069_v24  ;;  %1329 = vmatpush1.bf16.msra.mxu1 (!%p338_p2), %v6811_v30  ;;  %v6813_v35 = vld [vmem:[%s8725_s3 + $0x60] sm:$0xff] (!%p338_p2)   ;;  %v6817_v36 = vld [vmem:[%s8725_s3 + $0xa8] sm:$0xff] (!%p338_p2)  }
   0xb   : > { %6535 = vmatpush3.bf16.msra.mxu0 (!%p338_p2), %v6788_v1  ;;  %784 = vst.msk [vmem:[#allocation2 + $0x30] sm:$0xff] (!%p338_p2), %vm776_vm0, %v7069_v24  ;;  %788 = vst.msk [vmem:[#allocation2 + $0x50] sm:$0xff] (!%p338_p2), %vm776_vm0, %v7069_v24  ;;  %1330 = vmatprep.subr.bf16.mxu1 (!%p338_p2), %v7073_v31  ;;  %v6814_v37 = vld [vmem:[%s8725_s3 + $0x68] sm:$0xff] (!%p338_p2)   ;;  %v6819_v38 = vld [vmem:[%s8725_s3 + $0xb0] sm:$0xff] (!%p338_p2)   ;;  %vm1071_vm4 = vcmask (!%p338_p2), 785920   ;;  %vm2123_vm5 = vcmask (!%p338_p2), 523264  }
   0xc   : > { %6536 = vmatprep.subr.bf16.mxu0 (!%p338_p2), %v6789_v2  ;;  %785 = vst.msk [vmem:[#allocation2 + $0x38] sm:$0xf] (!%p338_p2), %vm778_vm1, %v7069_v24  ;;  %789 = vst.msk [vmem:[#allocation2 + $0x58] sm:$0xf] (!%p338_p2), %vm778_vm1, %v7069_v24  ;;  %v6816_v39 = vld [vmem:[%s8725_s3 + $0x70] sm:$0xff] (!%p338_p2)   ;;  %v6821_v40 = vld [vmem:[%s8725_s3 + $0xb8] sm:$0xff] (!%p338_p2)  }
   0xd   : > { %s8735_s18 = smov (!%p375_p3, %s5440_s18), 1  ;;  %790 = vst.msk [vmem:[#allocation2 + $0x60] sm:$0xff] %vm776_vm0, %v7069_v24  ;;  %792 = vst.msk [vmem:[#allocation2 + $0x70] sm:$0xff] %vm776_vm0, %v7069_v24  ;;  %v6818_v41 = vld [vmem:[%s8725_s3 + $0x78] sm:$0xff]   ;;  %v6820_v43 = vld [vmem:[%s8725_s3 + $0x80] sm:$0xff]   ;;  %vm2125_vm6 = vcmask 519168  }
   0xe   : > { %s6167_s25 = sshll.u32 %s8735_s18, 7  ;;  %791 = vst.msk [vmem:[#allocation2 + $0x68] sm:$0xf] %vm778_vm1, %v7069_v24  ;;  %793 = vst.msk [vmem:[#allocation2 + $0x78] sm:$0xf] %vm778_vm1, %v7069_v24  ;;  %1331 = vmatpush1.bf16.msra.mxu1 %v6812_v32  ;;  %vm2237_vm7 = vcmask 1048064  }
   0xf   : > { %s7157_s28 = scalar_lea.vmem %s8722_s0, %s6167_s25  ;;  %6537 = vmatpush3.bf16.msra.mxu0 %v6789_v2  ;;  %794 = vst.msk [vmem:[#allocation2 + $0x80] sm:$0xff] %vm776_vm0, %v7069_v24  ;;  %796 = vst.msk [vmem:[#allocation2 + $0x90] sm:$0xff] %vm776_vm0, %v7069_v24  ;;  %v1157_v29 = vld [vmem:[#allocation2 + $0x4] sm:$0xff]  ;;  %1332 = vmatprep.subr.bf16.mxu1 %v7073_v31  ;;  %v7293_v44 = vld [vmem:[%s8724_s2] ss:$0 sm:$0xff]  ;;  %vm5376_vm8 = vcmask 254976   ;;  %s382_s25 = scalar_lea.vmem %s8733_s11, %s8735_s18 }
  0x10   : > { %v6795_v4 = vld [vmem:[%s7157_s28] sm:$0xff]   ;;  %6538 = vmatprep.subr.bf16.mxu0 %v6790_v3  ;;  %v6796_v9 = vld [vmem:[%s7157_s28 + $0x8] sm:$0xff]   ;;  %v6797_v10 = vld [vmem:[%s7157_s28 + $0x10] sm:$0xff]   ;;  %795 = vst.msk [vmem:[#allocation2 + $0x88] sm:$0xf] %vm778_vm1, %v7069_v24 }
  0x11   : > { %6548 = vmatprep.mubr.bf16.mxu0 %v6795_v4  ;;  %v6798_v11 = vld [vmem:[%s7157_s28 + $0x18] sm:$0xff]   ;;  %v6799_v12 = vld [vmem:[%s7157_s28 + $0x20] sm:$0xff]   ;;  %v6800_v13 = vld [vmem:[%s7157_s28 + $0x28] sm:$0xff]   ;;  %797 = vst.msk [vmem:[#allocation2 + $0x98] sm:$0xf] %vm778_vm1, %v7069_v24 }
  0x12   : > { %v6801_v14 = vld [vmem:[%s7157_s28 + $0x30] sm:$0xff]   ;;  %v6802_v15 = vld [vmem:[%s7157_s28 + $0x38] sm:$0xff]   ;;  %v6803_v16 = vld [vmem:[%s7157_s28 + $0x40] sm:$0xff]   ;;  %798 = vst.msk [vmem:[#allocation2 + $0xa0] sm:$0xff] %vm776_vm0, %v7069_v24  ;;  %1333 = vmatpush1.bf16.msra.mxu1 %v6813_v35 }
  0x13   : > { %6539 = vmatpush3.bf16.msra.mxu0 %v6790_v3  ;;  %v6804_v17 = vld [vmem:[%s7157_s28 + $0x48] sm:$0xff]   ;;  %v6805_v18 = vld [vmem:[%s7157_s28 + $0x50] sm:$0xff]   ;;  %v6806_v19 = vld [vmem:[%s7157_s28 + $0x58] sm:$0xff]   ;;  %799 = vst.msk [vmem:[#allocation2 + $0xa8] sm:$0xf] %vm778_vm1, %v7069_v24  ;;  %1334 = vmatprep.subr.bf16.mxu1 %v7073_v31 }
  0x14   : > { %6540 = vmatprep.subr.bf16.mxu0 %v6791_v5  ;;  %v6807_v20 = vld [vmem:[%s7157_s28 + $0x60] sm:$0xff]   ;;  %v6808_v21 = vld [vmem:[%s7157_s28 + $0x68] sm:$0xff]   ;;  %v6809_v22 = vld [vmem:[%s7157_s28 + $0x70] sm:$0xff]   ;;  %800 = vst.msk [vmem:[#allocation2 + $0xb0] sm:$0xff] %vm776_vm0, %v7069_v24 }
  0x15   : > { %v6810_v23 = vld [vmem:[%s7157_s28 + $0x78] sm:$0xff]   ;;  %801 = vst.msk [vmem:[#allocation2 + $0xb8] sm:$0xf] %vm778_vm1, %v7069_v24  ;;  %v915_v34 = vld [vmem:[#allocation2 + $0x10] sm:$0xff] }
  0x16   : > { %v939_v25 = vld [vmem:[#allocation2 + $0x11] sm:$0xff]  ;;  %1169 = vst.msk [vmem:[#allocation5 + $0x8] sm:$0xff] %vm776_vm0, %v1157_v29  ;;  %927 = vst.msk [vmem:[#allocation5 + $0x10] sm:$0xff] %vm776_vm0, %v915_v34  ;;  %1335 = vmatpush1.bf16.msra.mxu1 %v6814_v37 }
  0x17   : > { %6541 = vmatpush3.bf16.msra.mxu0 %v6791_v5  ;;  %964 = vrot.lane.b32.xlu0 %v939_v25, %s7070_s22  ;;  %v1012_v26 = vld [vmem:[#allocation2 + $0x12] sm:$0xff]  ;;  %v6823_v25 = vld [vmem:[%s8725_s3 + $0xc0] sm:$0xff]   ;;  %2124 = vst.msk [vmem:[#allocation3] sm:$0xff] %vm2123_vm5, %v7069_v24  ;;  %2127 = vst.msk [vmem:[#allocation3 + $0x10] sm:$0xff] %vm2123_vm5, %v7069_v24 }
  0x18   : > { %6542 = vmatprep.subr.bf16.mxu0 %v6792_v6  ;;  %v1085_v27 = vld [vmem:[#allocation2 + $0x13] sm:$0xff]  ;;  %1037 = vrot.lane.b32.xlu1 %v1012_v26, %s7071_s23  ;;  %2129 = vst.msk [vmem:[#allocation3 + $0x20] sm:$0xff] %vm2123_vm5, %v7069_v24  ;;  %2131 = vst.msk [vmem:[#allocation3 + $0x30] sm:$0xff] %vm2123_vm5, %v7069_v24 }
  0x19   : > { %v1158_v28 = vld [vmem:[#allocation2 + $0x14] sm:$0xff]  ;;  %1336 = vmatprep.subr.bf16.mxu1 %v7073_v31  ;;  %2133 = vst.msk [vmem:[#allocation3 + $0x40] sm:$0xff] %vm2123_vm5, %v7069_v24  ;;  %2135 = vst.msk [vmem:[#allocation3 + $0x50] sm:$0xff] %vm2123_vm5, %v7069_v24 }
  0x1a   : > { %1170 = vst.msk [vmem:[#allocation5 + $0x18] sm:$0xff] %vm776_vm0, %v1158_v28  ;;  %1337 = vmatpush1.bf16.msra.mxu1 %v6816_v39  ;;  %v1167_v42 = vld [vmem:[#allocation2 + $0xa4] sm:$0xff]  ;;  %v6824_v37 = vld [vmem:[%s8725_s3 + $0x90] sm:$0xff]  }
  0x1b   : > { %6543 = vmatpush3.bf16.msra.mxu0 %v6792_v6  ;;  %1110 = vrot.lane.b32.xlu0 %v1085_v27, %s7072_s24  ;;  %1179 = vst.msk [vmem:[#allocation5 + $0xa8] sm:$0xff] %vm776_vm0, %v1167_v42 }
  0x1c   : > { %6544 = vmatprep.subr.bf16.mxu0 %v6793_v7  ;;  %1338 = vmatprep.subr.bf16.mxu1 %v7073_v31  ;;  %2137 = vst.msk [vmem:[#allocation3 + $0x60] sm:$0xff] %vm2123_vm5, %v7069_v24  ;;  %2139 = vst.msk [vmem:[#allocation3 + $0x70] sm:$0xff] %vm2123_vm5, %v7069_v24 }
  0x1d   : > { %3758 = vst.msk [vmem:[#allocation4] sm:$0xff] %vm2123_vm5, %v7069_v24  ;;  %3760 = vst.msk [vmem:[#allocation4 + $0x10] sm:$0xff] %vm2123_vm5, %v7069_v24 }
  0x1e   : > { %1339 = vmatpush1.bf16.msra.mxu1 %v6818_v41  ;;  %3762 = vst.msk [vmem:[#allocation4 + $0x20] sm:$0xff] %vm2123_vm5, %v7069_v24  ;;  %3764 = vst.msk [vmem:[#allocation4 + $0x30] sm:$0xff] %vm2123_vm5, %v7069_v24 }
  0x1f   : > { %6545 = vmatpush3.bf16.msra.mxu0 %v6793_v7  ;;  %1340 = vmatprep.subr.bf16.mxu1 %v7073_v31  ;;  %3766 = vst.msk [vmem:[#allocation4 + $0x40] sm:$0xff] %vm2123_vm5, %v7069_v24  ;;  %3768 = vst.msk [vmem:[#allocation4 + $0x50] sm:$0xff] %vm2123_vm5, %v7069_v24 }
  0x20   : > { %6546 = vmatprep.subr.bf16.mxu0 %v6794_v8  ;;  %3770 = vst.msk [vmem:[#allocation4 + $0x60] sm:$0xff] %vm2123_vm5, %v7069_v24  ;;  %3772 = vst.msk [vmem:[#allocation4 + $0x70] sm:$0xff] %vm2123_vm5, %v7069_v24 }
  0x21   : > { %2126 = vst.msk [vmem:[#allocation3 + $0x8] sm:$0xf] %vm2125_vm6, %v7069_v24  ;;  %2128 = vst.msk [vmem:[#allocation3 + $0x18] sm:$0xf] %vm2125_vm6, %v7069_v24 }
  0x22   : > { %1341 = vmatpush1.bf16.msra.mxu1 %v6820_v43  ;;  %2130 = vst.msk [vmem:[#allocation3 + $0x28] sm:$0xf] %vm2125_vm6, %v7069_v24  ;;  %2132 = vst.msk [vmem:[#allocation3 + $0x38] sm:$0xf] %vm2125_vm6, %v7069_v24 }
  0x23   : > { %6547 = vmatpush3.bf16.msra.mxu0 %v6794_v8  ;;  %1342 = vmatprep.subr.bf16.mxu1 %v7073_v31  ;;  %2134 = vst.msk [vmem:[#allocation3 + $0x48] sm:$0xf] %vm2125_vm6, %v7069_v24  ;;  %2136 = vst.msk [vmem:[#allocation3 + $0x58] sm:$0xf] %vm2125_vm6, %v7069_v24 }
  0x24   : > { %1647 = vmatprep.subr.bf16.mxu0 %v7073_v31  ;;  %2138 = vst.msk [vmem:[#allocation3 + $0x68] sm:$0xf] %vm2125_vm6, %v7069_v24  ;;  %2140 = vst.msk [vmem:[#allocation3 + $0x78] sm:$0xf] %vm2125_vm6, %v7069_v24 }
  0x25   : > { %3759 = vst.msk [vmem:[#allocation4 + $0x8] sm:$0xf] %vm2125_vm6, %v7069_v24  ;;  %3761 = vst.msk [vmem:[#allocation4 + $0x18] sm:$0xf] %vm2125_vm6, %v7069_v24 }
  0x26   : > { %6549 = vmatmul.mubr.bf16.vlgmr.msra.gmra.mrb[0].mxu0 %v6796_v9  ;;  %3763 = vst.msk [vmem:[#allocation4 + $0x28] sm:$0xf] %vm2125_vm6, %v7069_v24  ;;  %3765 = vst.msk [vmem:[#allocation4 + $0x38] sm:$0xf] %vm2125_vm6, %v7069_v24 }
  0x27   : > { %6552 = vmatprep.mubr.bf16.mxu0 %v6797_v10  ;;  %1648 = vmatpush1.bf16.msra.mxu0 %v6815_v33  ;;  %3767 = vst.msk [vmem:[#allocation4 + $0x48] sm:$0xf] %vm2125_vm6, %v7069_v24  ;;  %3769 = vst.msk [vmem:[#allocation4 + $0x58] sm:$0xf] %vm2125_vm6, %v7069_v24 }
  0x28   : > { %1649 = vmatprep.subr.bf16.mxu0 %v7073_v31  ;;  %3771 = vst.msk [vmem:[#allocation4 + $0x68] sm:$0xf] %vm2125_vm6, %v7069_v24  ;;  %3773 = vst.msk [vmem:[#allocation4 + $0x78] sm:$0xf] %vm2125_vm6, %v7069_v24  ;;  %v6861_v24 = vld [vmem:[%s8727_s5 + $0x120] sm:$0xff]  }
  0x2b   : > { %1650 = vmatpush1.bf16.msra.mxu0 %v6817_v36 }
  0x2c   : > { %1651 = vmatprep.subr.bf16.mxu0 %v7073_v31 }
  0x2e   : > { %6553 = vmatmul.mubr.bf16.gmra.mrb[4].mxu0 %v6798_v11 }
  0x2f   : > { %6556 = vmatprep.mubr.bf16.mxu0 %v6799_v12  ;;  %1652 = vmatpush1.bf16.msra.mxu0 %v6819_v38  ;;  %v6825_v38 = vld [vmem:[%s8725_s3 + $0xc8] sm:$0xff]  }
  0x30   : > { %1653 = vmatprep.subr.bf16.mxu0 %v7073_v31 }
  0x33   : > { %1654 = vmatpush1.bf16.msra.mxu0 %v6821_v40 }
  0x34   : > { %1655 = vmatprep.subr.bf16.mxu0 %v7073_v31 }
  0x36   : > { %6557 = vmatmul.mubr.bf16.gmra.mrb[8].mxu0 %v6800_v13 }
  0x37   : > { %6560 = vmatprep.mubr.bf16.mxu0 %v6801_v14  ;;  %1656 = vmatpush1.bf16.msra.mxu0 %v6823_v25 }
  0x38   : > { %1657 = vmatprep.subr.bf16.mxu0 %v7073_v31 }
  0x3b   : > { %1658 = vmatpush1.bf16.msra.mxu0 %v6825_v38 }
  0x3c   : > { %1659 = vmatprep.subr.bf16.mxu0 %v7073_v31 }
  0x3e   : > { %6561 = vmatmul.mubr.bf16.gmra.mrb[12].mxu0 %v6802_v15 }
  0x3f   : > { %6564 = vmatprep.mubr.bf16.mxu0 %v6803_v16 }
  0x46   : > { %6565 = vmatmul.mubr.bf16.gmra.mrb[16].mxu0 %v6804_v17 }
  0x47   : > { %6568 = vmatprep.mubr.bf16.mxu0 %v6805_v18 }
  0x4e   : > { %6569 = vmatmul.mubr.bf16.gmra.mrb[20].mxu0 %v6806_v19 }
  0x4f   : > { %6572 = vmatprep.mubr.bf16.mxu0 %v6807_v20 }
  0x56   : > { %6573 = vmatmul.mubr.bf16.gmra.mrb[24].mxu0 %v6808_v21 }
  0x57   : > { %6576 = vmatprep.mubr.bf16.mxu0 %v6809_v22 }
  0x5e   : > { %6577 = vmatmul.mubr.bf16.gmra.mrb[28].mxu0 %v6810_v23  ;;  %v6822_v23 = vld [vmem:[%s8725_s3 + $0x88] sm:$0xff]  }
  0x5f   : > { %1343 = vmatpush1.bf16.msra.mxu1 %v6822_v23 }
  0x60   : > { %1344 = vmatprep.subr.bf16.mxu1 %v7073_v31 }
  0x63   : > { %1345 = vmatpush1.bf16.msra.mxu1 %v6824_v37 }
  0x64   : > { %1346 = vmatprep.subr.bf16.mxu1 %v7073_v31 }
  0x89   : > { %v965_v61 = vpop.permute.xlu0 %964 }
  0x8a   : > { %1000 = vst.msk [vmem:[#allocation5 + $0x10] sm:$0xff] %vm998_vm2, %v965_v61  ;;  %v1038_v8 = vpop.permute.xlu1 %1037 }
  0x8b   : > { %1073 = vst.msk [vmem:[#allocation5 + $0x10] sm:$0xff] %vm1071_vm4, %v1038_v8 }
  0x8d   : > { %v1111_v11 = vpop.permute.xlu0 %1110 }
  0x8e   : > { %1146 = vst.msk [vmem:[#allocation5 + $0x10] sm:$0xff] %vm1144_vm3, %v1111_v11 }
  0xf9   : > { %v6550_v45 = vpop.f32.mrb[0].mxu0 }
  0xfa   : > { %v626_v46 = vadd.f32 %v6550_v45, %v7293_v44  ;;  %v617_v47 = vpop.f32.mrb[1].mxu0 }
  0xfb   : > { %v618_v48 = vadd.f32 %v7293_v44, %v617_v47  ;;  %v6551_v49 = vpop.f32.mrb[2].mxu0 }
  0xfc   : > { %v746_v50 = vmax.f32 %v626_v46, 0.0  ;;  %v629_v51 = vadd.f32 %v6551_v49, %v7293_v44  ;;  %v620_v52 = vpop.f32.mrb[3].mxu0  ;;  %v6827_v49 = vld [vmem:[%s8725_s3 + $0xd0] sm:$0xff]  }
  0xfd   : > { %v744_v53 = vmax.f32 %v618_v48, 0.0  ;;  %v621_v54 = vadd.f32 %v7293_v44, %v620_v52  ;;  %v6826_v48 = vld [vmem:[%s8725_s3 + $0x98] sm:$0xff]   ;;  %1660 = vmatpush1.bf16.msra.mxu0 %v6827_v49 }
  0xfe   : > { %v803_v55 = vsel %vm776_vm0, %v746_v50, -inf  ;;  %v747_v56 = vmax.f32 %v629_v51, 0.0  ;;  %1347 = vmatpush1.bf16.msra.mxu1 %v6826_v48  ;;  %1661 = vmatprep.subr.bf16.mxu0 %v7073_v31 }
  0xff   : > { %v802_v57 = vsel %vm776_vm0, %v744_v53, -inf  ;;  %v745_v58 = vmax.f32 %v621_v54, 0.0  ;;  %1465 = vmatprep.subr.bf16.mxu1 %v7073_v31 }
 0x100   : > { %v804_v59 = vmax.f32 %v802_v57, %v803_v55  ;;  %v806_v60 = vsel %vm776_vm0, %v747_v56, -inf }
 0x101   : > { %v805_v62 = vsel %vm776_vm0, %v745_v58, -inf  ;;  %v6554_v63 = vpop.f32.mrb[4].mxu0 }
 0x102   : > { %850 = vst.msk [vmem:[#allocation8] sm:$0xff] %vm776_vm0, %v804_v59  ;;  %v807_v0 = vmax.f32 %v805_v62, %v806_v60  ;;  %v642_v1 = vadd.f32 %v6554_v63, %v7293_v44  ;;  %v633_v2 = vpop.f32.mrb[5].mxu0 }
 0x103   : > { %v634_v3 = vadd.f32 %v7293_v44, %v633_v2  ;;  %v6555_v4 = vpop.f32.mrb[6].mxu0 }
 0x104   : > { %851 = vst.msk [vmem:[#allocation8 + $0x8] sm:$0xff] %vm776_vm0, %v807_v0  ;;  %v750_v5 = vmax.f32 %v642_v1, 0.0  ;;  %v645_v6 = vadd.f32 %v6555_v4, %v7293_v44  ;;  %v636_v7 = vpop.f32.mrb[7].mxu0 }
 0x105   : > { %v748_v9 = vmax.f32 %v634_v3, 0.0  ;;  %v637_v10 = vadd.f32 %v7293_v44, %v636_v7  ;;  %v6828_v7 = vld [vmem:[%s8725_s3 + $0xd8] sm:$0xff]  }
 0x106   : > { %v809_v12 = vsel %vm776_vm0, %v750_v5, -inf  ;;  %v751_v13 = vmax.f32 %v645_v6, 0.0  ;;  %1662 = vmatpush1.bf16.msra.mxu0 %v6828_v7 }
 0x107   : > { %v808_v14 = vsel %vm776_vm0, %v748_v9, -inf  ;;  %v749_v15 = vmax.f32 %v637_v10, 0.0  ;;  %1663 = vmatprep.subr.bf16.mxu0 %v7073_v31 }
 0x108   : > { %v810_v16 = vmax.f32 %v808_v14, %v809_v12  ;;  %v812_v17 = vsel %vm776_vm0, %v751_v13, -inf  ;;  %v6829_v13 = vld [vmem:[%s8725_s3 + $0xe0] sm:$0xff]  }
 0x109   : > { %v811_v18 = vsel %vm776_vm0, %v749_v15, -inf  ;;  %v6558_v19 = vpop.f32.mrb[8].mxu0 }
 0x10a   : > { %852 = vst.msk [vmem:[#allocation8 + $0x10] sm:$0xff] %vm776_vm0, %v810_v16  ;;  %v813_v20 = vmax.f32 %v811_v18, %v812_v17  ;;  %v658_v21 = vadd.f32 %v6558_v19, %v7293_v44  ;;  %v649_v22 = vpop.f32.mrb[9].mxu0  ;;  %1664 = vmatpush1.bf16.msra.mxu0 %v6829_v13 }
 0x10b   : > { %v866_v26 = vld [vmem:[#allocation8] ss:$2 sm:$0xff]  ;;  %v882_v27 = vld [vmem:[#allocation8 + $0x1] ss:$2 sm:$0xff]  ;;  %v650_v28 = vadd.f32 %v7293_v44, %v649_v22  ;;  %v6559_v29 = vpop.f32.mrb[10].mxu0  ;;  %1665 = vmatprep.subr.bf16.mxu0 %v7073_v31 }
 0x10c   : > { %v897_v30 = vmax.f32 %v866_v26, %v882_v27  ;;  %853 = vst.msk [vmem:[#allocation8 + $0x18] sm:$0xff] %vm776_vm0, %v813_v20  ;;  %v754_v32 = vmax.f32 %v658_v21, 0.0  ;;  %v661_v33 = vadd.f32 %v6559_v29, %v7293_v44  ;;  %v652_v34 = vpop.f32.mrb[11].mxu0  ;;  %v7380_v26 = vld [vmem:[#allocation5 + $0x18] sm:$0xff] }
 0x10d   : > { %v752_v35 = vmax.f32 %v650_v28, 0.0  ;;  %v653_v36 = vadd.f32 %v7293_v44, %v652_v34 }
 0x10e   : > { %v815_v39 = vsel %vm776_vm0, %v754_v32, -inf  ;;  %v755_v40 = vmax.f32 %v661_v33, 0.0  ;;  %906 = vst.msk [vmem:[#allocation2 + $0x22] sm:$0xff] %vm776_vm0, %v897_v30 }
 0x10f   : > { %v814_v41 = vsel %vm776_vm0, %v752_v35, -inf  ;;  %v753_v42 = vmax.f32 %v653_v36, 0.0 }
 0x110   : > { %v816_v43 = vmax.f32 %v814_v41, %v815_v39  ;;  %v818_v45 = vsel %vm776_vm0, %v755_v40, -inf  ;;  %v6830_v39 = vld [vmem:[%s8725_s3 + $0xe8] sm:$0xff]  }
 0x111   : > { %v817_v46 = vsel %vm776_vm0, %v753_v42, -inf  ;;  %v6562_v47 = vpop.f32.mrb[12].mxu0  ;;  %1666 = vmatpush1.bf16.msra.mxu0 %v6830_v39 }
 0x112   : > { %854 = vst.msk [vmem:[#allocation8 + $0x20] sm:$0xff] %vm776_vm0, %v816_v43  ;;  %v819_v50 = vmax.f32 %v817_v46, %v818_v45  ;;  %v674_v51 = vadd.f32 %v6562_v47, %v7293_v44  ;;  %v665_v52 = vpop.f32.mrb[13].mxu0  ;;  %2027 = vmatprep.subr.bf16.mxu0 %v7073_v31 }
 0x113   : > { %v868_v53 = vld [vmem:[#allocation8 + $0x10] ss:$2 sm:$0xff]  ;;  %v884_v54 = vld [vmem:[#allocation8 + $0x11] ss:$2 sm:$0xff]  ;;  %v666_v55 = vadd.f32 %v7293_v44, %v665_v52  ;;  %v6563_v56 = vpop.f32.mrb[14].mxu0 }
 0x114   : > { %v898_v57 = vmax.f32 %v868_v53, %v884_v54  ;;  %855 = vst.msk [vmem:[#allocation8 + $0x28] sm:$0xff] %vm776_vm0, %v819_v50  ;;  %v758_v58 = vmax.f32 %v674_v51, 0.0  ;;  %v677_v59 = vadd.f32 %v6563_v56, %v7293_v44  ;;  %v668_v60 = vpop.f32.mrb[15].mxu0 }
 0x115   : > { %v756_v61 = vmax.f32 %v666_v55, 0.0  ;;  %v669_v62 = vadd.f32 %v7293_v44, %v668_v60  ;;  %v1013_v63 = vld [vmem:[#allocation2 + $0x22] sm:$0xff] }
 0x116   : > { %v940_v0 = vld [vmem:[#allocation2 + $0x21] sm:$0xff]  ;;  %907 = vst.msk [vmem:[#allocation2 + $0x32] sm:$0xff] %vm776_vm0, %v898_v57  ;;  %v821_v1 = vsel %vm776_vm0, %v758_v58, -inf  ;;  %v759_v2 = vmax.f32 %v677_v59, 0.0  ;;  %1039 = vrot.lane.b32.xlu1 %v1013_v63, %s7071_s23 }
 0x117   : > { %966 = vrot.lane.b32.xlu0 %v940_v0, %s7070_s22  ;;  %v1159_v3 = vld [vmem:[#allocation2 + $0x24] sm:$0xff]  ;;  %v820_v5 = vsel %vm776_vm0, %v756_v61, -inf  ;;  %v757_v6 = vmax.f32 %v669_v62, 0.0 }
 0x118   : > { %v916_v4 = vld [vmem:[#allocation2 + $0x20] sm:$0xff]  ;;  %1171 = vst.msk [vmem:[#allocation5 + $0x28] sm:$0xff] %vm776_vm0, %v1159_v3  ;;  %v822_v8 = vmax.f32 %v820_v5, %v821_v1  ;;  %v824_v9 = vsel %vm776_vm0, %v759_v2, -inf }
 0x119   : > { %928 = vst.msk [vmem:[#allocation5 + $0x20] sm:$0xff] %vm776_vm0, %v916_v4  ;;  %v823_v10 = vsel %vm776_vm0, %v757_v6, -inf  ;;  %v6566_v11 = vpop.f32.mrb[16].mxu0  ;;  %v1086_v12 = vld [vmem:[#allocation2 + $0x23] sm:$0xff] }
 0x11a   : > { %856 = vst.msk [vmem:[#allocation8 + $0x30] sm:$0xff] %vm776_vm0, %v822_v8  ;;  %v825_v14 = vmax.f32 %v823_v10, %v824_v9  ;;  %v690_v15 = vadd.f32 %v6566_v11, %v7293_v44  ;;  %v681_v16 = vpop.f32.mrb[17].mxu0  ;;  %1112 = vrot.lane.b32.xlu1 %v1086_v12, %s7072_s24 }
 0x11b   : > { %v870_v17 = vld [vmem:[#allocation8 + $0x20] ss:$2 sm:$0xff]  ;;  %v886_v18 = vld [vmem:[#allocation8 + $0x21] ss:$2 sm:$0xff]  ;;  %v682_v19 = vadd.f32 %v7293_v44, %v681_v16  ;;  %v6567_v20 = vpop.f32.mrb[18].mxu0 }
 0x11c   : > { %v899_v21 = vmax.f32 %v870_v17, %v886_v18  ;;  %857 = vst.msk [vmem:[#allocation8 + $0x38] sm:$0xff] %vm776_vm0, %v825_v14  ;;  %v762_v22 = vmax.f32 %v690_v15, 0.0  ;;  %v693_v23 = vadd.f32 %v6567_v20, %v7293_v44  ;;  %v684_v25 = vpop.f32.mrb[19].mxu0 }
 0x11d   : > { %v760_v27 = vmax.f32 %v682_v19, 0.0  ;;  %v685_v28 = vadd.f32 %v7293_v44, %v684_v25  ;;  %v941_v29 = vld [vmem:[#allocation2 + $0x31] sm:$0xff] }
 0x11e   : > { %v1160_v30 = vld [vmem:[#allocation2 + $0x34] sm:$0xff]  ;;  %908 = vst.msk [vmem:[#allocation2 + $0x42] sm:$0xff] %vm776_vm0, %v899_v21  ;;  %v827_v32 = vsel %vm776_vm0, %v762_v22, -inf  ;;  %v763_v33 = vmax.f32 %v693_v23, 0.0  ;;  %968 = vrot.lane.b32.xlu0 %v941_v29, %s7070_s22 }
 0x11f   : > { %1172 = vst.msk [vmem:[#allocation5 + $0x38] sm:$0xff] %vm776_vm0, %v1160_v30  ;;  %v1186_v34 = vld [vmem:[#allocation5 + $0x28] sm:$0xff]  ;;  %v917_v35 = vld [vmem:[#allocation2 + $0x30] sm:$0xff]  ;;  %v826_v36 = vsel %vm776_vm0, %v760_v27, -inf  ;;  %v761_v37 = vmax.f32 %v685_v28, 0.0 }
 0x120   : > { %v1228_v38 = vpack.c.bf16 %v1186_v34, %v7380_v26  ;;  %929 = vst.msk [vmem:[#allocation5 + $0x30] sm:$0xff] %vm776_vm0, %v917_v35  ;;  %v828_v40 = vmax.f32 %v826_v36, %v827_v32  ;;  %v830_v41 = vsel %vm776_vm0, %v763_v33, -inf  ;;  %v1014_v45 = vld [vmem:[#allocation2 + $0x32] sm:$0xff] }
 0x121   : > { %v829_v42 = vsel %vm776_vm0, %v761_v37, -inf  ;;  %v6570_v43 = vpop.f32.mrb[20].mxu0  ;;  %v1087_v57 = vld [vmem:[#allocation2 + $0x33] sm:$0xff] }
 0x122   : > { %5502 = vmatprep.mubr.msk.bf16.mxu1 %vm776_vm0, %v1228_v38  ;;  %858 = vst.msk [vmem:[#allocation8 + $0x40] sm:$0xff] %vm776_vm0, %v828_v40  ;;  %v831_v46 = vmax.f32 %v829_v42, %v830_v41  ;;  %v706_v47 = vadd.f32 %v6570_v43, %v7293_v44  ;;  %v697_v48 = vpop.f32.mrb[21].mxu0  ;;  %1041 = vrot.lane.b32.xlu0 %v1014_v45, %s7071_s23 }
 0x123   : > { %v872_v49 = vld [vmem:[#allocation8 + $0x30] ss:$2 sm:$0xff]  ;;  %v888_v50 = vld [vmem:[#allocation8 + $0x31] ss:$2 sm:$0xff]  ;;  %v698_v51 = vadd.f32 %v7293_v44, %v697_v48  ;;  %v6571_v52 = vpop.f32.mrb[22].mxu0 }
 0x124   : > { %v900_v53 = vmax.f32 %v872_v49, %v888_v50  ;;  %859 = vst.msk [vmem:[#allocation8 + $0x48] sm:$0xff] %vm776_vm0, %v831_v46  ;;  %v766_v54 = vmax.f32 %v706_v47, 0.0  ;;  %v709_v55 = vadd.f32 %v6571_v52, %v7293_v44  ;;  %v700_v56 = vpop.f32.mrb[23].mxu0 }
 0x125   : > { %v1161_v58 = vld [vmem:[#allocation2 + $0x44] sm:$0xff]  ;;  %v764_v60 = vmax.f32 %v698_v51, 0.0  ;;  %v701_v61 = vadd.f32 %v7293_v44, %v700_v56 }
 0x126   : > { %v7404_v59 = vld [vmem:[#allocation5 + $0x38] sm:$0xff]  ;;  %v942_v62 = vld [vmem:[#allocation2 + $0x41] sm:$0xff]  ;;  %909 = vst.msk [vmem:[#allocation2 + $0x52] sm:$0xff] %vm776_vm0, %v900_v53  ;;  %1173 = vst.msk [vmem:[#allocation5 + $0x48] sm:$0xff] %vm776_vm0, %v1161_v58  ;;  %v833_v0 = vsel %vm776_vm0, %v766_v54, -inf  ;;  %v767_v1 = vmax.f32 %v709_v55, 0.0  ;;  %1114 = vrot.lane.b32.xlu0 %v1087_v57, %s7072_s24 }
 0x127   : > { %v7410_v63 = vpack.c.bf16 %v7404_v59, %v1186_v34  ;;  %970 = vrot.lane.b32.xlu1 %v942_v62, %s7070_s22  ;;  %v918_v2 = vld [vmem:[#allocation2 + $0x40] sm:$0xff]  ;;  %v832_v3 = vsel %vm776_vm0, %v764_v60, -inf  ;;  %v765_v4 = vmax.f32 %v701_v61, 0.0 }
 0x128   : > { %930 = vst.msk [vmem:[#allocation5 + $0x40] sm:$0xff] %vm776_vm0, %v918_v2  ;;  %v834_v5 = vmax.f32 %v832_v3, %v833_v0  ;;  %v836_v6 = vsel %vm776_vm0, %v767_v1, -inf  ;;  %v1015_v9 = vld [vmem:[#allocation2 + $0x42] sm:$0xff] }
 0x129   : > { %5550 = vmatprep.mubr.msk.bf16.mxu0 %vm776_vm0, %v7410_v63  ;;  %v835_v7 = vsel %vm776_vm0, %v765_v4, -inf  ;;  %v6574_v8 = vpop.f32.mrb[24].mxu0  ;;  %v1088_v23 = vld [vmem:[#allocation2 + $0x43] sm:$0xff] }
 0x12a   : > { %860 = vst.msk [vmem:[#allocation8 + $0x50] sm:$0xff] %vm776_vm0, %v834_v5  ;;  %v837_v10 = vmax.f32 %v835_v7, %v836_v6  ;;  %v722_v11 = vadd.f32 %v6574_v8, %v7293_v44  ;;  %v713_v12 = vpop.f32.mrb[25].mxu0 }
 0x12b   : > { %1043 = vrot.lane.b32.xlu1 %v1015_v9, %s7071_s23  ;;  %v874_v13 = vld [vmem:[#allocation8 + $0x40] ss:$2 sm:$0xff]  ;;  %v890_v14 = vld [vmem:[#allocation8 + $0x41] ss:$2 sm:$0xff]  ;;  %v714_v15 = vadd.f32 %v7293_v44, %v713_v12  ;;  %v6575_v16 = vpop.f32.mrb[26].mxu0 }
 0x12c   : > { %v901_v17 = vmax.f32 %v874_v13, %v890_v14  ;;  %861 = vst.msk [vmem:[#allocation8 + $0x58] sm:$0xff] %vm776_vm0, %v837_v10  ;;  %v770_v18 = vmax.f32 %v722_v11, 0.0  ;;  %v725_v19 = vadd.f32 %v6575_v16, %v7293_v44  ;;  %v716_v20 = vpop.f32.mrb[27].mxu0  ;;  %v914_v11 = vld [vmem:[#allocation2] sm:$0xff] }
 0x12d   : > { %v768_v21 = vmax.f32 %v714_v15, 0.0  ;;  %v717_v22 = vadd.f32 %v7293_v44, %v716_v20  ;;  %v943_v25 = vld [vmem:[#allocation2 + $0x51] sm:$0xff]  ;;  %926 = vst.msk [vmem:[#allocation5] sm:$0xff] %vm776_vm0, %v914_v11 }
 0x12e   : > { %910 = vst.msk [vmem:[#allocation2 + $0x62] sm:$0xff] %vm776_vm0, %v901_v17  ;;  %v839_v27 = vsel %vm776_vm0, %v770_v18, -inf  ;;  %v771_v28 = vmax.f32 %v725_v19, 0.0  ;;  %972 = vrot.lane.b32.xlu0 %v943_v25, %s7070_s22  ;;  %v919_v29 = vld [vmem:[#allocation2 + $0x50] sm:$0xff]  ;;  %v938_v19 = vld [vmem:[#allocation2 + $0x1] sm:$0xff] }
 0x12f   : > { %1116 = vrot.lane.b32.xlu1 %v1088_v23, %s7072_s24  ;;  %v1162_v30 = vld [vmem:[#allocation2 + $0x54] sm:$0xff]  ;;  %v838_v32 = vsel %vm776_vm0, %v768_v21, -inf  ;;  %v769_v33 = vmax.f32 %v717_v22, 0.0  ;;  %931 = vst.msk [vmem:[#allocation5 + $0x50] sm:$0xff] %vm776_vm0, %v919_v29  ;;  %v1084_v21 = vld [vmem:[#allocation2 + $0x3] sm:$0xff] }
 0x130   : > { %1174 = vst.msk [vmem:[#allocation5 + $0x58] sm:$0xff] %vm776_vm0, %v1162_v30  ;;  %v840_v34 = vmax.f32 %v838_v32, %v839_v27  ;;  %v842_v35 = vsel %vm776_vm0, %v771_v28, -inf  ;;  %v1016_v38 = vld [vmem:[#allocation2 + $0x52] sm:$0xff]  ;;  %v1011_v27 = vld [vmem:[#allocation2 + $0x2] sm:$0xff] }
 0x131   : > { %v841_v36 = vsel %vm776_vm0, %v769_v33, -inf  ;;  %v6578_v37 = vpop.f32.mrb[28].mxu0  ;;  %v1089_v54 = vld [vmem:[#allocation2 + $0x53] sm:$0xff]  ;;  %v948_v30 = vld [vmem:[#allocation2 + $0xa1] sm:$0xff] }
 0x132   : > { %862 = vst.msk [vmem:[#allocation8 + $0x60] sm:$0xff] %vm776_vm0, %v840_v34  ;;  %v843_v39 = vmax.f32 %v841_v36, %v842_v35  ;;  %v738_v40 = vadd.f32 %v6578_v37, %v7293_v44  ;;  %v729_v41 = vpop.f32.mrb[29].mxu0  ;;  %1045 = vrot.lane.b32.xlu0 %v1016_v38, %s7071_s23  ;;  %v949_v33 = vld [vmem:[#allocation2 + $0xb1] sm:$0xff]  ;;  %v1021_v34 = vld [vmem:[#allocation2 + $0xa2] sm:$0xff] }
 0x133   : > { %v876_v42 = vld [vmem:[#allocation8 + $0x50] ss:$2 sm:$0xff]  ;;  %v892_v43 = vld [vmem:[#allocation8 + $0x51] ss:$2 sm:$0xff]  ;;  %v730_v45 = vadd.f32 %v7293_v44, %v729_v41  ;;  %v6579_v46 = vpop.f32.mrb[30].mxu0  ;;  %v1094_v36 = vld [vmem:[#allocation2 + $0xa3] sm:$0xff] }
 0x134   : > { %v902_v47 = vmax.f32 %v876_v42, %v892_v43  ;;  %863 = vst.msk [vmem:[#allocation8 + $0x68] sm:$0xff] %vm776_vm0, %v843_v39  ;;  %v774_v48 = vmax.f32 %v738_v40, 0.0  ;;  %v741_v49 = vadd.f32 %v6579_v46, %v7293_v44  ;;  %v732_v50 = vpop.f32.mrb[31].mxu0  ;;  %v1022_v35 = vld [vmem:[#allocation2 + $0xb2] sm:$0xff]  ;;  %v924_v37 = vld [vmem:[#allocation2 + $0xa0] sm:$0xff] }
 0x135   : > { %v772_v51 = vmax.f32 %v730_v45, 0.0  ;;  %v733_v52 = vadd.f32 %v7293_v44, %v732_v50  ;;  %v944_v53 = vld [vmem:[#allocation2 + $0x61] sm:$0xff]  ;;  %936 = vst.msk [vmem:[#allocation5 + $0xa0] sm:$0xff] %vm776_vm0, %v924_v37  ;;  %v1095_v38 = vld [vmem:[#allocation2 + $0xb3] sm:$0xff] }
 0x136   : > { %911 = vst.msk [vmem:[#allocation2 + $0x72] sm:$0xff] %vm776_vm0, %v902_v47  ;;  %v845_v55 = vsel %vm776_vm0, %v774_v48, -inf  ;;  %v775_v56 = vmax.f32 %v741_v49, 0.0  ;;  %974 = vrot.lane.b32.xlu1 %v944_v53, %s7070_s22  ;;  %1118 = vrot.lane.b32.xlu0 %v1089_v54, %s7072_s24  ;;  %v920_v57 = vld [vmem:[#allocation2 + $0x60] sm:$0xff]  ;;  %v925_v39 = vld [vmem:[#allocation2 + $0xb0] sm:$0xff]  ;;  %v1190_v47 = vld [vmem:[#allocation5 + $0x48] sm:$0xff] }
 0x137   : > { %v1163_v58 = vld [vmem:[#allocation2 + $0x64] sm:$0xff]  ;;  %v844_v60 = vsel %vm776_vm0, %v772_v51, -inf  ;;  %v773_v61 = vmax.f32 %v733_v52, 0.0  ;;  %932 = vst.msk [vmem:[#allocation5 + $0x60] sm:$0xff] %vm776_vm0, %v920_v57  ;;  %937 = vst.msk [vmem:[#allocation5 + $0xb0] sm:$0xff] %vm776_vm0, %v925_v39  ;;  %v1168_v42 = vld [vmem:[#allocation2 + $0xb4] sm:$0xff]  ;;  %v1230_v52 = vpack.c.bf16 %v1190_v47, %v7404_v59 }
 0x138   : > { %1175 = vst.msk [vmem:[#allocation5 + $0x68] sm:$0xff] %vm776_vm0, %v1163_v58  ;;  %v846_v44 = vmax.f32 %v844_v60, %v845_v55  ;;  %v848_v62 = vsel %vm776_vm0, %v775_v56, -inf  ;;  %v1017_v1 = vld [vmem:[#allocation2 + $0x62] sm:$0xff]  ;;  %1180 = vst.msk [vmem:[#allocation5 + $0xb8] sm:$0xff] %vm776_vm0, %v1168_v42  ;;  %v7491_v46 = vld [vmem:[#allocation5 + $0x10] sm:$0xff] }
 0x139   : > { %v847_v0 = vsel %vm776_vm0, %v773_v61, -inf  ;;  %v1090_v6 = vld [vmem:[#allocation2 + $0x63] sm:$0xff]  ;;  %v6833_v59 = vld [vmem:[%s8725_s3 + $0x10] sm:$0xff]   ;;  %v1537_v57 = vld [vmem:[#allocation5 + $0x58] sm:$0xff] }
 0x13a   : > { %864 = vst.msk [vmem:[#allocation8 + $0x70] sm:$0xff] %vm776_vm0, %v846_v44  ;;  %v849_v2 = vmax.f32 %v847_v0, %v848_v62  ;;  %1047 = vrot.lane.b32.xlu1 %v1017_v1, %s7071_s23  ;;  %v6831_v50 = vld [vmem:[%s8725_s3] sm:$0xff]   ;;  %v6832_v55 = vld [vmem:[%s8725_s3 + $0x8] sm:$0xff]   ;;  %v6834_v44 = vld [vmem:[%s8725_s3 + $0x18] sm:$0xff]   ;;  %v7522_v1 = vpack.c.bf16 %v1537_v57, %v1190_v47 }
 0x13b   : > { %v878_v3 = vld [vmem:[#allocation8 + $0x60] ss:$2 sm:$0xff]  ;;  %v894_v4 = vld [vmem:[#allocation8 + $0x61] ss:$2 sm:$0xff]  ;;  %v6839_v11 = vld [vmem:[%s8725_s3 + $0x150] sm:$0xff]  }
 0x13c   : > { %v903_v5 = vmax.f32 %v878_v3, %v894_v4  ;;  %865 = vst.msk [vmem:[#allocation8 + $0x78] sm:$0xff] %vm776_vm0, %v849_v2  ;;  %v6835_v0 = vld [vmem:[%s8725_s3 + $0x140] sm:$0xff]   ;;  %v6837_v4 = vld [vmem:[%s8725_s3 + $0x148] sm:$0xff]  }
 0x13d   : > { %v945_v7 = vld [vmem:[#allocation2 + $0x71] sm:$0xff]  ;;  %v6836_v3 = vld [vmem:[%s8725_s3 + $0x20] sm:$0xff]  }
 0x13e   : > { %912 = vst.msk [vmem:[#allocation2 + $0x82] sm:$0xff] %vm776_vm0, %v903_v5  ;;  %1120 = vrot.lane.b32.xlu1 %v1090_v6, %s7072_s24  ;;  %976 = vrot.lane.b32.xlu0 %v945_v7, %s7070_s22  ;;  %v921_v8 = vld [vmem:[#allocation2 + $0x70] sm:$0xff] }
 0x13f   : > { %v1164_v9 = vld [vmem:[#allocation2 + $0x74] sm:$0xff]  ;;  %933 = vst.msk [vmem:[#allocation5 + $0x70] sm:$0xff] %vm776_vm0, %v921_v8  ;;  %v1194_v5 = vld [vmem:[#allocation5 + $0x68] sm:$0xff] }
 0x140   : > { %1176 = vst.msk [vmem:[#allocation5 + $0x78] sm:$0xff] %vm776_vm0, %v1164_v9  ;;  %v1018_v10 = vld [vmem:[#allocation2 + $0x72] sm:$0xff]  ;;  %v6838_v9 = vld [vmem:[%s8725_s3 + $0x28] sm:$0xff]  }
 0x141   : > { %v1091_v16 = vld [vmem:[#allocation2 + $0x73] sm:$0xff] }
 0x142   : > { %1049 = vrot.lane.b32.xlu0 %v1018_v10, %s7071_s23 }
 0x143   : > { %v880_v12 = vld [vmem:[#allocation8 + $0x70] ss:$2 sm:$0xff]  ;;  %v896_v13 = vld [vmem:[#allocation8 + $0x71] ss:$2 sm:$0xff] }
 0x144   : > { %v904_v14 = vmax.f32 %v880_v12, %v896_v13  ;;  %v7547_v12 = vpack.c.bf16 %v1194_v5, %v1537_v57 }
 0x145   : > { %v946_v15 = vld [vmem:[#allocation2 + $0x81] sm:$0xff] }
 0x146   : > { %913 = vst.msk [vmem:[#allocation2 + $0x92] sm:$0xff] %vm776_vm0, %v904_v14  ;;  %978 = vrot.lane.b32.xlu1 %v946_v15, %s7070_s22  ;;  %1122 = vrot.lane.b32.xlu0 %v1091_v16, %s7072_s24  ;;  %v922_v17 = vld [vmem:[#allocation2 + $0x80] sm:$0xff]  ;;  %v6840_v14 = vld [vmem:[%s8725_s3 + $0x30] sm:$0xff]   ;;  %v6841_v15 = vld [vmem:[%s8725_s3 + $0x158] sm:$0xff]  }
 0x147   : > { %v1165_v18 = vld [vmem:[#allocation2 + $0x84] sm:$0xff]  ;;  %934 = vst.msk [vmem:[#allocation5 + $0x80] sm:$0xff] %vm776_vm0, %v922_v17  ;;  %v1541_v16 = vld [vmem:[#allocation5 + $0x78] sm:$0xff] }
 0x148   : > { %1177 = vst.msk [vmem:[#allocation5 + $0x88] sm:$0xff] %vm776_vm0, %v1165_v18  ;;  %v1019_v20 = vld [vmem:[#allocation2 + $0x82] sm:$0xff] }
 0x149   : > { %v1092_v22 = vld [vmem:[#allocation2 + $0x83] sm:$0xff] }
 0x14a   : > { %1051 = vrot.lane.b32.xlu1 %v1019_v20, %s7071_s23  ;;  %962 = vrot.lane.b32.xlu0 %v938_v19, %s7070_s22  ;;  %v6842_v20 = vld [vmem:[%s8725_s3 + $0x38] sm:$0xff]  }
 0x14d   : > { %v1166_v23 = vld [vmem:[#allocation2 + $0x94] sm:$0xff] }
 0x14e   : > { %1124 = vrot.lane.b32.xlu1 %v1092_v22, %s7072_s24  ;;  %1108 = vrot.lane.b32.xlu0 %v1084_v21, %s7072_s24  ;;  %v923_v25 = vld [vmem:[#allocation2 + $0x90] sm:$0xff]  ;;  %1178 = vst.msk [vmem:[#allocation5 + $0x98] sm:$0xff] %vm776_vm0, %v1166_v23  ;;  %v6843_v22 = vld [vmem:[%s8725_s3 + $0x160] sm:$0xff]   ;;  %v7573_v23 = vpack.c.bf16 %v1541_v16, %v1194_v5 }
 0x14f   : > { %v1020_v28 = vld [vmem:[#allocation2 + $0x92] sm:$0xff]  ;;  %935 = vst.msk [vmem:[#allocation5 + $0x90] sm:$0xff] %vm776_vm0, %v923_v25 }
 0x150   : > { %v947_v29 = vld [vmem:[#allocation2 + $0x91] sm:$0xff] }
 0x151   : > { %v1093_v32 = vld [vmem:[#allocation2 + $0x93] sm:$0xff] }
 0x152   : > { %1035 = vrot.lane.b32.xlu1 %v1011_v27, %s7071_s23  ;;  %1053 = vrot.lane.b32.xlu0 %v1020_v28, %s7071_s23  ;;  %v6844_v27 = vld [vmem:[%s8725_s3 + $0x40] sm:$0xff]   ;;  %v6845_v28 = vld [vmem:[%s8725_s3 + $0x168] sm:$0xff]  }
 0x156   : > { %980 = vrot.lane.b32.xlu1 %v947_v29, %s7070_s22  ;;  %982 = vrot.lane.b32.xlu0 %v948_v30, %s7070_s22  ;;  %v1226_v29 = vld [vmem:[#allocation5 + $0x88] sm:$0xff] }
 0x157   : > { %v7599_v37 = vpack.c.bf16 %v1226_v29, %v1541_v16  ;;  %v6858_v16 = vld [vmem:[%s8725_s3 + $0x128] sm:$0xff]  }
 0x15a   : > { %1126 = vrot.lane.b32.xlu1 %v1093_v32, %s7072_s24  ;;  %984 = vrot.lane.b32.xlu0 %v949_v33, %s7070_s22 }
 0x15e   : > { %1055 = vrot.lane.b32.xlu1 %v1021_v34, %s7071_s23  ;;  %1057 = vrot.lane.b32.xlu0 %v1022_v35, %s7071_s23  ;;  %v6846_v34 = vld [vmem:[%s8725_s3 + $0x48] sm:$0xff]  }
 0x162   : > { %1128 = vrot.lane.b32.xlu1 %v1094_v36, %s7072_s24  ;;  %v6847_v36 = vld [vmem:[%s8725_s3 + $0x170] sm:$0xff]  }
 0x166   : > { %1130 = vrot.lane.b32.xlu1 %v1095_v38, %s7072_s24 }
 0x188   : > { %v1040_v40 = vpop.permute.xlu1 %1039 }
 0x189   : > { %v967_v41 = vpop.permute.xlu0 %966 }
 0x18a   : > { %1001 = vst.msk [vmem:[#allocation5 + $0x20] sm:$0xff] %vm998_vm2, %v967_v41  ;;  %v7612_v41 = vld [vmem:[#allocation5 + $0x98] sm:$0xff] }
 0x18b   : > { %1074 = vst.msk [vmem:[#allocation5 + $0x20] sm:$0xff] %vm1071_vm4, %v1040_v40  ;;  %v6849_v40 = vld [vmem:[%s8725_s3 + $0x178] sm:$0xff]  }
 0x18c   : > { %v1113_v43 = vpop.permute.xlu1 %1112 }
 0x18d   : > { %1147 = vst.msk [vmem:[#allocation5 + $0x20] sm:$0xff] %vm1144_vm3, %v1113_v43 }
 0x190   : > { %v969_v45 = vpop.permute.xlu0 %968 }
 0x191   : > { %1002 = vst.msk [vmem:[#allocation5 + $0x30] sm:$0xff] %vm998_vm2, %v969_v45 }
 0x194   : > { %v1042_v48 = vpop.permute.xlu0 %1041  ;;  %v1185_v49 = vld [vmem:[#allocation5 + $0x20] sm:$0xff] }
 0x195   : > { %1075 = vst.msk [vmem:[#allocation5 + $0x30] sm:$0xff] %vm1071_vm4, %v1042_v48  ;;  %v1227_v51 = vpack.c.bf16 %v1185_v49, %v7491_v46  ;;  %v6851_v48 = vld [vmem:[%s8725_s3 + $0x180] sm:$0xff]  }
 0x197   : > { %1361 = vmatmul.mubr.bf16.vlgmr.msra.gmra.mrb[0].mxu1 %v1227_v51 }
 0x198   : > { %v1115_v54 = vpop.permute.xlu0 %1114  ;;  %5503 = vmatprep.mubr.msk.bf16.mxu1 %vm776_vm0, %v1230_v52  ;;  %1466 = vmatpush1.bf16.msra.mxu1 %v6831_v50  ;;  %v1182_v52 = vld [vmem:[#allocation5 + $0x8] sm:$0xff] }
 0x199   : > { %v971_v53 = vpop.permute.xlu1 %970  ;;  %1148 = vst.msk [vmem:[#allocation5 + $0x30] sm:$0xff] %vm1144_vm3, %v1115_v54  ;;  %1467 = vmatprep.subr.bf16.mxu1 %v7073_v31  ;;  %v1198_v54 = vpack.c.bf16 %v7380_v26, %v1182_v52 }
 0x19a   : > { %1003 = vst.msk [vmem:[#allocation5 + $0x40] sm:$0xff] %vm998_vm2, %v971_v53  ;;  %v6853_v53 = vld [vmem:[%s8725_s3 + $0x188] sm:$0xff]  }
 0x19c   : > { %1468 = vmatpush1.bf16.msra.mxu1 %v6832_v55 }
 0x19d   : > { %v1044_v56 = vpop.permute.xlu1 %1043  ;;  %1469 = vmatprep.subr.bf16.mxu1 %v7073_v31 }
 0x19e   : > { %1076 = vst.msk [vmem:[#allocation5 + $0x40] sm:$0xff] %vm1071_vm4, %v1044_v56 }
 0x1a0   : > { %v973_v60 = vpop.permute.xlu0 %972  ;;  %v1532_v61 = vld [vmem:[#allocation5 + $0x30] sm:$0xff]  ;;  %1470 = vmatpush1.bf16.msra.mxu1 %v6833_v59 }
 0x1a1   : > { %v1117_v58 = vpop.permute.xlu1 %1116  ;;  %1004 = vst.msk [vmem:[#allocation5 + $0x50] sm:$0xff] %vm998_vm2, %v973_v60  ;;  %v7516_v62 = vpack.c.bf16 %v1532_v61, %v1185_v49  ;;  %1471 = vmatprep.subr.bf16.mxu1 %v7073_v31  ;;  %v7621_v49 = vpack.c.bf16 %v7612_v41, %v1226_v29  ;;  %v2311_v29 = vld [vmem:[#allocation3 + $0x14] sm:$0xff] }
 0x1a2   : > { %1149 = vst.msk [vmem:[#allocation5 + $0x40] sm:$0xff] %vm1144_vm3, %v1117_v58 }
 0x1a3   : > { %1680 = vmatmul.mubr.bf16.vlgmr.msra.gmra.mrb[32].mxu0 %v7516_v62  ;;  %2319 = vst.msk [vmem:[#allocation6 + $0x28] sm:$0xff] %vm2123_vm5, %v2311_v29 }
 0x1a4   : > { %v1046_v2 = vpop.permute.xlu0 %1045  ;;  %5551 = vmatprep.mubr.msk.bf16.mxu0 %vm776_vm0, %v7522_v1  ;;  %1472 = vmatpush1.bf16.msra.mxu1 %v6834_v44 }
 0x1a5   : > { %1077 = vst.msk [vmem:[#allocation5 + $0x50] sm:$0xff] %vm1071_vm4, %v1046_v2  ;;  %2028 = vmatpush1.bf16.msra.mxu0 %v6835_v0  ;;  %1473 = vmatprep.subr.bf16.mxu1 %v7073_v31 }
 0x1a6   : > { %2029 = vmatprep.subr.bf16.mxu0 %v7073_v31 }
 0x1a8   : > { %v975_v6 = vpop.permute.xlu1 %974  ;;  %v1119_v7 = vpop.permute.xlu0 %1118  ;;  %1474 = vmatpush1.bf16.msra.mxu1 %v6836_v3 }
 0x1a9   : > { %v1189_v8 = vld [vmem:[#allocation5 + $0x40] sm:$0xff]  ;;  %1005 = vst.msk [vmem:[#allocation5 + $0x60] sm:$0xff] %vm998_vm2, %v975_v6  ;;  %2030 = vmatpush1.bf16.msra.mxu0 %v6837_v4  ;;  %1475 = vmatprep.subr.bf16.mxu1 %v7073_v31  ;;  %v6850_v4 = vld [vmem:[%s8725_s3 + $0xf8] sm:$0xff]  }
 0x1aa   : > { %1150 = vst.msk [vmem:[#allocation5 + $0x50] sm:$0xff] %vm1144_vm3, %v1119_v7  ;;  %v7541_v10 = vpack.c.bf16 %v1189_v8, %v1532_v61  ;;  %2031 = vmatprep.subr.bf16.mxu0 %v7073_v31  ;;  %v6848_v61 = vld [vmem:[%s8725_s3 + $0xf0] sm:$0xff]   ;;  %v6854_v7 = vld [vmem:[%s8725_s3 + $0x108] sm:$0xff]  }
 0x1ac   : > { %1369 = vmatmul.mubr.bf16.gmra.mrb[4].mxu1 %v7541_v10  ;;  %v1048_v13 = vpop.permute.xlu1 %1047 }
 0x1ad   : > { %5504 = vmatprep.mubr.msk.bf16.mxu1 %vm776_vm0, %v7547_v12  ;;  %1476 = vmatpush1.bf16.msra.mxu1 %v6838_v9  ;;  %1078 = vst.msk [vmem:[#allocation5 + $0x60] sm:$0xff] %vm1071_vm4, %v1048_v13  ;;  %v6857_v9 = vld [vmem:[%s8725_s3 + $0x120] sm:$0xff]   ;;  %v1925_v13 = vld [vmem:[#allocation5 + $0xb8] sm:$0xff] }
 0x1ae   : > { %2032 = vmatpush1.bf16.msra.mxu0 %v6839_v11  ;;  %1477 = vmatprep.subr.bf16.mxu1 %v7073_v31  ;;  %v1721_v11 = vld [vmem:[#allocation5 + $0x38] sm:$0xff] }
 0x1af   : > { %2033 = vmatprep.subr.bf16.mxu0 %v7073_v31 }
 0x1b0   : > { %v1121_v17 = vpop.permute.xlu1 %1120  ;;  %v977_v18 = vpop.permute.xlu0 %976 }
 0x1b1   : > { %v1536_v19 = vld [vmem:[#allocation5 + $0x50] sm:$0xff]  ;;  %1478 = vmatpush1.bf16.msra.mxu1 %v6840_v14  ;;  %1151 = vst.msk [vmem:[#allocation5 + $0x60] sm:$0xff] %vm1144_vm3, %v1121_v17 }
 0x1b2   : > { %1006 = vst.msk [vmem:[#allocation5 + $0x70] sm:$0xff] %vm998_vm2, %v977_v18  ;;  %v7567_v21 = vpack.c.bf16 %v1536_v19, %v1189_v8  ;;  %2034 = vmatpush1.bf16.msra.mxu0 %v6841_v15  ;;  %1479 = vmatprep.subr.bf16.mxu1 %v7073_v31  ;;  %v1723_v8 = vld [vmem:[#allocation5 + $0x48] sm:$0xff]  ;;  %v6859_v18 = vld [vmem:[%s8725_s3 + $0x130] sm:$0xff]  }
 0x1b3   : > { %2035 = vmatprep.subr.bf16.mxu0 %v7073_v31  ;;  %v1737_v14 = vpack.c.bf16 %v1723_v8, %v1721_v11  ;;  %v1735_v15 = vld [vmem:[#allocation5 + $0xa8] sm:$0xff]  ;;  %v6882_v11 = vld [vmem:[%s8727_s5 + $0xc0] sm:$0xff]  }
 0x1b4   : > { %1688 = vmatmul.mubr.bf16.gmra.mrb[36].mxu0 %v7567_v21  ;;  %v1050_v25 = vpop.permute.xlu0 %1049  ;;  %v1933_v17 = vpack.c.bf16 %v1925_v13, %v1735_v15 }
 0x1b5   : > { %5552 = vmatprep.mubr.msk.bf16.mxu0 %vm776_vm0, %v7573_v23  ;;  %1480 = vmatpush1.bf16.msra.mxu1 %v6842_v20  ;;  %1079 = vst.msk [vmem:[#allocation5 + $0x70] sm:$0xff] %vm1071_vm4, %v1050_v25 }
 0x1b6   : > { %2036 = vmatpush1.bf16.msra.mxu0 %v6843_v22  ;;  %1481 = vmatprep.subr.bf16.mxu1 %v7073_v31  ;;  %v6860_v22 = vld [vmem:[%s8725_s3 + $0x138] sm:$0xff]  }
 0x1b7   : > { %2037 = vmatprep.subr.bf16.mxu0 %v7073_v31 }
 0x1b8   : > { %v979_v30 = vpop.permute.xlu1 %978  ;;  %v1123_v32 = vpop.permute.xlu0 %1122  ;;  %v1193_v33 = vld [vmem:[#allocation5 + $0x60] sm:$0xff] }
 0x1b9   : > { %1482 = vmatpush1.bf16.msra.mxu1 %v6844_v27  ;;  %1007 = vst.msk [vmem:[#allocation5 + $0x80] sm:$0xff] %vm998_vm2, %v979_v30  ;;  %v7593_v35 = vpack.c.bf16 %v1193_v33, %v1536_v19  ;;  %v2198_v30 = vld [vmem:[#allocation3 + $0x11] sm:$0xff] }
 0x1ba   : > { %1152 = vst.msk [vmem:[#allocation5 + $0x70] sm:$0xff] %vm1144_vm3, %v1123_v32  ;;  %2038 = vmatpush1.bf16.msra.mxu0 %v6845_v28  ;;  %1483 = vmatprep.subr.bf16.mxu1 %v7073_v31  ;;  %v2263_v28 = vld [vmem:[#allocation3 + $0x13] sm:$0xff] }
 0x1bb   : > { %2039 = vmatprep.subr.bf16.mxu0 %v7073_v31  ;;  %1377 = vmatmul.mubr.bf16.gmra.mrb[8].mxu1 %v7593_v35 }
 0x1bc   : > { %v1052_v38 = vpop.permute.xlu1 %1051  ;;  %5505 = vmatprep.mubr.msk.bf16.mxu1 %vm776_vm0, %v7599_v37  ;;  %v963_v39 = vpop.permute.xlu0 %962  ;;  %2280 = vrot.lane.b32.xlu0 %v2263_v28, %s7071_s23 }
 0x1bd   : > { %1484 = vmatpush1.bf16.msra.mxu1 %v6846_v34  ;;  %1080 = vst.msk [vmem:[#allocation5 + $0x80] sm:$0xff] %vm1071_vm4, %v1052_v38  ;;  %v6863_v38 = vld [vmem:[%s8727_s5 + $0x130] sm:$0xff]  }
 0x1be   : > { %999 = vst.msk [vmem:[#allocation5] sm:$0xff] %vm998_vm2, %v963_v39  ;;  %2040 = vmatpush1.bf16.msra.mxu0 %v6847_v36  ;;  %1837 = vmatprep.subr.bf16.mxu1 %v7073_v31  ;;  %v6862_v36 = vld [vmem:[%s8727_s5 + $0x128] sm:$0xff]  }
 0x1bf   : > { %2041 = vmatprep.subr.bf16.mxu0 %v7073_v31 }
 0x1c0   : > { %v1125_v42 = vpop.permute.xlu1 %1124  ;;  %v1109_v45 = vpop.permute.xlu0 %1108  ;;  %2215 = vrot.lane.b32.xlu0 %v2198_v30, %s7071_s23 }
 0x1c1   : > { %v1540_v43 = vld [vmem:[#allocation5 + $0x70] sm:$0xff]  ;;  %1153 = vst.msk [vmem:[#allocation5 + $0x80] sm:$0xff] %vm1144_vm3, %v1125_v42  ;;  %v6864_v42 = vld [vmem:[%s8727_s5 + $0x138] sm:$0xff]  }
 0x1c2   : > { %v7615_v47 = vpack.c.bf16 %v1540_v43, %v1193_v33  ;;  %2042 = vmatpush1.bf16.msra.mxu0 %v6849_v40 }
 0x1c3   : > { %2043 = vmatprep.subr.bf16.mxu0 %v7073_v31 }
 0x1c4   : > { %1696 = vmatmul.mubr.bf16.gmra.mrb[40].mxu0 %v7615_v47  ;;  %v1036_v50 = vpop.permute.xlu1 %1035  ;;  %v1054_v51 = vpop.permute.xlu0 %1053 }
 0x1c5   : > { %5553 = vmatprep.mubr.msk.bf16.mxu0 %vm776_vm0, %v7621_v49  ;;  %1072 = vst.msk [vmem:[#allocation5] sm:$0xff] %vm1071_vm4, %v1036_v50 }
 0x1c6   : > { %2044 = vmatpush1.bf16.msra.mxu0 %v6851_v48  ;;  %1145 = vst.msk [vmem:[#allocation5] sm:$0xff] %vm1144_vm3, %v1109_v45  ;;  %v7813_v45 = vld [vmem:[%s8727_s5 + $0x80] sm:$0xff]  }
 0x1c7   : > { %2045 = vmatprep.subr.bf16.mxu0 %v7073_v31  ;;  %v2316_v48 = vld [vmem:[#allocation3 + $0x64] sm:$0xff] }
 0x1c8   : > { %v981_v55 = vpop.permute.xlu1 %980  ;;  %v1225_v56 = vld [vmem:[#allocation5 + $0x80] sm:$0xff]  ;;  %v983_v59 = vpop.permute.xlu0 %982  ;;  %2324 = vst.msk [vmem:[#allocation6 + $0xa0] sm:$0xff] %vm2123_vm5, %v2316_v48 }
 0x1c9   : > { %1008 = vst.msk [vmem:[#allocation5 + $0x90] sm:$0xff] %vm998_vm2, %v981_v55  ;;  %v7635_v57 = vpack.c.bf16 %v1225_v56, %v1540_v43  ;;  %1009 = vst.msk [vmem:[#allocation5 + $0xa0] sm:$0xff] %vm998_vm2, %v983_v59 }
 0x1ca   : > { %2046 = vmatpush1.bf16.msra.mxu0 %v6853_v53  ;;  %1081 = vst.msk [vmem:[#allocation5 + $0x90] sm:$0xff] %vm1071_vm4, %v1054_v51  ;;  %v2310_v51 = vld [vmem:[#allocation3 + $0x4] sm:$0xff] }
 0x1cb   : > { %1385 = vmatmul.mubr.bf16.gmra.mrb[12].mxu1 %v7635_v57  ;;  %6580 = vmatprep.subr.bf16.mxu0 %v6861_v24  ;;  %2318 = vst.msk [vmem:[#allocation6 + $0x10] sm:$0xff] %vm2123_vm5, %v2310_v51 }
 0x1cc   : > { %v1127_v58 = vpop.permute.xlu1 %1126  ;;  %5516 = vmatprep.mubr.msk.bf16.mxu1 %vm776_vm0, %v1198_v54  ;;  %v985_v60 = vpop.permute.xlu0 %984 }
 0x1cd   : > { %1154 = vst.msk [vmem:[#allocation5 + $0x90] sm:$0xff] %vm1144_vm3, %v1127_v58  ;;  %v1181_v26 = vld [vmem:[#allocation5] sm:$0xff] }
 0x1ce   : > { %1010 = vst.msk [vmem:[#allocation5 + $0xb0] sm:$0xff] %vm998_vm2, %v985_v60  ;;  %v1197_v2 = vpack.c.bf16 %v7491_v46, %v1181_v26  ;;  %v6869_v58 = vld [vmem:[%s8727_s5 + $0xe0] sm:$0xff]  }
 0x1cf   : > { %v6870_v26 = vld [vmem:[%s8727_s5 + $0xa0] sm:$0xff]  }
 0x1d0   : > { %v1056_v44 = vpop.permute.xlu1 %1055  ;;  %v1058_v0 = vpop.permute.xlu0 %1057 }
 0x1d1   : > { %1082 = vst.msk [vmem:[#allocation5 + $0xa0] sm:$0xff] %vm1071_vm4, %v1056_v44  ;;  %1083 = vst.msk [vmem:[#allocation5 + $0xb0] sm:$0xff] %vm1071_vm4, %v1058_v0  ;;  %v6872_v44 = vld [vmem:[%s8727_s5 + $0xa8] sm:$0xff]   ;;  %v6873_v0 = vld [vmem:[%s8727_s5 + $0xf0] sm:$0xff]  }
 0x1d3   : > { %1498 = vmatmul.mubr.bf16.vlgmr.msra.gmra.mrb[16].mxu1 %v1197_v2 }
 0x1d4   : > { %1838 = vmatpush1.bf16.msra.mxu1 %v6848_v61  ;;  %5517 = vmatprep.mubr.msk.bf16.mxu1 %vm776_vm0, %v7410_v63  ;;  %v7651_v3 = vld [vmem:[#allocation5 + $0x90] sm:$0xff]  ;;  %v1129_v5 = vpop.permute.xlu1 %1128  ;;  %v6852_v63 = vld [vmem:[%s8725_s3 + $0x100] sm:$0xff]   ;;  %v6871_v61 = vld [vmem:[%s8727_s5 + $0xe8] sm:$0xff]  }
 0x1d5   : > { %1839 = vmatprep.subr.bf16.mxu1 %v7073_v31  ;;  %v1552_v46 = vpack.c.bf16 %v7651_v3, %v1225_v56  ;;  %1155 = vst.msk [vmem:[#allocation5 + $0xa0] sm:$0xff] %vm1144_vm3, %v1129_v5  ;;  %v6874_v5 = vld [vmem:[%s8727_s5 + $0xb0] sm:$0xff]  }
 0x1d7   : > { %1704 = vmatmul.mubr.bf16.gmra.mrb[44].mxu0 %v1552_v46 }
 0x1d8   : > { %1840 = vmatpush1.bf16.msra.mxu1 %v6850_v4  ;;  %5618 = vmatprep.mubr.msk.bf16.mxu0 %vm776_vm0, %v7522_v1  ;;  %v1131_v6 = vpop.permute.xlu1 %1130 }
 0x1d9   : > { %1841 = vmatprep.subr.bf16.mxu1 %v7073_v31  ;;  %1156 = vst.msk [vmem:[#allocation5 + $0xb0] sm:$0xff] %vm1144_vm3, %v1131_v6 }
 0x1db   : > { %1506 = vmatmul.mubr.bf16.gmra.mrb[20].mxu1 %v7516_v62  ;;  %v6855_v62 = vld [vmem:[%s8725_s3 + $0x110] sm:$0xff]  }
 0x1dc   : > { %1842 = vmatpush1.bf16.msra.mxu1 %v6852_v63  ;;  %5518 = vmatprep.mubr.msk.bf16.mxu1 %vm776_vm0, %v7522_v1  ;;  %v6856_v1 = vld [vmem:[%s8725_s3 + $0x118] sm:$0xff]   ;;  %v1734_v20 = vld [vmem:[#allocation5 + $0xa0] sm:$0xff] }
 0x1dd   : > { %1843 = vmatprep.subr.bf16.mxu1 %v7073_v31  ;;  %v6877_v63 = vld [vmem:[%s8727_s5 + $0xf8] sm:$0xff]  }
 0x1df   : > { %2060 = vmatmul.mubr.bf16.vlgmr.msra.gmra.mrb[48].mxu0 %v7567_v21 }
 0x1e0   : > { %1844 = vmatpush1.bf16.msra.mxu1 %v6854_v7  ;;  %5619 = vmatprep.mubr.msk.bf16.mxu0 %vm776_vm0, %v7573_v23  ;;  %v1924_v19 = vld [vmem:[#allocation5 + $0xb0] sm:$0xff]  ;;  %v6878_v7 = vld [vmem:[%s8727_s5 + $0xb8] sm:$0xff]  }
 0x1e1   : > { %1845 = vmatprep.subr.bf16.mxu1 %v7073_v31  ;;  %6581 = vmatpush3.bf16.msra.mxu0 %v6861_v24 }
 0x1e2   : > { %6582 = vmatprep.subr.bf16.mxu0 %v6862_v36 }
 0x1e3   : > { %1514 = vmatmul.mubr.bf16.gmra.mrb[24].mxu1 %v7567_v21  ;;  %v1932_v21 = vpack.c.bf16 %v1924_v19, %v1734_v20 }
 0x1e4   : > { %1846 = vmatpush1.bf16.msra.mxu1 %v6855_v62  ;;  %5519 = vmatprep.mubr.msk.bf16.mxu1 %vm776_vm0, %v7573_v23  ;;  %v1743_v23 = vpack.c.bf16 %v1735_v15, %v7612_v41  ;;  %v6881_v62 = vld [vmem:[%s8727_s5 + $0x100] sm:$0xff]  }
 0x1e5   : > { %1847 = vmatprep.subr.bf16.mxu1 %v7073_v31  ;;  %6583 = vmatpush3.bf16.msra.mxu0 %v6862_v36 }
 0x1e6   : > { %6584 = vmatprep.subr.bf16.mxu0 %v6863_v38 }
 0x1e7   : > { %2068 = vmatmul.mubr.bf16.gmra.mrb[52].mxu0 %v7615_v47 }
 0x1e8   : > { %1848 = vmatpush1.bf16.msra.mxu1 %v6856_v1  ;;  %5620 = vmatprep.mubr.msk.bf16.mxu0 %vm776_vm0, %v7621_v49 }
 0x1e9   : > { %1849 = vmatprep.subr.bf16.mxu1 %v7073_v31  ;;  %6585 = vmatpush3.bf16.msra.mxu0 %v6863_v38 }
 0x1ea   : > { %6586 = vmatprep.subr.bf16.mxu0 %v6864_v42 }
 0x1eb   : > { %1522 = vmatmul.mubr.bf16.gmra.mrb[28].mxu1 %v7615_v47 }
 0x1ec   : > { %1850 = vmatpush1.bf16.msra.mxu1 %v6857_v9  ;;  %5584 = vmatprep.mubr.msk.bf16.mxu1 %vm776_vm0, %v1737_v14 }
 0x1ed   : > { %1851 = vmatprep.subr.bf16.mxu1 %v7073_v31  ;;  %6587 = vmatpush3.bf16.msra.mxu0 %v6864_v42 }
 0x1ee   : > { %6592 = vmatprep.subr.bf16.mxu0 %v7813_v45 }
 0x1ef   : > { %2076 = vmatmul.mubr.bf16.gmra.mrb[56].mxu0 %v1552_v46 }
 0x1f0   : > { %1852 = vmatpush1.bf16.msra.mxu1 %v6858_v16  ;;  %5621 = vmatprep.mubr.msk.bf16.mxu0 %vm776_vm0, %v1933_v17 }
 0x1f1   : > { %1853 = vmatprep.subr.bf16.mxu1 %v7073_v31 }
 0x1f4   : > { %1854 = vmatpush1.bf16.msra.mxu1 %v6859_v18 }
 0x1f5   : > { %1855 = vmatprep.subr.bf16.mxu1 %v7073_v31  ;;  %v1742_v31 = vpack.c.bf16 %v1734_v20, %v7651_v3  ;;  %v2247_v3 = vld [vmem:[#allocation3 + $0x12] sm:$0xff] }
 0x1f6   : > { %2255 = vst.msk [vmem:[#allocation6 + $0x20] sm:$0xff] %vm2123_vm5, %v2247_v3 }
 0x1f7   : > { %2084 = vmatmul.mubr.bf16.gmra.mrb[60].mxu0 %v1932_v21 }
 0x1f8   : > { %1856 = vmatpush1.bf16.msra.mxu1 %v6860_v22 }
 0x1f9   : > { %6192 = vmatprep.subr.bf16.mxu1 %v6869_v58 }
 0x1fb   : > { %1870 = vmatmul.mubr.bf16.vlgmr.msra.gmra.mrb[32].mxu1 %v7541_v10 }
 0x1fc   : > { %5585 = vmatprep.mubr.msk.bf16.mxu1 %vm776_vm0, %v7547_v12  ;;  %6193 = vmatpush3.bf16.msra.mxu1 %v6870_v26 }
 0x1fd   : > { %6194 = vmatprep.subr.bf16.mxu1 %v6871_v61 }
 0x200   : > { %6195 = vmatpush3.bf16.msra.mxu1 %v6872_v44 }
 0x201   : > { %6196 = vmatprep.subr.bf16.mxu1 %v6873_v0 }
 0x203   : > { %1878 = vmatmul.mubr.bf16.gmra.mrb[36].mxu1 %v7593_v35 }
 0x204   : > { %5586 = vmatprep.mubr.msk.bf16.mxu1 %vm776_vm0, %v7599_v37  ;;  %6197 = vmatpush3.bf16.msra.mxu1 %v6874_v5 }
 0x205   : > { %6198 = vmatprep.subr.bf16.mxu1 %v6877_v63 }
 0x208   : > { %6199 = vmatpush3.bf16.msra.mxu1 %v6878_v7 }
 0x209   : > { %6200 = vmatprep.subr.bf16.mxu1 %v6881_v62 }
 0x20b   : > { %1886 = vmatmul.mubr.bf16.gmra.mrb[40].mxu1 %v7635_v57 }
 0x20c   : > { %5587 = vmatprep.mubr.msk.bf16.mxu1 %vm776_vm0, %v1743_v23  ;;  %6201 = vmatpush3.bf16.msra.mxu1 %v6882_v11 }
 0x213   : > { %1894 = vmatmul.mubr.bf16.gmra.mrb[44].mxu1 %v1742_v31 }
 0x26a   : > { %v7783_v10 = vpop.f32.mrb[0].mxu1 }
 0x26b   : > { %v1364_v12 = vpop.f32.mrb[1].mxu1 }
 0x26c   : > { %v7785_v25 = vpop.f32.mrb[2].mxu1 }
 0x26d   : > { %v1367_v27 = vpop.f32.mrb[3].mxu1 }
 0x276   : > { %v7790_v32 = vpop.f32.mrb[32].mxu0 }
 0x277   : > { %v1683_v33 = vpop.f32.mrb[33].mxu0 }
 0x278   : > { %v7795_v34 = vpop.f32.mrb[34].mxu0 }
 0x279   : > { %v1686_v35 = vpop.f32.mrb[35].mxu0 }
 0x27f   : > { %v7800_v37 = vpop.f32.mrb[4].mxu1 }
 0x280   : > { %v1372_v39 = vpop.f32.mrb[5].mxu1 }
 0x281   : > { %v7805_v40 = vpop.f32.mrb[6].mxu1 }
 0x282   : > { %v1375_v41 = vpop.f32.mrb[7].mxu1 }
 0x287   : > { %v1689_v43 = vpop.f32.mrb[36].mxu0 }
 0x288   : > { %v1691_v47 = vpop.f32.mrb[37].mxu0 }
 0x289   : > { %v1692_v49 = vpop.f32.mrb[38].mxu0 }
 0x28a   : > { %v1694_v50 = vpop.f32.mrb[39].mxu0 }
 0x28e   : > { %v1378_v52 = vpop.f32.mrb[8].mxu1 }
 0x28f   : > { %v1380_v53 = vpop.f32.mrb[9].mxu1 }
 0x290   : > { %v1381_v54 = vpop.f32.mrb[10].mxu1 }
 0x291   : > { %v1383_v55 = vpop.f32.mrb[11].mxu1 }
 0x297   : > { %v1697_v56 = vpop.f32.mrb[40].mxu0 }
 0x298   : > { %v1699_v59 = vpop.f32.mrb[41].mxu0 }
 0x299   : > { %v1700_v57 = vpop.f32.mrb[42].mxu0 }
 0x29a   : > { %v1702_v60 = vpop.f32.mrb[43].mxu0 }
 0x29e   : > { %v1386_v2 = vpop.f32.mrb[12].mxu1 }
 0x29f   : > { %v1388_v4 = vpop.f32.mrb[13].mxu1 }
 0x2a0   : > { %v1389_v46 = vpop.f32.mrb[14].mxu1  ;;  %v7866_v4 = vld [vmem:[%s8726_s4] ss:$0 sm:$0xff] }
 0x2a1   : > { %v1391_v6 = vpop.f32.mrb[15].mxu1 }
 0x2a6   : > { %v1499_v1 = vpop.f32.mrb[16].mxu1 }
 0x2a7   : > { %v1500_v8 = vadd.f32 %v1499_v1, %v7783_v10  ;;  %v1501_v9 = vpop.f32.mrb[17].mxu1 }
 0x2a8   : > { %v1502_v13 = vpop.f32.mrb[18].mxu1 }
 0x2a9   : > { %v1503_v14 = vadd.f32 %v1502_v13, %v7785_v25  ;;  %v1504_v15 = vpop.f32.mrb[19].mxu1  ;;  %v1712_v16 = vadd.f32 %v7790_v32, %v1500_v8 }
 0x2aa   : > { %v1705_v17 = vpop.f32.mrb[44].mxu0 }
 0x2ab   : > { %v1707_v18 = vpop.f32.mrb[45].mxu0  ;;  %v1713_v19 = vadd.f32 %v7795_v34, %v1503_v14 }
 0x2ac   : > { %v1708_v20 = vpop.f32.mrb[46].mxu0 }
 0x2ad   : > { %v1710_v21 = vpop.f32.mrb[47].mxu0 }
 0x2ae   : > { %v1507_v22 = vpop.f32.mrb[20].mxu1 }
 0x2af   : > { %v1508_v23 = vadd.f32 %v1507_v22, %v7800_v37  ;;  %v1509_v31 = vpop.f32.mrb[21].mxu1 }
 0x2b0   : > { %v1510_v10 = vpop.f32.mrb[22].mxu1 }
 0x2b1   : > { %v1511_v12 = vadd.f32 %v1510_v10, %v7805_v40  ;;  %v1512_v27 = vpop.f32.mrb[23].mxu1  ;;  %v1714_v28 = vadd.f32 %v1689_v43, %v1508_v23 }
 0x2b2   : > { %v2061_v25 = vpop.f32.mrb[48].mxu0 }
 0x2b3   : > { %v2063_v29 = vpop.f32.mrb[49].mxu0  ;;  %v1715_v30 = vadd.f32 %v1692_v49, %v1511_v12 }
 0x2b4   : > { %v2064_v32 = vpop.f32.mrb[50].mxu0 }
 0x2b5   : > { %v2066_v24 = vpop.f32.mrb[51].mxu0 }
 0x2b6   : > { %v1515_v33 = vpop.f32.mrb[24].mxu1 }
 0x2b7   : > { %v1516_v35 = vadd.f32 %v1515_v33, %v1378_v52  ;;  %v1517_v34 = vpop.f32.mrb[25].mxu1 }
 0x2b8   : > { %v1518_v36 = vpop.f32.mrb[26].mxu1  ;;  %v2281_v34 = vpop.permute.xlu0 %2280 }
 0x2b9   : > { %v1519_v38 = vadd.f32 %v1518_v36, %v1381_v54  ;;  %v1520_v39 = vpop.f32.mrb[27].mxu1  ;;  %v1716_v41 = vadd.f32 %v1697_v56, %v1516_v35  ;;  %v6885_v36 = vld [vmem:[%s8727_s5 + $0x108] sm:$0xff]   ;;  %2303 = vst.msk [vmem:[#allocation6 + $0x20] sm:$0xff] %vm2237_vm7, %v2281_v34 }
 0x2ba   : > { %v2069_v42 = vpop.f32.mrb[52].mxu0  ;;  %6202 = vmatprep.subr.bf16.mxu1 %v6885_v36 }
 0x2bb   : > { %v2071_v37 = vpop.f32.mrb[53].mxu0  ;;  %v1717_v47 = vadd.f32 %v1700_v57, %v1519_v38  ;;  %v6886_v38 = vld [vmem:[%s8727_s5 + $0xc8] sm:$0xff]  }
 0x2bc   : > { %v2072_v48 = vpop.f32.mrb[54].mxu0  ;;  %6203 = vmatpush3.bf16.msra.mxu1 %v6886_v38 }
 0x2bd   : > { %v2074_v50 = vpop.f32.mrb[55].mxu0 }
 0x2be   : > { %v1523_v40 = vpop.f32.mrb[28].mxu1 }
 0x2bf   : > { %v1524_v51 = vadd.f32 %v1523_v40, %v1386_v2  ;;  %v1525_v43 = vpop.f32.mrb[29].mxu1 }
 0x2c0   : > { %v1526_v53 = vpop.f32.mrb[30].mxu1  ;;  %v2216_v43 = vpop.permute.xlu0 %2215 }
 0x2c1   : > { %v1527_v55 = vadd.f32 %v1526_v53, %v1389_v46  ;;  %v1528_v49 = vpop.f32.mrb[31].mxu1  ;;  %v7855_v59 = vadd.f32 %v1705_v17, %v1524_v51  ;;  %v6889_v53 = vld [vmem:[%s8727_s5 + $0x110] sm:$0xff]  }
 0x2c2   : > { %v2077_v58 = vpop.f32.mrb[56].mxu0  ;;  %6204 = vmatprep.subr.bf16.mxu1 %v6889_v53 }
 0x2c3   : > { %v2079_v52 = vpop.f32.mrb[57].mxu0  ;;  %v7857_v60 = vadd.f32 %v1708_v20, %v1527_v55  ;;  %v6890_v55 = vld [vmem:[%s8727_s5 + $0xd0] sm:$0xff]  }
 0x2c4   : > { %v2080_v54 = vpop.f32.mrb[58].mxu0  ;;  %6205 = vmatpush3.bf16.msra.mxu1 %v6890_v55 }
 0x2c5   : > { %v2082_v26 = vpop.f32.mrb[59].mxu0 }
 0x2ca   : > { %v7859_v56 = vpop.f32.mrb[60].mxu0 }
 0x2cb   : > { %v2087_v61 = vpop.f32.mrb[61].mxu0 }
 0x2cc   : > { %v7861_v57 = vpop.f32.mrb[62].mxu0 }
 0x2cd   : > { %v2090_v44 = vpop.f32.mrb[63].mxu0 }
 0x2ce   : > { %v1871_v0 = vpop.f32.mrb[32].mxu1 }
 0x2cf   : > { %v1902_v2 = vadd.f32 %v1871_v0, %v1712_v16  ;;  %v1873_v3 = vpop.f32.mrb[33].mxu1 }
 0x2d0   : > { %v1874_v5 = vpop.f32.mrb[34].mxu1 }
 0x2d1   : > { %v2092_v46 = vadd.f32 %v2061_v25, %v1902_v2  ;;  %v1903_v63 = vadd.f32 %v1874_v5, %v1713_v19  ;;  %v1876_v6 = vpop.f32.mrb[35].mxu1  ;;  %v6893_v5 = vld [vmem:[%s8727_s5 + $0x118] sm:$0xff]  }
 0x2d2   : > { %6206 = vmatprep.subr.bf16.mxu1 %v6893_v5 }
 0x2d3   : > { %v2107_v7 = vadd.f32 %v7866_v4, %v2092_v46  ;;  %v2093_v62 = vadd.f32 %v2064_v32, %v1903_v63 }
 0x2d5   : > { %v2115_v1 = vmax.f32 %v2107_v7, 0.0  ;;  %v2108_v8 = vadd.f32 %v7866_v4, %v2093_v62 }
 0x2d6   : > { %v1879_v9 = vpop.f32.mrb[36].mxu1 }
 0x2d7   : > { %v2116_v11 = vmax.f32 %v2108_v8, 0.0  ;;  %v1904_v13 = vadd.f32 %v1879_v9, %v1714_v28  ;;  %v1881_v14 = vpop.f32.mrb[37].mxu1  ;;  %v2141_v16 = vsel %vm2123_vm5, %v2115_v1, -inf }
 0x2d8   : > { %v1882_v15 = vpop.f32.mrb[38].mxu1 }
 0x2d9   : > { %v2142_v17 = vsel %vm2123_vm5, %v2116_v11, -inf  ;;  %v2094_v18 = vadd.f32 %v2069_v42, %v1904_v13  ;;  %v1905_v20 = vadd.f32 %v1882_v15, %v1715_v30  ;;  %v1884_v21 = vpop.f32.mrb[39].mxu1  ;;  %v6897_v13 = vld [vmem:[%s8727_s5 + $0x40] sm:$0xff]  }
 0x2da   : > { %v2143_v19 = vmax.f32 %v2141_v16, %v2142_v17 }
 0x2db   : > { %v2109_v22 = vadd.f32 %v7866_v4, %v2094_v18  ;;  %v2095_v23 = vadd.f32 %v2072_v48, %v1905_v20  ;;  %v2331_v20 = vld [vmem:[#allocation6 + $0x28] sm:$0xff] }
 0x2dc   : > { %2153 = vst.msk [vmem:[#allocation9] sm:$0xff] %vm2123_vm5, %v2143_v19 }
 0x2dd   : > { %v2117_v31 = vmax.f32 %v2109_v22, 0.0  ;;  %v2110_v10 = vadd.f32 %v7866_v4, %v2095_v23 }
 0x2de   : > { %v1887_v12 = vpop.f32.mrb[40].mxu1 }
 0x2df   : > { %v2118_v27 = vmax.f32 %v2110_v10, 0.0  ;;  %v1906_v28 = vadd.f32 %v1887_v12, %v1716_v41  ;;  %v1889_v25 = vpop.f32.mrb[41].mxu1  ;;  %v2144_v32 = vsel %vm2123_vm5, %v2117_v31, -inf  ;;  %v2182_v41 = vld [vmem:[#allocation3 + $0x10] sm:$0xff] }
 0x2e0   : > { %v1890_v29 = vpop.f32.mrb[42].mxu1  ;;  %2190 = vst.msk [vmem:[#allocation6 + $0x18] sm:$0xff] %vm2123_vm5, %v2182_v41  ;;  %v2181_v25 = vld [vmem:[#allocation3] sm:$0xff] }
 0x2e1   : > { %v2145_v30 = vsel %vm2123_vm5, %v2118_v27, -inf  ;;  %v2096_v24 = vadd.f32 %v2077_v58, %v1906_v28  ;;  %v1907_v33 = vadd.f32 %v1890_v29, %v1717_v47  ;;  %v1892_v35 = vpop.f32.mrb[43].mxu1  ;;  %2239 = vst.msk [vmem:[#allocation6 + $0x18] sm:$0xff] %vm2237_vm7, %v2216_v43  ;;  %v2187_v41 = vld [vmem:[#allocation3 + $0x60] sm:$0xff] }
 0x2e2   : > { %v2146_v39 = vmax.f32 %v2144_v32, %v2145_v30  ;;  %2189 = vst.msk [vmem:[#allocation6] sm:$0xff] %vm2123_vm5, %v2181_v25  ;;  %v2262_v32 = vld [vmem:[#allocation3 + $0x3] sm:$0xff]  ;;  %2195 = vst.msk [vmem:[#allocation6 + $0x90] sm:$0xff] %vm2123_vm5, %v2187_v41 }
 0x2e3   : > { %v2111_v42 = vadd.f32 %v7866_v4, %v2096_v24  ;;  %v2097_v37 = vadd.f32 %v2080_v54, %v1907_v33  ;;  %v2157_v48 = vld [vmem:[#allocation9] ss:$2 sm:$0xf]  ;;  %v2165_v50 = vld [vmem:[#allocation9 + $0x1] ss:$2 sm:$0xf] }
 0x2e4   : > { %2154 = vst.msk [vmem:[#allocation9 + $0x8] sm:$0xff] %vm2123_vm5, %v2146_v39  ;;  %v2172_v47 = vmax.f32 %v2157_v48, %v2165_v50  ;;  %v2252_v35 = vld [vmem:[#allocation3 + $0x62] sm:$0xff] }
 0x2e5   : > { %v2119_v40 = vmax.f32 %v2111_v42, 0.0  ;;  %v2112_v51 = vadd.f32 %v7866_v4, %v2097_v37  ;;  %2260 = vst.msk [vmem:[#allocation6 + $0x98] sm:$0xff] %vm2123_vm5, %v2252_v35  ;;  %v2328_v37 = vld [vmem:[#allocation6 + $0x10] sm:$0xff]  ;;  %v2197_v48 = vld [vmem:[#allocation3 + $0x1] sm:$0xff] }
 0x2e6   : > { %v1895_v49 = vpop.f32.mrb[44].mxu1  ;;  %2177 = vst.msk [vmem:[#allocation3 + $0x22] sm:$0xf] %vm2125_vm6, %v2172_v47  ;;  %v6913_v41 = vld [vmem:[%s8727_s5 + $0x1c8] sm:$0xff]  }
 0x2e7   : > { %v2120_v58 = vmax.f32 %v2112_v51, 0.0  ;;  %v1908_v52 = vadd.f32 %v1895_v49, %v7855_v59  ;;  %v1897_v54 = vpop.f32.mrb[45].mxu1  ;;  %v2147_v61 = vsel %vm2123_vm5, %v2119_v40, -inf  ;;  %v6894_v59 = vld [vmem:[%s8727_s5 + $0xd8] sm:$0xff]   ;;  %v2340_v51 = vpack.c.bf16 %v2331_v20, %v2328_v37  ;;  %v2268_v49 = vld [vmem:[#allocation3 + $0x63] sm:$0xff] }
 0x2e8   : > { %v1898_v26 = vpop.f32.mrb[46].mxu1  ;;  %6207 = vmatpush3.bf16.msra.mxu1 %v6894_v59  ;;  %v6879_v59 = vld [vmem:[%s8727_s5 + $0x188] sm:$0xff]  }
 0x2e9   : > { %v2148_v44 = vsel %vm2123_vm5, %v2120_v58, -inf  ;;  %v1909_v0 = vadd.f32 %v1898_v26, %v7857_v60  ;;  %v2098_v2 = vadd.f32 %v7859_v56, %v1908_v52  ;;  %v1900_v3 = vpop.f32.mrb[47].mxu1  ;;  %6226 = vmatprep.subr.bf16.mxu1 %v6897_v13  ;;  %v6866_v58 = vld [vmem:[%s8727_s5 + $0x88] sm:$0xff]   ;;  %v6867_v26 = vld [vmem:[%s8727_s5 + $0x90] sm:$0xff]   ;;  %v6903_v13 = vld [vmem:[%s8727_s5 + $0x1b8] sm:$0xff]  }
 0x2ea   : > { %v2149_v46 = vmax.f32 %v2147_v61, %v2148_v44  ;;  %v2203_v61 = vld [vmem:[#allocation3 + $0x61] sm:$0xff]  ;;  %v2269_v44 = vld [vmem:[#allocation3 + $0x73] sm:$0xff] }
 0x2eb   : > { %v2113_v63 = vadd.f32 %v7866_v4, %v2098_v2  ;;  %v2099_v6 = vadd.f32 %v7861_v57, %v1909_v0  ;;  %v2159_v7 = vld [vmem:[#allocation9 + $0x8] ss:$2 sm:$0xf]  ;;  %v2167_v62 = vld [vmem:[#allocation9 + $0x9] ss:$2 sm:$0xf] }
 0x2ec   : > { %2155 = vst.msk [vmem:[#allocation9 + $0x10] sm:$0xff] %vm2123_vm5, %v2149_v46  ;;  %v2173_v60 = vmax.f32 %v2159_v7, %v2167_v62  ;;  %v2204_v0 = vld [vmem:[#allocation3 + $0x71] sm:$0xff]  ;;  %v6875_v2 = vld [vmem:[%s8727_s5 + $0x180] sm:$0xff]   ;;  %v6880_v46 = vld [vmem:[%s8727_s5 + $0x148] sm:$0xff]  }
 0x2ed   : > { %v2121_v56 = vmax.f32 %v2113_v63, 0.0  ;;  %v2114_v1 = vadd.f32 %v7866_v4, %v2099_v6  ;;  %v2264_v8 = vld [vmem:[#allocation3 + $0x23] sm:$0xff]  ;;  %v6883_v63 = vld [vmem:[%s8727_s5 + $0x190] sm:$0xff]   ;;  %v6887_v7 = vld [vmem:[%s8727_s5 + $0x198] sm:$0xff]  }
 0x2ee   : > { %v2312_v9 = vld [vmem:[#allocation3 + $0x24] sm:$0xff]  ;;  %2282 = vrot.lane.b32.xlu1 %v2264_v8, %s7071_s23  ;;  %2178 = vst.msk [vmem:[#allocation3 + $0x32] sm:$0xf] %vm2125_vm6, %v2173_v60  ;;  %v6884_v6 = vld [vmem:[%s8727_s5 + $0x150] sm:$0xff]   ;;  %v6888_v62 = vld [vmem:[%s8727_s5 + $0x158] sm:$0xff]  }
 0x2ef   : > { %2320 = vst.msk [vmem:[#allocation6 + $0x40] sm:$0xff] %vm2123_vm5, %v2312_v9  ;;  %v2248_v11 = vld [vmem:[#allocation3 + $0x22] sm:$0xff]  ;;  %v2122_v14 = vmax.f32 %v2114_v1, 0.0  ;;  %v2150_v15 = vsel %vm2123_vm5, %v2121_v56, -inf  ;;  %v2317_v1 = vld [vmem:[#allocation3 + $0x74] sm:$0xff] }
 0x2f0   : > { %v2183_v57 = vld [vmem:[#allocation3 + $0x20] sm:$0xff]  ;;  %2256 = vst.msk [vmem:[#allocation6 + $0x38] sm:$0xff] %vm2123_vm5, %v2248_v11  ;;  %v6895_v8 = vld [vmem:[%s8727_s5 + $0x1a8] sm:$0xff]   ;;  %2325 = vst.msk [vmem:[#allocation6 + $0xb8] sm:$0xff] %vm2123_vm5, %v2317_v1 }
 0x2f1   : > { %2191 = vst.msk [vmem:[#allocation6 + $0x30] sm:$0xff] %vm2123_vm5, %v2183_v57  ;;  %v2246_v4 = vld [vmem:[#allocation3 + $0x2] sm:$0xff]  ;;  %v2151_v16 = vsel %vm2123_vm5, %v2122_v14, -inf  ;;  %v6899_v11 = vld [vmem:[%s8727_s5 + $0x1b0] sm:$0xff]   ;;  %v6904_v14 = vld [vmem:[%s8727_s5 + $0x178] sm:$0xff]  }
 0x2f2   : > { %v2199_v17 = vld [vmem:[#allocation3 + $0x21] sm:$0xff]  ;;  %2254 = vst.msk [vmem:[#allocation6 + $0x8] sm:$0xff] %vm2123_vm5, %v2246_v4  ;;  %v2152_v18 = vmax.f32 %v2150_v15, %v2151_v16  ;;  %v6900_v57 = vld [vmem:[%s8727_s5 + $0x170] sm:$0xff]   ;;  %v6918_v1 = vld [vmem:[%s8727_s5 + $0x78] sm:$0xff]  }
 0x2f3   : > { %2217 = vrot.lane.b32.xlu1 %v2199_v17, %s7071_s23  ;;  %v2161_v21 = vld [vmem:[#allocation9 + $0x10] ss:$2 sm:$0xf]  ;;  %v2169_v19 = vld [vmem:[#allocation9 + $0x11] ss:$2 sm:$0xf] }
 0x2f4   : > { %v2174_v22 = vmax.f32 %v2161_v21, %v2169_v19  ;;  %2156 = vst.msk [vmem:[#allocation9 + $0x18] sm:$0xff] %vm2123_vm5, %v2152_v18  ;;  %v6876_v3 = vld [vmem:[%s8727_s5 + $0x140] sm:$0xff]   ;;  %v6896_v9 = vld [vmem:[%s8727_s5 + $0x168] sm:$0xff]   ;;  %v2253_v15 = vld [vmem:[#allocation3 + $0x72] sm:$0xff] }
 0x2f5   : > { %v2265_v23 = vld [vmem:[#allocation3 + $0x33] sm:$0xff]  ;;  %v6891_v60 = vld [vmem:[%s8727_s5 + $0x1a0] sm:$0xff]   ;;  %2261 = vst.msk [vmem:[#allocation6 + $0xb0] sm:$0xff] %vm2123_vm5, %v2253_v15  ;;  %v6925_v15 = vld [vmem:[%s8727_s5 + $0x268] sm:$0xff]  }
 0x2f6   : > { %v2313_v31 = vld [vmem:[#allocation3 + $0x34] sm:$0xff]  ;;  %v7924_v10 = vld [vmem:[#allocation6 + $0x40] sm:$0xff]  ;;  %2179 = vst.msk [vmem:[#allocation3 + $0x42] sm:$0xf] %vm2125_vm6, %v2174_v22  ;;  %2284 = vrot.lane.b32.xlu0 %v2265_v23, %s7071_s23 }
 0x2f7   : > { %2321 = vst.msk [vmem:[#allocation6 + $0x58] sm:$0xff] %vm2123_vm5, %v2313_v31  ;;  %v2389_v12 = vpack.c.bf16 %v7924_v10, %v2331_v20  ;;  %v2249_v27 = vld [vmem:[#allocation3 + $0x32] sm:$0xff]  ;;  %v6892_v56 = vld [vmem:[%s8727_s5 + $0x160] sm:$0xff]  }
 0x2f8   : > { %v2184_v28 = vld [vmem:[#allocation3 + $0x30] sm:$0xff]  ;;  %2257 = vst.msk [vmem:[#allocation6 + $0x50] sm:$0xff] %vm2123_vm5, %v2249_v27  ;;  %v6910_v4 = vld [vmem:[%s8727_s5 + $0x1c0] sm:$0xff]   ;;  %v8037_v23 = vld [vmem:[#allocation6 + $0x18] sm:$0xff] }
 0x2f9   : > { %2192 = vst.msk [vmem:[#allocation6 + $0x48] sm:$0xff] %vm2123_vm5, %v2184_v28  ;;  %6588 = vmatprep.mubr.msk.bf16.mxu0 %vm2123_vm5, %v2389_v12  ;;  %v2200_v29 = vld [vmem:[#allocation3 + $0x31] sm:$0xff]  ;;  %v8033_v20 = vld [vmem:[#allocation6 + $0x20] sm:$0xff]  ;;  %v6901_v28 = vld [vmem:[%s8727_s5 + $0x48] sm:$0xff]  }
 0x2fa   : > { %2219 = vrot.lane.b32.xlu0 %v2200_v29, %s7071_s23  ;;  %v2188_v16 = vld [vmem:[#allocation3 + $0x70] sm:$0xff]  ;;  %v6898_v12 = vld [vmem:[%s8727_s5] sm:$0xff]  }
 0x2fb   : > { %v2163_v30 = vld [vmem:[#allocation9 + $0x18] ss:$2 sm:$0xf]  ;;  %v2171_v24 = vld [vmem:[#allocation9 + $0x19] ss:$2 sm:$0xf] }
 0x2fc   : > { %v2175_v33 = vmax.f32 %v2163_v30, %v2171_v24  ;;  %2196 = vst.msk [vmem:[#allocation6 + $0xa8] sm:$0xff] %vm2123_vm5, %v2188_v16  ;;  %v6926_v16 = vld [vmem:[%s8727_s5 + $0x1e8] sm:$0xff]  }
 0x2fd   : > { %v2314_v34 = vld [vmem:[#allocation3 + $0x44] sm:$0xff] }
 0x2fe   : > { %v2266_v36 = vld [vmem:[#allocation3 + $0x43] sm:$0xff]  ;;  %2322 = vst.msk [vmem:[#allocation6 + $0x70] sm:$0xff] %vm2123_vm5, %v2314_v34  ;;  %2278 = vrot.lane.b32.xlu0 %v2262_v32, %s7071_s23  ;;  %v2337_v50 = vld [vmem:[#allocation6 + $0x58] sm:$0xff]  ;;  %v6906_v34 = vld [vmem:[%s8727_s5 + $0x10] sm:$0xff]  }
 0x2ff   : > { %2286 = vrot.lane.b32.xlu1 %v2266_v36, %s7071_s23  ;;  %2180 = vst.msk [vmem:[#allocation3 + $0x52] sm:$0xf] %vm2125_vm6, %v2175_v33  ;;  %v2250_v38 = vld [vmem:[#allocation3 + $0x42] sm:$0xff]  ;;  %v7979_v5 = vpack.c.bf16 %v2337_v50, %v7924_v10  ;;  %v6905_v33 = vld [vmem:[%s8727_s5 + $0x50] sm:$0xff]  }
 0x300   : > { %v2185_v39 = vld [vmem:[#allocation3 + $0x40] sm:$0xff]  ;;  %2258 = vst.msk [vmem:[#allocation6 + $0x68] sm:$0xff] %vm2123_vm5, %v2250_v38  ;;  %v6902_v32 = vld [vmem:[%s8727_s5 + $0x8] sm:$0xff]  }
 0x301   : > { %2193 = vst.msk [vmem:[#allocation6 + $0x60] sm:$0xff] %vm2123_vm5, %v2185_v39  ;;  %v2201_v42 = vld [vmem:[#allocation3 + $0x41] sm:$0xff]  ;;  %v6907_v39 = vld [vmem:[%s8727_s5 + $0x58] sm:$0xff]  }
 0x303   : > { %2221 = vrot.lane.b32.xlu1 %v2201_v42, %s7071_s23 }
 0x305   : > { %v7944_v47 = vld [vmem:[#allocation6 + $0x70] sm:$0xff] }
 0x306   : > { %v2267_v40 = vld [vmem:[#allocation3 + $0x53] sm:$0xff]  ;;  %v7947_v43 = vpack.c.bf16 %v7944_v47, %v2337_v50 }
 0x307   : > { %2213 = vrot.lane.b32.xlu1 %v2197_v48, %s7071_s23  ;;  %2288 = vrot.lane.b32.xlu0 %v2267_v40, %s7071_s23  ;;  %v2251_v53 = vld [vmem:[#allocation3 + $0x52] sm:$0xff] }
 0x308   : > { %v2186_v55 = vld [vmem:[#allocation3 + $0x50] sm:$0xff]  ;;  %2259 = vst.msk [vmem:[#allocation6 + $0x80] sm:$0xff] %vm2123_vm5, %v2251_v53  ;;  %6589 = vmatmul.mubr.msk.bf16.vlgmr.msra.gmra.mrb[64].mxu0 %vm2123_vm5, %v7947_v43  ;;  %v6908_v50 = vld [vmem:[%s8727_s5 + $0x18] sm:$0xff]  }
 0x309   : > { %2194 = vst.msk [vmem:[#allocation6 + $0x78] sm:$0xff] %vm2123_vm5, %v2186_v55  ;;  %v2315_v52 = vld [vmem:[#allocation3 + $0x54] sm:$0xff]  ;;  %6593 = vmatpush3.bf16.msra.mxu0 %v7813_v45  ;;  %6600 = vmatprep.mubr.msk.bf16.mxu0 %vm2123_vm5, %v2340_v51  ;;  %v6909_v51 = vld [vmem:[%s8727_s5 + $0x60] sm:$0xff]  }
 0x30a   : > { %2323 = vst.msk [vmem:[#allocation6 + $0x88] sm:$0xff] %vm2123_vm5, %v2315_v52  ;;  %v2202_v54 = vld [vmem:[#allocation3 + $0x51] sm:$0xff]  ;;  %6594 = vmatprep.subr.bf16.mxu0 %v6866_v58 }
 0x30b   : > { %2223 = vrot.lane.b32.xlu1 %v2202_v54, %s7071_s23  ;;  %2290 = vrot.lane.b32.xlu0 %v2268_v49, %s7071_s23  ;;  %v6868_v45 = vld [vmem:[%s8727_s5 + $0x98] sm:$0xff]   ;;  %v6916_v53 = vld [vmem:[%s8727_s5 + $0x1d0] sm:$0xff]  }
 0x30c   : > { %v6911_v54 = vld [vmem:[%s8727_s5 + $0x20] sm:$0xff]  }
 0x30d   : > { %6595 = vmatpush3.bf16.msra.mxu0 %v6866_v58 }
 0x30e   : > { %6596 = vmatprep.subr.bf16.mxu0 %v6867_v26 }
 0x30f   : > { %2225 = vrot.lane.b32.xlu1 %v2203_v61, %s7071_s23  ;;  %2292 = vrot.lane.b32.xlu0 %v2269_v44, %s7071_s23  ;;  %v6912_v61 = vld [vmem:[%s8727_s5 + $0x68] sm:$0xff]  }
 0x311   : > { %6597 = vmatpush3.bf16.msra.mxu0 %v6867_v26 }
 0x312   : > { %6598 = vmatprep.subr.bf16.mxu0 %v6868_v45 }
 0x313   : > { %2227 = vrot.lane.b32.xlu1 %v2204_v0, %s7071_s23 }
 0x315   : > { %6599 = vmatpush3.bf16.msra.mxu0 %v6868_v45  ;;  %v6919_v45 = vld [vmem:[%s8727_s5 + $0x1d8] sm:$0xff]  }
 0x316   : > { %6260 = vmatprep.subr.bf16.mxu0 %v6875_v2  ;;  %v6914_v2 = vld [vmem:[%s8727_s5 + $0x28] sm:$0xff]  }
 0x318   : > { %6601 = vmatmul.mubr.msk.bf16.vlgmr.msra.gmra.mrb[64].mxu0 %vm2123_vm5, %v7979_v5 }
 0x319   : > { %6261 = vmatpush3.bf16.msra.mxu0 %v6876_v3 }
 0x31a   : > { %6262 = vmatprep.subr.bf16.mxu0 %v6879_v59 }
 0x31d   : > { %6263 = vmatpush3.bf16.msra.mxu0 %v6880_v46  ;;  %v6915_v46 = vld [vmem:[%s8727_s5 + $0x70] sm:$0xff]  }
 0x31e   : > { %6264 = vmatprep.subr.bf16.mxu0 %v6883_v63 }
 0x321   : > { %6265 = vmatpush3.bf16.msra.mxu0 %v6884_v6  ;;  %v6922_v6 = vld [vmem:[%s8727_s5 + $0x260] sm:$0xff]  }
 0x322   : > { %6266 = vmatprep.subr.bf16.mxu0 %v6887_v7  ;;  %v6917_v7 = vld [vmem:[%s8727_s5 + $0x30] sm:$0xff]  }
 0x325   : > { %6267 = vmatpush3.bf16.msra.mxu0 %v6888_v62 }
 0x326   : > { %6268 = vmatprep.subr.bf16.mxu0 %v6891_v60 }
 0x329   : > { %6269 = vmatpush3.bf16.msra.mxu0 %v6892_v56 }
 0x32a   : > { %6270 = vmatprep.subr.bf16.mxu0 %v6895_v8  ;;  %v6920_v8 = vld [vmem:[%s8727_s5 + $0x38] sm:$0xff]  }
 0x32d   : > { %6271 = vmatpush3.bf16.msra.mxu0 %v6896_v9  ;;  %v6921_v9 = vld [vmem:[%s8727_s5 + $0x220] sm:$0xff]  }
 0x32e   : > { %6272 = vmatprep.subr.bf16.mxu0 %v6899_v11 }
 0x331   : > { %6273 = vmatpush3.bf16.msra.mxu0 %v6900_v57  ;;  %v2893_v57 = vld [vmem:[#allocation6 + $0x88] sm:$0xff] }
 0x332   : > { %6274 = vmatprep.subr.bf16.mxu0 %v6903_v13  ;;  %v6923_v13 = vld [vmem:[%s8727_s5 + $0x1e0] sm:$0xff]  }
 0x335   : > { %6275 = vmatpush3.bf16.msra.mxu0 %v6904_v14 }
 0x336   : > { %6604 = vmatprep.subr.bf16.mxu0 %v6910_v4 }
 0x360   : > { %v2283_v17 = vpop.permute.xlu1 %2282 }
 0x361   : > { %2304 = vst.msk [vmem:[#allocation6 + $0x38] sm:$0xff] %vm2237_vm7, %v2283_v17  ;;  %v6928_v17 = vld [vmem:[%s8727_s5 + $0x270] sm:$0xff]  }
 0x365   : > { %v2218_v18 = vpop.permute.xlu1 %2217 }
 0x366   : > { %2240 = vst.msk [vmem:[#allocation6 + $0x30] sm:$0xff] %vm2237_vm7, %v2218_v18  ;;  %v6929_v18 = vld [vmem:[%s8727_s5 + $0x1f0] sm:$0xff]  }
 0x368   : > { %v2285_v21 = vpop.permute.xlu0 %2284  ;;  %v2333_v19 = vld [vmem:[#allocation6 + $0x38] sm:$0xff] }
 0x369   : > { %2305 = vst.msk [vmem:[#allocation6 + $0x50] sm:$0xff] %vm2237_vm7, %v2285_v21  ;;  %v2388_v22 = vpack.c.bf16 %v2333_v19, %v8033_v20  ;;  %v6932_v21 = vld [vmem:[%s8727_s5 + $0x1f8] sm:$0xff]  }
 0x36b   : > { %2592 = vmatprep.mubr.bf16.mxu1 %v2388_v22  ;;  %v6934_v22 = vld [vmem:[%s8727_s5 + $0x300] sm:$0xff]  }
 0x36c   : > { %v2220_v31 = vpop.permute.xlu0 %2219 }
 0x36d   : > { %v2332_v10 = vld [vmem:[#allocation6 + $0x30] sm:$0xff]  ;;  %2241 = vst.msk [vmem:[#allocation6 + $0x48] sm:$0xff] %vm2237_vm7, %v2220_v31  ;;  %v6935_v31 = vld [vmem:[%s8727_s5 + $0x200] sm:$0xff]  }
 0x36e   : > { %v2387_v27 = vpack.c.bf16 %v2332_v10, %v8037_v23 }
 0x370   : > { %2593 = vmatmul.mubr.bf16.vlgmr.msra.gmra.mrb[48].mxu1 %v2387_v27  ;;  %v2279_v29 = vpop.permute.xlu0 %2278  ;;  %v2886_v30 = vld [vmem:[#allocation6 + $0x50] sm:$0xff]  ;;  %v6937_v27 = vld [vmem:[%s8727_s5 + $0x308] sm:$0xff]  }
 0x371   : > { %6227 = vmatpush3.bf16.msra.mxu1 %v6898_v12  ;;  %v2287_v25 = vpop.permute.xlu1 %2286  ;;  %2302 = vst.msk [vmem:[#allocation6 + $0x8] sm:$0xff] %vm2237_vm7, %v2279_v29  ;;  %v8052_v24 = vpack.c.bf16 %v2886_v30, %v2333_v19  ;;  %v6933_v19 = vld [vmem:[%s8727_s5 + $0x240] sm:$0xff]   ;;  %v6936_v12 = vld [vmem:[%s8727_s5 + $0x248] sm:$0xff]   ;;  %v6940_v29 = vld [vmem:[%s8727_s5 + $0x310] sm:$0xff]  }
 0x372   : > { %2306 = vst.msk [vmem:[#allocation6 + $0x68] sm:$0xff] %vm2237_vm7, %v2287_v25  ;;  %6228 = vmatprep.subr.bf16.mxu1 %v6901_v28  ;;  %v6938_v28 = vld [vmem:[%s8727_s5 + $0x208] sm:$0xff]   ;;  %v6939_v25 = vld [vmem:[%s8727_s5 + $0x250] sm:$0xff]  }
 0x373   : > { %3099 = vmatprep.mubr.bf16.mxu0 %v8052_v24 }
 0x374   : > { %v2885_v36 = vld [vmem:[#allocation6 + $0x48] sm:$0xff] }
 0x375   : > { %6229 = vmatpush3.bf16.msra.mxu1 %v6902_v32  ;;  %v2222_v35 = vpop.permute.xlu1 %2221  ;;  %v8062_v38 = vpack.c.bf16 %v2885_v36, %v2332_v10  ;;  %v6941_v32 = vld [vmem:[%s8727_s5 + $0x210] sm:$0xff]  }
 0x376   : > { %2242 = vst.msk [vmem:[#allocation6 + $0x60] sm:$0xff] %vm2237_vm7, %v2222_v35  ;;  %6230 = vmatprep.subr.bf16.mxu1 %v6905_v33  ;;  %v6944_v33 = vld [vmem:[%s8727_s5 + $0x218] sm:$0xff]   ;;  %v6945_v35 = vld [vmem:[%s8727_s5 + $0x2c0] sm:$0xff]  }
 0x377   : > { %3100 = vmatmul.mubr.bf16.vlgmr.msra.gmra.mrb[68].mxu0 %v8062_v38 }
 0x378   : > { %6605 = vmatpush3.bf16.msra.mxu0 %v6910_v4  ;;  %v2327_v55 = vld [vmem:[#allocation6 + $0x8] sm:$0xff] }
 0x379   : > { %6231 = vmatpush3.bf16.msra.mxu1 %v6906_v34  ;;  %v2214_v42 = vpop.permute.xlu1 %2213  ;;  %v2289_v37 = vpop.permute.xlu0 %2288  ;;  %v2385_v48 = vld [vmem:[#allocation6 + $0x68] sm:$0xff]  ;;  %6606 = vmatprep.subr.bf16.mxu0 %v6913_v41  ;;  %v2339_v44 = vpack.c.bf16 %v8033_v20, %v2327_v55  ;;  %v6931_v20 = vld [vmem:[%s8727_s5 + $0x278] sm:$0xff]  }
 0x37a   : > { %2238 = vst.msk [vmem:[#allocation6] sm:$0xff] %vm2237_vm7, %v2214_v42  ;;  %2307 = vst.msk [vmem:[#allocation6 + $0x80] sm:$0xff] %vm2237_vm7, %v2289_v37  ;;  %6232 = vmatprep.subr.bf16.mxu1 %v6907_v39  ;;  %v8076_v40 = vpack.c.bf16 %v2385_v48, %v2886_v30  ;;  %v6924_v4 = vld [vmem:[%s8727_s5 + $0x228] sm:$0xff]   ;;  %v6942_v30 = vld [vmem:[%s8727_s5 + $0x258] sm:$0xff]  }
 0x37b   : > { %v3467_v34 = vld [vmem:[#allocation6 + $0xb8] sm:$0xff]  ;;  %v6946_v39 = vld [vmem:[%s8727_s5 + $0x280] sm:$0xff]   ;;  %v6947_v42 = vld [vmem:[%s8727_s5 + $0x2c8] sm:$0xff]  }
 0x37c   : > { %2600 = vmatprep.mubr.bf16.mxu1 %v8076_v40  ;;  %6607 = vmatpush3.bf16.msra.mxu0 %v6913_v41  ;;  %v6948_v37 = vld [vmem:[%s8727_s5 + $0x288] sm:$0xff]   ;;  %v6952_v55 = vld [vmem:[%s8727_s5 + $0x298] sm:$0xff]  }
 0x37d   : > { %6233 = vmatpush3.bf16.msra.mxu1 %v6908_v50  ;;  %v2224_v49 = vpop.permute.xlu1 %2223  ;;  %v2291_v58 = vpop.permute.xlu0 %2290  ;;  %v2384_v52 = vld [vmem:[#allocation6 + $0x60] sm:$0xff]  ;;  %6608 = vmatprep.subr.bf16.mxu0 %v6916_v53  ;;  %v6949_v50 = vld [vmem:[%s8727_s5 + $0x2d0] sm:$0xff]  }
 0x37e   : > { %2243 = vst.msk [vmem:[#allocation6 + $0x78] sm:$0xff] %vm2237_vm7, %v2224_v49  ;;  %2308 = vst.msk [vmem:[#allocation6 + $0x98] sm:$0xff] %vm2237_vm7, %v2291_v58  ;;  %6234 = vmatprep.subr.bf16.mxu1 %v6909_v51  ;;  %v8090_v26 = vpack.c.bf16 %v2384_v52, %v2885_v36  ;;  %v6950_v51 = vld [vmem:[%s8727_s5 + $0x290] sm:$0xff]   ;;  %v6953_v49 = vld [vmem:[%s8727_s5 + $0x2e0] sm:$0xff]  }
 0x37f   : > { %v6954_v58 = vld [vmem:[%s8727_s5 + $0x2a0] sm:$0xff]  }
 0x380   : > { %2601 = vmatmul.mubr.bf16.gmra.mrb[52].mxu1 %v8090_v26  ;;  %6609 = vmatpush3.bf16.msra.mxu0 %v6916_v53  ;;  %v6951_v53 = vld [vmem:[%s8727_s5 + $0x2d8] sm:$0xff]  }
 0x381   : > { %6235 = vmatpush3.bf16.msra.mxu1 %v6911_v54  ;;  %v2226_v0 = vpop.permute.xlu1 %2225  ;;  %2816 = vmatprep.mubr.bf16.mxu1 %v2339_v44  ;;  %v8103_v3 = vld [vmem:[#allocation6 + $0x80] sm:$0xff]  ;;  %v2293_v63 = vpop.permute.xlu0 %2292  ;;  %v6956_v54 = vld [vmem:[%s8727_s5 + $0x2a8] sm:$0xff]   ;;  %v6959_v44 = vld [vmem:[%s8727_s5 + $0x2f8] sm:$0xff]  }
 0x382   : > { %2244 = vst.msk [vmem:[#allocation6 + $0x90] sm:$0xff] %vm2237_vm7, %v2226_v0  ;;  %6236 = vmatprep.subr.bf16.mxu1 %v6912_v61  ;;  %v8107_v59 = vpack.c.bf16 %v8103_v3, %v2385_v48  ;;  %6610 = vmatprep.subr.bf16.mxu0 %v6919_v45  ;;  %2309 = vst.msk [vmem:[#allocation6 + $0xb0] sm:$0xff] %vm2237_vm7, %v2293_v63  ;;  %v2326_v11 = vld [vmem:[#allocation6] sm:$0xff]  ;;  %v6958_v61 = vld [vmem:[%s8727_s5 + $0x2b0] sm:$0xff]  }
 0x383   : > { %v2338_v14 = vpack.c.bf16 %v8037_v23, %v2326_v11  ;;  %v3180_v23 = vld [vmem:[#allocation6 + $0xa0] sm:$0xff]  ;;  %v3796_v63 = vld [vmem:[#allocation4 + $0x11] sm:$0xff] }
 0x384   : > { %3107 = vmatprep.mubr.bf16.mxu0 %v8107_v59  ;;  %6611 = vmatpush3.bf16.msra.mxu0 %v6919_v45  ;;  %v3186_v10 = vpack.c.bf16 %v3180_v23, %v2893_v57  ;;  %v6960_v45 = vld [vmem:[%s8727_s5 + $0x2b8] sm:$0xff]  }
 0x385   : > { %6237 = vmatpush3.bf16.msra.mxu1 %v6914_v2  ;;  %v8120_v62 = vld [vmem:[#allocation6 + $0x78] sm:$0xff]  ;;  %v2228_v60 = vpop.permute.xlu1 %2227  ;;  %6616 = vmatprep.subr.bf16.mxu0 %v6922_v6 }
 0x386   : > { %6238 = vmatprep.subr.bf16.mxu1 %v6915_v46  ;;  %v8123_v56 = vpack.c.bf16 %v8120_v62, %v2384_v52  ;;  %2245 = vst.msk [vmem:[#allocation6 + $0xa8] sm:$0xff] %vm2237_vm7, %v2228_v60  ;;  %v3179_v36 = vld [vmem:[#allocation6 + $0x98] sm:$0xff]  ;;  %v6955_v52 = vld [vmem:[%s8727_s5 + $0x2e8] sm:$0xff]   ;;  %v6963_v60 = vld [vmem:[%s8729_s7 + $0x130] sm:$0xff]  }
 0x387   : > { %v3185_v41 = vpack.c.bf16 %v3179_v36, %v8103_v3  ;;  %v3860_v46 = vld [vmem:[#allocation4 + $0x13] sm:$0xff] }
 0x388   : > { %3108 = vmatmul.mubr.bf16.gmra.mrb[72].mxu0 %v8123_v56  ;;  %3877 = vrot.lane.b32.xlu0 %v3860_v46, %s7071_s23  ;;  %v6964_v11 = vld [vmem:[%s8729_s7 + $0x138] sm:$0xff]  }
 0x389   : > { %6239 = vmatpush3.bf16.msra.mxu1 %v6917_v7  ;;  %6612 = vmatprep.mubr.msk.bf16.mxu0 %vm2123_vm5, %v7979_v5  ;;  %v2899_v5 = vpack.c.bf16 %v2893_v57, %v7944_v47  ;;  %v6927_v47 = vld [vmem:[%s8727_s5 + $0x230] sm:$0xff]   ;;  %v6961_v7 = vld [vmem:[%s8729_s7 + $0x120] sm:$0xff]  }
 0x38a   : > { %6240 = vmatprep.subr.bf16.mxu1 %v6918_v1  ;;  %v3178_v48 = vld [vmem:[#allocation6 + $0x90] sm:$0xff]  ;;  %v3913_v57 = vld [vmem:[#allocation4 + $0x64] sm:$0xff] }
 0x38b   : > { %v3466_v0 = vld [vmem:[#allocation6 + $0xb0] sm:$0xff]  ;;  %3921 = vst.msk [vmem:[#allocation7 + $0xa0] sm:$0xff] %vm2123_vm5, %v3913_v57 }
 0x38c   : > { %v3472_v2 = vpack.c.bf16 %v3466_v0, %v3179_v36  ;;  %3813 = vrot.lane.b32.xlu0 %v3796_v63, %s7071_s23 }
 0x38d   : > { %6241 = vmatpush3.bf16.msra.mxu1 %v6920_v8  ;;  %v3465_v3 = vld [vmem:[#allocation6 + $0xa8] sm:$0xff] }
 0x38e   : > { %6294 = vmatprep.subr.bf16.mxu1 %v6921_v9 }
 0x390   : > { %2817 = vmatmul.mubr.bf16.vlgmr.msra.gmra.mrb[56].mxu1 %v2338_v14  ;;  %6613 = vmatmul.mubr.msk.bf16.vlgmr.msra.gmra.mrb[64].mxu0 %vm2123_vm5, %v2899_v5 }
 0x391   : > { %2824 = vmatprep.mubr.bf16.mxu1 %v8052_v24  ;;  %6295 = vmatpush3.bf16.msra.mxu1 %v6923_v13  ;;  %v6943_v24 = vld [vmem:[%s8727_s5 + $0x318] sm:$0xff]  }
 0x392   : > { %6617 = vmatpush3.bf16.msra.mxu0 %v6922_v6  ;;  %6624 = vmatprep.mubr.msk.bf16.mxu0 %vm2123_vm5, %v7947_v43  ;;  %v6930_v43 = vld [vmem:[%s8727_s5 + $0x238] sm:$0xff]  }
 0x393   : > { %6296 = vmatprep.subr.bf16.mxu1 %v6924_v4  ;;  %6618 = vmatprep.subr.bf16.mxu0 %v6925_v15  ;;  %v3908_v6 = vld [vmem:[#allocation4 + $0x14] sm:$0xff] }
 0x394   : > { %3916 = vst.msk [vmem:[#allocation7 + $0x28] sm:$0xff] %vm2123_vm5, %v3908_v6 }
 0x395   : > { %6297 = vmatpush3.bf16.msra.mxu1 %v6926_v16 }
 0x396   : > { %6619 = vmatpush3.bf16.msra.mxu0 %v6925_v15  ;;  %6298 = vmatprep.subr.bf16.mxu1 %v6927_v47 }
 0x397   : > { %6620 = vmatprep.subr.bf16.mxu0 %v6928_v17 }
 0x398   : > { %2825 = vmatmul.mubr.bf16.gmra.mrb[60].mxu1 %v8062_v38  ;;  %v3473_v38 = vpack.c.bf16 %v3467_v34, %v3180_v23 }
 0x399   : > { %6299 = vmatpush3.bf16.msra.mxu1 %v6929_v18  ;;  %3386 = vmatprep.mubr.bf16.mxu1 %v8076_v40  ;;  %v3184_v40 = vpack.c.bf16 %v3178_v48, %v8120_v62  ;;  %v6962_v62 = vld [vmem:[%s8729_s7 + $0x128] sm:$0xff]  }
 0x39a   : > { %6621 = vmatpush3.bf16.msra.mxu0 %v6928_v17  ;;  %6300 = vmatprep.subr.bf16.mxu1 %v6930_v43 }
 0x39b   : > { %6622 = vmatprep.subr.bf16.mxu0 %v6931_v20 }
 0x39d   : > { %6301 = vmatpush3.bf16.msra.mxu1 %v6932_v21  ;;  %v6966_v21 = vld [vmem:[%s8729_s7 + $0xa0] sm:$0xff]  }
 0x39e   : > { %6623 = vmatpush3.bf16.msra.mxu0 %v6931_v20  ;;  %6302 = vmatprep.subr.bf16.mxu1 %v6933_v19  ;;  %v6965_v20 = vld [vmem:[%s8729_s7 + $0xe0] sm:$0xff]   ;;  %v6967_v19 = vld [vmem:[%s8729_s7 + $0xe8] sm:$0xff]  }
 0x39f   : > { %6628 = vmatprep.subr.bf16.mxu0 %v6934_v22 }
 0x3a1   : > { %6625 = vmatmul.mubr.msk.bf16.vlgmr.msra.gmra.mrb[64].mxu0 %vm2123_vm5, %v3186_v10  ;;  %6303 = vmatpush3.bf16.msra.mxu1 %v6935_v31  ;;  %v3844_v10 = vld [vmem:[#allocation4 + $0x12] sm:$0xff] }
 0x3a2   : > { %6629 = vmatpush3.bf16.msra.mxu0 %v6934_v22  ;;  %6636 = vmatprep.mubr.msk.bf16.mxu0 %vm2123_vm5, %v2899_v5  ;;  %3852 = vst.msk [vmem:[#allocation7 + $0x20] sm:$0xff] %vm2123_vm5, %v3844_v10 }
 0x3a3   : > { %6304 = vmatprep.subr.bf16.mxu1 %v6936_v12  ;;  %6630 = vmatprep.subr.bf16.mxu0 %v6937_v27  ;;  %v6972_v12 = vld [vmem:[%s8729_s7 + $0x40] sm:$0xff]  }
 0x3a5   : > { %6305 = vmatpush3.bf16.msra.mxu1 %v6938_v28  ;;  %v6968_v28 = vld [vmem:[%s8729_s7 + $0xa8] sm:$0xff]  }
 0x3a6   : > { %6631 = vmatpush3.bf16.msra.mxu0 %v6937_v27  ;;  %6306 = vmatprep.subr.bf16.mxu1 %v6939_v25  ;;  %v3780_v25 = vld [vmem:[#allocation4 + $0x10] sm:$0xff] }
 0x3a7   : > { %6632 = vmatprep.subr.bf16.mxu0 %v6940_v29  ;;  %3788 = vst.msk [vmem:[#allocation7 + $0x18] sm:$0xff] %vm2123_vm5, %v3780_v25 }
 0x3a9   : > { %6307 = vmatpush3.bf16.msra.mxu1 %v6941_v32 }
 0x3aa   : > { %6633 = vmatpush3.bf16.msra.mxu0 %v6940_v29  ;;  %6308 = vmatprep.subr.bf16.mxu1 %v6942_v30  ;;  %v6969_v29 = vld [vmem:[%s8729_s7 + $0xf0] sm:$0xff]  }
 0x3ab   : > { %6634 = vmatprep.subr.bf16.mxu0 %v6943_v24  ;;  %v6970_v30 = vld [vmem:[%s8729_s7 + $0xb0] sm:$0xff]  }
 0x3ad   : > { %6309 = vmatpush3.bf16.msra.mxu1 %v6944_v33  ;;  %v6971_v33 = vld [vmem:[%s8729_s7 + $0xf8] sm:$0xff]  }
 0x3ae   : > { %6635 = vmatpush3.bf16.msra.mxu0 %v6943_v24  ;;  %6328 = vmatprep.subr.bf16.mxu1 %v6945_v35 }
 0x3af   : > { %6640 = vmatprep.subr.bf16.mxu0 %v6961_v7 }
 0x3b0   : > { %3387 = vmatmul.mubr.bf16.vlgmr.msra.gmra.mrb[64].mxu1 %v8090_v26  ;;  %v6957_v26 = vld [vmem:[%s8727_s5 + $0x2f0] sm:$0xff]  }
 0x3b1   : > { %6637 = vmatmul.mubr.msk.bf16.vlgmr.msra.gmra.mrb[64].mxu0 %vm2123_vm5, %v3473_v38  ;;  %3394 = vmatprep.mubr.bf16.mxu1 %v3185_v41  ;;  %v6975_v41 = vld [vmem:[%s8729_s7 + $0x100] sm:$0xff]  }
 0x3b2   : > { %6329 = vmatpush3.bf16.msra.mxu1 %v6946_v39  ;;  %6641 = vmatpush3.bf16.msra.mxu0 %v6961_v7  ;;  %v6973_v39 = vld [vmem:[%s8729_s7 + $0xb8] sm:$0xff]  }
 0x3b3   : > { %6330 = vmatprep.subr.bf16.mxu1 %v6947_v42  ;;  %6642 = vmatprep.subr.bf16.mxu0 %v6962_v62 }
 0x3b6   : > { %6331 = vmatpush3.bf16.msra.mxu1 %v6948_v37  ;;  %6643 = vmatpush3.bf16.msra.mxu0 %v6962_v62  ;;  %v6977_v37 = vld [vmem:[%s8729_s7 + $0xc0] sm:$0xff]  }
 0x3b7   : > { %6332 = vmatprep.subr.bf16.mxu1 %v6949_v50  ;;  %6644 = vmatprep.subr.bf16.mxu0 %v6963_v60 }
 0x3b8   : > { %3395 = vmatmul.mubr.bf16.gmra.mrb[68].mxu1 %v3184_v40 }
 0x3b9   : > { %3673 = vmatprep.mubr.bf16.mxu1 %v8107_v59  ;;  %v3471_v59 = vpack.c.bf16 %v3465_v3, %v3178_v48 }
 0x3ba   : > { %6333 = vmatpush3.bf16.msra.mxu1 %v6950_v51  ;;  %6645 = vmatpush3.bf16.msra.mxu0 %v6963_v60 }
 0x3bb   : > { %6334 = vmatprep.subr.bf16.mxu1 %v6951_v53  ;;  %6646 = vmatprep.subr.bf16.mxu0 %v6964_v11 }
 0x3be   : > { %6335 = vmatpush3.bf16.msra.mxu1 %v6952_v55  ;;  %6647 = vmatpush3.bf16.msra.mxu0 %v6964_v11 }
 0x3bf   : > { %6336 = vmatprep.subr.bf16.mxu1 %v6953_v49  ;;  %6396 = vmatprep.subr.bf16.mxu0 %v6972_v12 }
 0x3c2   : > { %6337 = vmatpush3.bf16.msra.mxu1 %v6954_v58 }
 0x3c3   : > { %6338 = vmatprep.subr.bf16.mxu1 %v6955_v52 }
 0x3c6   : > { %6339 = vmatpush3.bf16.msra.mxu1 %v6956_v54 }
 0x3c7   : > { %6340 = vmatprep.subr.bf16.mxu1 %v6957_v26 }
 0x3ca   : > { %6341 = vmatpush3.bf16.msra.mxu1 %v6958_v61 }
 0x3cb   : > { %6342 = vmatprep.subr.bf16.mxu1 %v6959_v44 }
 0x3ce   : > { %6343 = vmatpush3.bf16.msra.mxu1 %v6960_v45 }
 0x3cf   : > { %6362 = vmatprep.subr.bf16.mxu1 %v6965_v20 }
 0x3d1   : > { %3674 = vmatmul.mubr.bf16.vlgmr.msra.gmra.mrb[72].mxu1 %v8123_v56 }
 0x3d2   : > { %3681 = vmatprep.mubr.bf16.mxu1 %v3472_v2  ;;  %6363 = vmatpush3.bf16.msra.mxu1 %v6966_v21 }
 0x3d3   : > { %6364 = vmatprep.subr.bf16.mxu1 %v6967_v19 }
 0x3d6   : > { %6365 = vmatpush3.bf16.msra.mxu1 %v6968_v28 }
 0x3d7   : > { %6366 = vmatprep.subr.bf16.mxu1 %v6969_v29  ;;  %v6979_v29 = vld [vmem:[%s8729_s7 + $0x108] sm:$0xff]  }
 0x3d9   : > { %3682 = vmatmul.mubr.bf16.gmra.mrb[76].mxu1 %v3471_v59 }
 0x3da   : > { %6367 = vmatpush3.bf16.msra.mxu1 %v6970_v30 }
 0x3db   : > { %6368 = vmatprep.subr.bf16.mxu1 %v6971_v33  ;;  %v6981_v33 = vld [vmem:[%s8729_s7 + $0xc8] sm:$0xff]  }
 0x3de   : > { %6369 = vmatpush3.bf16.msra.mxu1 %v6973_v39 }
 0x3df   : > { %6370 = vmatprep.subr.bf16.mxu1 %v6975_v41 }
 0x3e2   : > { %6371 = vmatpush3.bf16.msra.mxu1 %v6977_v37 }
 0x3e3   : > { %6372 = vmatprep.subr.bf16.mxu1 %v6979_v29  ;;  %v6978_v29 = vld [vmem:[%s8729_s7 + $0x8] sm:$0xff]  }
 0x3e6   : > { %6373 = vmatpush3.bf16.msra.mxu1 %v6981_v33  ;;  %v6984_v33 = vld [vmem:[%s8729_s7 + $0x58] sm:$0xff]  }
 0x3fa   : > { %v3878_v20 = vpop.permute.xlu0 %3877 }
 0x3fb   : > { %3900 = vst.msk [vmem:[#allocation7 + $0x20] sm:$0xff] %vm2237_vm7, %v3878_v20 }
 0x3fe   : > { %v3814_v12 = vpop.permute.xlu0 %3813 }
 0x3ff   : > { %3836 = vst.msk [vmem:[#allocation7 + $0x18] sm:$0xff] %vm2237_vm7, %v3814_v12  ;;  %v6976_v12 = vld [vmem:[%s8729_s7 + $0x48] sm:$0xff]  }
 0x443   : > { %v6208_v56 = vpop.f32.mrb[48].mxu1 }
 0x444   : > { %v6209_v1 = vpop.f32.mrb[49].mxu1 }
 0x445   : > { %v6210_v8 = vadd.f32 %v6209_v1, %v6208_v56  ;;  %v6211_v9 = vpop.f32.mrb[50].mxu1 }
 0x446   : > { %v6212_v13 = vpop.f32.mrb[51].mxu1 }
 0x447   : > { %v6213_v14 = vadd.f32 %v6212_v13, %v6211_v9 }
 0x44a   : > { %v6276_v5 = vpop.f32.mrb[68].mxu0 }
 0x44b   : > { %v6277_v4 = vpop.f32.mrb[69].mxu0 }
 0x44c   : > { %v6278_v15 = vadd.f32 %v6277_v4, %v6276_v5  ;;  %v6279_v16 = vpop.f32.mrb[70].mxu0 }
 0x44d   : > { %v6280_v47 = vpop.f32.mrb[71].mxu0 }
 0x44e   : > { %v6281_v17 = vadd.f32 %v6280_v47, %v6279_v16 }
 0x453   : > { %v6214_v18 = vpop.f32.mrb[52].mxu1 }
 0x454   : > { %v6215_v43 = vpop.f32.mrb[53].mxu1 }
 0x455   : > { %v6216_v22 = vadd.f32 %v6215_v43, %v6214_v18  ;;  %v6217_v23 = vpop.f32.mrb[54].mxu1 }
 0x456   : > { %v6218_v31 = vpop.f32.mrb[55].mxu1 }
 0x457   : > { %v6219_v27 = vadd.f32 %v6218_v31, %v6217_v23 }
 0x45b   : > { %v6282_v32 = vpop.f32.mrb[72].mxu0 }
 0x45c   : > { %v6283_v24 = vpop.f32.mrb[73].mxu0 }
 0x45d   : > { %v6284_v35 = vadd.f32 %v6283_v24, %v6282_v32  ;;  %v6285_v34 = vpop.f32.mrb[74].mxu0 }
 0x45e   : > { %v6286_v36 = vpop.f32.mrb[75].mxu0 }
 0x45f   : > { %v6287_v38 = vadd.f32 %v6286_v36, %v6285_v34 }
 0x463   : > { %v6242_v42 = vpop.f32.mrb[56].mxu1 }
 0x464   : > { %v6243_v48 = vpop.f32.mrb[57].mxu1 }
 0x465   : > { %v6244_v50 = vadd.f32 %v6243_v48, %v6242_v42  ;;  %v6245_v40 = vpop.f32.mrb[58].mxu1  ;;  %v6983_v42 = vld [vmem:[%s8729_s7 + $0x110] sm:$0xff]  }
 0x466   : > { %v6246_v51 = vpop.f32.mrb[59].mxu1  ;;  %6374 = vmatprep.subr.bf16.mxu1 %v6983_v42  ;;  %v6996_v42 = vld [vmem:[%s8729_s7 + $0x70] sm:$0xff]  }
 0x467   : > { %v6705_v53 = vadd.f32 %v6244_v50, %v6210_v8  ;;  %v6247_v55 = vadd.f32 %v6246_v51, %v6245_v40  ;;  %v6985_v40 = vld [vmem:[%s8729_s7 + $0xd0] sm:$0xff]  }
 0x468   : > { %6375 = vmatpush3.bf16.msra.mxu1 %v6985_v40  ;;  %v8441_v40 = vld [vmem:[%s8729_s7 + $0x80] sm:$0xff]  }
 0x469   : > { %v6715_v49 = vadd.f32 %v6247_v55, %v6213_v14  ;;  %v6706_v58 = vadd.f32 %v6705_v53, %v6278_v15  ;;  %v6987_v55 = vld [vmem:[%s8729_s7 + $0x118] sm:$0xff]  }
 0x46a   : > { %6376 = vmatprep.subr.bf16.mxu1 %v6987_v55  ;;  %v3786_v55 = vld [vmem:[#allocation4 + $0x70] sm:$0xff] }
 0x46b   : > { %v6248_v52 = vpop.f32.mrb[60].mxu1  ;;  %v6716_v54 = vadd.f32 %v6715_v49, %v6281_v17  ;;  %v3843_v49 = vld [vmem:[#allocation4 + $0x2] sm:$0xff]  ;;  %3794 = vst.msk [vmem:[#allocation7 + $0xa8] sm:$0xff] %vm2123_vm5, %v3786_v55  ;;  %v7024_v55 = vld [vmem:[%s8729_s7 + $0x1d8] sm:$0xff]  }
 0x46c   : > { %v6249_v26 = vpop.f32.mrb[61].mxu1  ;;  %3851 = vst.msk [vmem:[#allocation7 + $0x8] sm:$0xff] %vm2123_vm5, %v3843_v49 }
 0x46d   : > { %v6250_v61 = vadd.f32 %v6249_v26, %v6248_v52  ;;  %v6251_v44 = vpop.f32.mrb[62].mxu1 }
 0x46e   : > { %v6252_v45 = vpop.f32.mrb[63].mxu1 }
 0x46f   : > { %v6700_v0 = vadd.f32 %v6250_v61, %v6216_v22  ;;  %v6253_v2 = vadd.f32 %v6252_v45, %v6251_v44 }
 0x471   : > { %v6710_v3 = vadd.f32 %v6253_v2, %v6219_v27  ;;  %v6701_v59 = vadd.f32 %v6700_v0, %v6284_v35  ;;  %v5893_v27 = vld [vmem:[%s8728_s6] ss:$0 sm:$0xff] }
 0x473   : > { %v6711_v46 = vadd.f32 %v6710_v3, %v6287_v38 }
 0x483   : > { %v6310_v63 = vpop.f32.mrb[64].mxu1 }
 0x484   : > { %v6638_v6 = vpop.f32.mrb[64].mxu0  ;;  %v6311_v7 = vpop.f32.mrb[65].mxu1 }
 0x485   : > { %v6312_v62 = vadd.f32 %v6311_v7, %v6310_v63  ;;  %v3724_v60 = vpop.f32.mrb[65].mxu0  ;;  %v6313_v56 = vpop.f32.mrb[66].mxu1 }
 0x486   : > { %v6639_v1 = vpop.f32.mrb[66].mxu0  ;;  %v6314_v8 = vpop.f32.mrb[67].mxu1 }
 0x487   : > { %v6707_v9 = vadd.f32 %v6706_v58, %v6312_v62  ;;  %v6315_v11 = vadd.f32 %v6314_v8, %v6313_v56  ;;  %v3727_v57 = vpop.f32.mrb[67].mxu0  ;;  %v3849_v56 = vld [vmem:[#allocation4 + $0x62] sm:$0xff] }
 0x488   : > { %v8359_v8 = vld [vmem:[#allocation7 + $0x28] sm:$0xff]  ;;  %3857 = vst.msk [vmem:[#allocation7 + $0x98] sm:$0xff] %vm2123_vm5, %v3849_v56 }
 0x489   : > { %v6717_v13 = vadd.f32 %v6716_v54, %v6315_v11  ;;  %v6989_v54 = vld [vmem:[%s8729_s7 + $0xd8] sm:$0xff]  }
 0x48a   : > { %6377 = vmatpush3.bf16.msra.mxu1 %v6989_v54 }
 0x48b   : > { %v6316_v14 = vpop.f32.mrb[68].mxu1 }
 0x48c   : > { %v6317_v5 = vpop.f32.mrb[69].mxu1 }
 0x48d   : > { %v6318_v4 = vadd.f32 %v6317_v5, %v6316_v14  ;;  %v6319_v15 = vpop.f32.mrb[70].mxu1 }
 0x48e   : > { %v6320_v16 = vpop.f32.mrb[71].mxu1 }
 0x48f   : > { %v6702_v47 = vadd.f32 %v6701_v59, %v6318_v4  ;;  %v6321_v17 = vadd.f32 %v6320_v16, %v6319_v15  ;;  %v6991_v59 = vld [vmem:[%s8729_s7 + $0x180] sm:$0xff]  }
 0x490   : > { %6430 = vmatprep.subr.bf16.mxu1 %v6991_v59 }
 0x491   : > { %v6712_v18 = vadd.f32 %v6711_v46, %v6321_v17 }
 0x4a4   : > { %v6344_v43 = vpop.f32.mrb[72].mxu1 }
 0x4a5   : > { %v6345_v21 = vpop.f32.mrb[73].mxu1 }
 0x4a6   : > { %v6346_v19 = vadd.f32 %v6345_v21, %v6344_v43  ;;  %v6347_v22 = vpop.f32.mrb[74].mxu1  ;;  %v3785_v43 = vld [vmem:[#allocation4 + $0x60] sm:$0xff] }
 0x4a7   : > { %v6348_v23 = vpop.f32.mrb[75].mxu1  ;;  %v3795_v21 = vld [vmem:[#allocation4 + $0x1] sm:$0xff]  ;;  %3793 = vst.msk [vmem:[#allocation7 + $0x90] sm:$0xff] %vm2123_vm5, %v3785_v43 }
 0x4a8   : > { %v6708_v31 = vadd.f32 %v6707_v9, %v6346_v19  ;;  %v6349_v10 = vadd.f32 %v6348_v23, %v6347_v22  ;;  %v3859_v9 = vld [vmem:[#allocation4 + $0x3] sm:$0xff] }
 0x4a9   : > { %v3865_v23 = vld [vmem:[#allocation4 + $0x63] sm:$0xff] }
 0x4aa   : > { %v6709_v28 = vadd.f32 %v6708_v31, %v3724_v60  ;;  %v6718_v25 = vadd.f32 %v6717_v13, %v6349_v10  ;;  %v3779_v60 = vld [vmem:[#allocation4] sm:$0xff] }
 0x4ab   : > { %3787 = vst.msk [vmem:[#allocation7] sm:$0xff] %vm2123_vm5, %v3779_v60  ;;  %v6974_v31 = vld [vmem:[%s8729_s7] sm:$0xff]  }
 0x4ac   : > { %v3750_v32 = vadd.f32 %v6709_v28, %v5893_v27  ;;  %v6719_v30 = vadd.f32 %v6718_v25, %v3727_v57  ;;  %v6350_v24 = vpop.f32.mrb[76].mxu1  ;;  %v3866_v25 = vld [vmem:[#allocation4 + $0x73] sm:$0xff] }
 0x4ad   : > { %v6351_v35 = vpop.f32.mrb[77].mxu1 }
 0x4ae   : > { %v3754_v34 = vmax.f32 %v3750_v32, 0.0  ;;  %v3751_v36 = vadd.f32 %v6719_v30, %v5893_v27  ;;  %v6352_v38 = vadd.f32 %v6351_v35, %v6350_v24  ;;  %v6353_v39 = vpop.f32.mrb[78].mxu1  ;;  %v6980_v32 = vld [vmem:[%s8729_s7 + $0x50] sm:$0xff]   ;;  %v3801_v30 = vld [vmem:[#allocation4 + $0x61] sm:$0xff] }
 0x4af   : > { %v6354_v41 = vpop.f32.mrb[79].mxu1  ;;  %v6982_v24 = vld [vmem:[%s8729_s7 + $0x10] sm:$0xff]  }
 0x4b0   : > { %3775 = vst.msk [vmem:[#allocation4 + $0x22] sm:$0xf] %vm2125_vm6, %v3754_v34  ;;  %v3755_v37 = vmax.f32 %v3751_v36, 0.0  ;;  %v6703_v48 = vadd.f32 %v6702_v47, %v6352_v38  ;;  %v6355_v50 = vadd.f32 %v6354_v41, %v6353_v39  ;;  %v3802_v35 = vld [vmem:[#allocation4 + $0x71] sm:$0xff]  ;;  %v6988_v36 = vld [vmem:[%s8729_s7 + $0x60] sm:$0xff]   ;;  %v6992_v39 = vld [vmem:[%s8729_s7 + $0x68] sm:$0xff]  }
 0x4b1   : > { %v6986_v34 = vld [vmem:[%s8729_s7 + $0x18] sm:$0xff]   ;;  %v6990_v38 = vld [vmem:[%s8729_s7 + $0x20] sm:$0xff]   ;;  %v6993_v41 = vld [vmem:[%s8729_s7 + $0x28] sm:$0xff]  }
 0x4b2   : > { %3776 = vst.msk [vmem:[#allocation4 + $0x32] sm:$0xf] %vm2125_vm6, %v3755_v37  ;;  %v6704_v51 = vadd.f32 %v6703_v48, %v6638_v6  ;;  %v6713_v53 = vadd.f32 %v6712_v18, %v6355_v50  ;;  %v6997_v37 = vld [vmem:[%s8729_s7 + $0x30] sm:$0xff]   ;;  %v6999_v48 = vld [vmem:[%s8729_s7 + $0x78] sm:$0xff]  }
 0x4b3   : > { %v7001_v50 = vld [vmem:[%s8729_s7 + $0x38] sm:$0xff]  }
 0x4b4   : > { %v3752_v58 = vadd.f32 %v6704_v51, %v5893_v27  ;;  %v6714_v52 = vadd.f32 %v6713_v53, %v6639_v1  ;;  %v3914_v51 = vld [vmem:[#allocation4 + $0x74] sm:$0xff] }
 0x4b5   : > { %3922 = vst.msk [vmem:[#allocation7 + $0xb8] sm:$0xff] %vm2123_vm5, %v3914_v51  ;;  %v3850_v53 = vld [vmem:[#allocation4 + $0x72] sm:$0xff] }
 0x4b6   : > { %v3756_v26 = vmax.f32 %v3752_v58, 0.0  ;;  %v3753_v61 = vadd.f32 %v6714_v52, %v5893_v27  ;;  %v3907_v27 = vld [vmem:[#allocation4 + $0x4] sm:$0xff]  ;;  %3858 = vst.msk [vmem:[#allocation7 + $0xb0] sm:$0xff] %vm2123_vm5, %v3850_v53 }
 0x4b7   : > { %v3861_v44 = vld [vmem:[#allocation4 + $0x23] sm:$0xff]  ;;  %3915 = vst.msk [vmem:[#allocation7 + $0x10] sm:$0xff] %vm2123_vm5, %v3907_v27 }
 0x4b8   : > { %v3909_v45 = vld [vmem:[#allocation4 + $0x24] sm:$0xff]  ;;  %3777 = vst.msk [vmem:[#allocation4 + $0x42] sm:$0xf] %vm2125_vm6, %v3756_v26  ;;  %v3757_v0 = vmax.f32 %v3753_v61, 0.0  ;;  %3879 = vrot.lane.b32.xlu1 %v3861_v44, %s7071_s23 }
 0x4b9   : > { %3917 = vst.msk [vmem:[#allocation7 + $0x40] sm:$0xff] %vm2123_vm5, %v3909_v45  ;;  %v3845_v2 = vld [vmem:[#allocation4 + $0x22] sm:$0xff]  ;;  %v3862_v46 = vld [vmem:[#allocation4 + $0x33] sm:$0xff] }
 0x4ba   : > { %v3781_v3 = vld [vmem:[#allocation4 + $0x20] sm:$0xff]  ;;  %v3910_v63 = vld [vmem:[#allocation4 + $0x34] sm:$0xff]  ;;  %3853 = vst.msk [vmem:[#allocation7 + $0x38] sm:$0xff] %vm2123_vm5, %v3845_v2  ;;  %3881 = vrot.lane.b32.xlu0 %v3862_v46, %s7071_s23  ;;  %v7022_v53 = vld [vmem:[%s8729_s7 + $0x228] sm:$0xff]  }
 0x4bb   : > { %3789 = vst.msk [vmem:[#allocation7 + $0x30] sm:$0xff] %vm2123_vm5, %v3781_v3  ;;  %3918 = vst.msk [vmem:[#allocation7 + $0x58] sm:$0xff] %vm2123_vm5, %v3910_v63  ;;  %v3846_v6 = vld [vmem:[#allocation4 + $0x32] sm:$0xff]  ;;  %v3797_v62 = vld [vmem:[#allocation4 + $0x21] sm:$0xff] }
 0x4bc   : > { %3778 = vst.msk [vmem:[#allocation4 + $0x52] sm:$0xf] %vm2125_vm6, %v3757_v0  ;;  %v3782_v7 = vld [vmem:[#allocation4 + $0x30] sm:$0xff]  ;;  %3815 = vrot.lane.b32.xlu1 %v3797_v62, %s7071_s23  ;;  %v3927_v26 = vld [vmem:[#allocation7 + $0x20] sm:$0xff]  ;;  %v3926_v2 = vld [vmem:[#allocation7 + $0x18] sm:$0xff] }
 0x4bd   : > { %3854 = vst.msk [vmem:[#allocation7 + $0x50] sm:$0xff] %vm2123_vm5, %v3846_v6  ;;  %3790 = vst.msk [vmem:[#allocation7 + $0x48] sm:$0xff] %vm2123_vm5, %v3782_v7  ;;  %v3798_v1 = vld [vmem:[#allocation4 + $0x31] sm:$0xff]  ;;  %v6994_v46 = vld [vmem:[%s8729_s7 + $0x140] sm:$0xff]  }
 0x4be   : > { %3817 = vrot.lane.b32.xlu0 %v3798_v1, %s7071_s23  ;;  %v6995_v6 = vld [vmem:[%s8729_s7 + $0x188] sm:$0xff]   ;;  %v7007_v27 = vld [vmem:[%s8729_s7 + $0x1a0] sm:$0xff]  }
 0x4bf   : > { %v3863_v11 = vld [vmem:[#allocation4 + $0x43] sm:$0xff] }
 0x4c0   : > { %v3911_v57 = vld [vmem:[#allocation4 + $0x44] sm:$0xff]  ;;  %3883 = vrot.lane.b32.xlu1 %v3863_v11, %s7071_s23  ;;  %v7000_v11 = vld [vmem:[%s8729_s7 + $0x190] sm:$0xff]  }
 0x4c1   : > { %v3931_v13 = vld [vmem:[#allocation7 + $0x40] sm:$0xff]  ;;  %3919 = vst.msk [vmem:[#allocation7 + $0x70] sm:$0xff] %vm2123_vm5, %v3911_v57  ;;  %v6998_v1 = vld [vmem:[%s8729_s7 + $0x148] sm:$0xff]  }
 0x4c2   : > { %v3986_v14 = vpack.c.bf16 %v3931_v13, %v8359_v8  ;;  %v3847_v5 = vld [vmem:[#allocation4 + $0x42] sm:$0xff]  ;;  %v3934_v15 = vld [vmem:[#allocation7 + $0x58] sm:$0xff]  ;;  %3875 = vrot.lane.b32.xlu0 %v3859_v9, %s7071_s23 }
 0x4c3   : > { %v3783_v4 = vld [vmem:[#allocation4 + $0x40] sm:$0xff]  ;;  %3855 = vst.msk [vmem:[#allocation7 + $0x68] sm:$0xff] %vm2123_vm5, %v3847_v5  ;;  %v8370_v16 = vpack.c.bf16 %v3934_v15, %v3931_v13  ;;  %v3848_v47 = vld [vmem:[#allocation4 + $0x52] sm:$0xff] }
 0x4c4   : > { %3791 = vst.msk [vmem:[#allocation7 + $0x60] sm:$0xff] %vm2123_vm5, %v3783_v4  ;;  %6648 = vmatprep.mubr.msk.bf16.mxu0 %vm2123_vm5, %v3986_v14  ;;  %v3784_v17 = vld [vmem:[#allocation4 + $0x50] sm:$0xff]  ;;  %v3799_v18 = vld [vmem:[#allocation4 + $0x41] sm:$0xff]  ;;  %3856 = vst.msk [vmem:[#allocation7 + $0x80] sm:$0xff] %vm2123_vm5, %v3848_v47 }
 0x4c5   : > { %3792 = vst.msk [vmem:[#allocation7 + $0x78] sm:$0xff] %vm2123_vm5, %v3784_v17  ;;  %3819 = vrot.lane.b32.xlu1 %v3799_v18, %s7071_s23  ;;  %v3864_v20 = vld [vmem:[#allocation4 + $0x53] sm:$0xff] }
 0x4c6   : > { %v3912_v19 = vld [vmem:[#allocation4 + $0x54] sm:$0xff]  ;;  %3885 = vrot.lane.b32.xlu0 %v3864_v20, %s7071_s23 }
 0x4c7   : > { %3920 = vst.msk [vmem:[#allocation7 + $0x88] sm:$0xff] %vm2123_vm5, %v3912_v19  ;;  %v3800_v28 = vld [vmem:[#allocation4 + $0x51] sm:$0xff] }
 0x4c8   : > { %v8379_v22 = vld [vmem:[#allocation7 + $0x70] sm:$0xff]  ;;  %v7004_v18 = vld [vmem:[%s8729_s7 + $0x198] sm:$0xff]  }
 0x4c9   : > { %v8385_v10 = vpack.c.bf16 %v8379_v22, %v3934_v15  ;;  %3811 = vrot.lane.b32.xlu1 %v3795_v21, %s7071_s23  ;;  %v7002_v47 = vld [vmem:[%s8729_s7 + $0x150] sm:$0xff]  }
 0x4ca   : > { %3887 = vrot.lane.b32.xlu0 %v3865_v23, %s7071_s23  ;;  %v7005_v23 = vld [vmem:[%s8729_s7 + $0x158] sm:$0xff]  }
 0x4cb   : > { %6649 = vmatmul.mubr.msk.bf16.vlgmr.msra.gmra.mrb[76].mxu0 %vm2123_vm5, %v8385_v10 }
 0x4cc   : > { %6397 = vmatpush3.bf16.msra.mxu0 %v6974_v31 }
 0x4cd   : > { %3821 = vrot.lane.b32.xlu1 %v3800_v28, %s7071_s23  ;;  %6398 = vmatprep.subr.bf16.mxu0 %v6976_v12  ;;  %v7006_v12 = vld [vmem:[%s8729_s7 + $0x88] sm:$0xff]   ;;  %v7008_v28 = vld [vmem:[%s8729_s7 + $0x160] sm:$0xff]  }
 0x4ce   : > { %3889 = vrot.lane.b32.xlu0 %v3866_v25, %s7071_s23 }
 0x4d0   : > { %6399 = vmatpush3.bf16.msra.mxu0 %v6978_v29  ;;  %v7009_v29 = vld [vmem:[%s8729_s7 + $0x90] sm:$0xff]  }
 0x4d1   : > { %3823 = vrot.lane.b32.xlu1 %v3801_v30, %s7071_s23  ;;  %6400 = vmatprep.subr.bf16.mxu0 %v6980_v32  ;;  %v7010_v32 = vld [vmem:[%s8729_s7 + $0x1a8] sm:$0xff]   ;;  %v3925_v30 = vld [vmem:[#allocation7 + $0x10] sm:$0xff] }
 0x4d4   : > { %6401 = vmatpush3.bf16.msra.mxu0 %v6982_v24  ;;  %v7011_v24 = vld [vmem:[%s8729_s7 + $0x168] sm:$0xff]  }
 0x4d5   : > { %3825 = vrot.lane.b32.xlu1 %v3802_v35, %s7071_s23  ;;  %6402 = vmatprep.subr.bf16.mxu0 %v6984_v33  ;;  %v7012_v35 = vld [vmem:[%s8729_s7 + $0x98] sm:$0xff]  }
 0x4d8   : > { %6403 = vmatpush3.bf16.msra.mxu0 %v6986_v34  ;;  %v7013_v34 = vld [vmem:[%s8729_s7 + $0x1b0] sm:$0xff]  }
 0x4d9   : > { %6404 = vmatprep.subr.bf16.mxu0 %v6988_v36  ;;  %v3937_v36 = vpack.c.bf16 %v8359_v8, %v3925_v30  ;;  %v7017_v8 = vld [vmem:[%s8729_s7 + $0x178] sm:$0xff]   ;;  %v7058_v30 = vld [vmem:[%s8729_s7 + $0x2b0] sm:$0xff]  }
 0x4dc   : > { %6405 = vmatpush3.bf16.msra.mxu0 %v6990_v38  ;;  %v7014_v38 = vld [vmem:[%s8729_s7 + $0x170] sm:$0xff]  }
 0x4dd   : > { %6406 = vmatprep.subr.bf16.mxu0 %v6992_v39  ;;  %v7015_v39 = vld [vmem:[%s8729_s7 + $0x1b8] sm:$0xff]  }
 0x4e0   : > { %6407 = vmatpush3.bf16.msra.mxu0 %v6993_v41  ;;  %v7016_v41 = vld [vmem:[%s8729_s7 + $0x1c0] sm:$0xff]  }
 0x4e1   : > { %6408 = vmatprep.subr.bf16.mxu0 %v6996_v42  ;;  %v7018_v42 = vld [vmem:[%s8729_s7 + $0x1c8] sm:$0xff]  }
 0x4e4   : > { %6409 = vmatpush3.bf16.msra.mxu0 %v6997_v37  ;;  %v7019_v37 = vld [vmem:[%s8729_s7 + $0x220] sm:$0xff]  }
 0x4e5   : > { %6410 = vmatprep.subr.bf16.mxu0 %v6999_v48 }
 0x4e8   : > { %6411 = vmatpush3.bf16.msra.mxu0 %v7001_v50  ;;  %v7020_v50 = vld [vmem:[%s8729_s7 + $0x1e0] sm:$0xff]  }
 0x4e9   : > { %6652 = vmatprep.subr.bf16.mxu0 %v8441_v40 }
 0x52a   : > { %v3880_v49 = vpop.permute.xlu1 %3879 }
 0x52b   : > { %3901 = vst.msk [vmem:[#allocation7 + $0x38] sm:$0xff] %vm2237_vm7, %v3880_v49 }
 0x52c   : > { %v3882_v58 = vpop.permute.xlu0 %3881 }
 0x52d   : > { %3902 = vst.msk [vmem:[#allocation7 + $0x50] sm:$0xff] %vm2237_vm7, %v3882_v58  ;;  %v7025_v58 = vld [vmem:[%s8729_s7 + $0x230] sm:$0xff]  }
 0x52e   : > { %v3816_v52 = vpop.permute.xlu1 %3815 }
 0x52f   : > { %3837 = vst.msk [vmem:[#allocation7 + $0x30] sm:$0xff] %vm2237_vm7, %v3816_v52 }
 0x530   : > { %v3818_v54 = vpop.permute.xlu0 %3817 }
 0x531   : > { %3838 = vst.msk [vmem:[#allocation7 + $0x48] sm:$0xff] %vm2237_vm7, %v3818_v54  ;;  %v7026_v54 = vld [vmem:[%s8729_s7 + $0x1f0] sm:$0xff]  }
 0x532   : > { %v3884_v61 = vpop.permute.xlu1 %3883  ;;  %v3930_v44 = vld [vmem:[#allocation7 + $0x38] sm:$0xff] }
 0x533   : > { %3903 = vst.msk [vmem:[#allocation7 + $0x68] sm:$0xff] %vm2237_vm7, %v3884_v61  ;;  %v3985_v45 = vpack.c.bf16 %v3930_v44, %v3927_v26  ;;  %v4490_v61 = vld [vmem:[#allocation7 + $0x88] sm:$0xff] }
 0x534   : > { %v3876_v0 = vpop.permute.xlu0 %3875  ;;  %v3933_v60 = vld [vmem:[#allocation7 + $0x50] sm:$0xff] }
 0x535   : > { %3899 = vst.msk [vmem:[#allocation7 + $0x8] sm:$0xff] %vm2237_vm7, %v3876_v0  ;;  %4189 = vmatprep.mubr.bf16.mxu1 %v3985_v45  ;;  %v4492_v43 = vpack.c.bf16 %v3933_v60, %v3930_v44  ;;  %v7027_v44 = vld [vmem:[%s8729_s7 + $0x238] sm:$0xff]   ;;  %v4496_v45 = vpack.c.bf16 %v4490_v61, %v8379_v22  ;;  %v7032_v22 = vld [vmem:[%s8729_s7 + $0x200] sm:$0xff]  }
 0x536   : > { %v8453_v59 = vld [vmem:[#allocation7 + $0x30] sm:$0xff]  ;;  %v7029_v0 = vld [vmem:[%s8729_s7 + $0x1f8] sm:$0xff]  }
 0x537   : > { %v3820_v3 = vpop.permute.xlu1 %3819  ;;  %v3984_v63 = vpack.c.bf16 %v8453_v59, %v3926_v2 }
 0x538   : > { %3839 = vst.msk [vmem:[#allocation7 + $0x60] sm:$0xff] %vm2237_vm7, %v3820_v3  ;;  %v3886_v7 = vpop.permute.xlu0 %3885  ;;  %v3932_v4 = vld [vmem:[#allocation7 + $0x48] sm:$0xff]  ;;  %v7030_v3 = vld [vmem:[%s8729_s7 + $0x240] sm:$0xff]  }
 0x539   : > { %3904 = vst.msk [vmem:[#allocation7 + $0x80] sm:$0xff] %vm2237_vm7, %v3886_v7  ;;  %4190 = vmatmul.mubr.bf16.vlgmr.msra.gmra.mrb[80].mxu1 %v3984_v63  ;;  %v3938_v33 = vpack.c.bf16 %v3932_v4, %v8453_v59  ;;  %v7034_v59 = vld [vmem:[%s8729_s7 + $0x270] sm:$0xff]   ;;  %v7037_v63 = vld [vmem:[%s8729_s7 + $0x278] sm:$0xff]  }
 0x53a   : > { %6431 = vmatpush3.bf16.msra.mxu1 %v6994_v46  ;;  %v8464_v56 = vld [vmem:[#allocation7 + $0x68] sm:$0xff]  ;;  %v7038_v7 = vld [vmem:[%s8729_s7 + $0x210] sm:$0xff]  }
 0x53b   : > { %v3812_v62 = vpop.permute.xlu1 %3811  ;;  %6432 = vmatprep.subr.bf16.mxu1 %v6995_v6  ;;  %v8471_v9 = vpack.c.bf16 %v8464_v56, %v3933_v60  ;;  %v7033_v46 = vld [vmem:[%s8729_s7 + $0x248] sm:$0xff]   ;;  %v7036_v6 = vld [vmem:[%s8729_s7 + $0x250] sm:$0xff]   ;;  %v7039_v60 = vld [vmem:[%s8729_s7 + $0x258] sm:$0xff]  }
 0x53c   : > { %3835 = vst.msk [vmem:[#allocation7] sm:$0xff] %vm2237_vm7, %v3812_v62  ;;  %v3888_v57 = vpop.permute.xlu0 %3887  ;;  %v3924_v13 = vld [vmem:[#allocation7 + $0x8] sm:$0xff]  ;;  %v7040_v62 = vld [vmem:[%s8729_s7 + $0x300] sm:$0xff]  }
 0x53d   : > { %3905 = vst.msk [vmem:[#allocation7 + $0x98] sm:$0xff] %vm2237_vm7, %v3888_v57  ;;  %4197 = vmatprep.mubr.bf16.mxu1 %v8471_v9  ;;  %v3936_v14 = vpack.c.bf16 %v3927_v26, %v3924_v13  ;;  %v7028_v26 = vld [vmem:[%s8729_s7 + $0x260] sm:$0xff]  }
 0x53e   : > { %6433 = vmatpush3.bf16.msra.mxu1 %v6998_v1  ;;  %v7042_v57 = vld [vmem:[%s8729_s7 + $0x2c0] sm:$0xff]  }
 0x53f   : > { %v3822_v5 = vpop.permute.xlu1 %3821  ;;  %v8478_v15 = vld [vmem:[#allocation7 + $0x60] sm:$0xff]  ;;  %4413 = vmatprep.mubr.bf16.mxu0 %v3936_v14  ;;  %6434 = vmatprep.subr.bf16.mxu1 %v7000_v11  ;;  %v7043_v11 = vld [vmem:[%s8729_s7 + $0x308] sm:$0xff]  }
 0x540   : > { %3840 = vst.msk [vmem:[#allocation7 + $0x78] sm:$0xff] %vm2237_vm7, %v3822_v5  ;;  %v8485_v17 = vpack.c.bf16 %v8478_v15, %v3932_v4  ;;  %v3890_v20 = vpop.permute.xlu0 %3889  ;;  %v8545_v48 = vld [vmem:[#allocation7 + $0x80] sm:$0xff]  ;;  %v7045_v5 = vld [vmem:[%s8729_s7 + $0x2c8] sm:$0xff]   ;;  %v7046_v4 = vld [vmem:[%s8729_s7 + $0x310] sm:$0xff]  }
 0x541   : > { %3906 = vst.msk [vmem:[#allocation7 + $0xb0] sm:$0xff] %vm2237_vm7, %v3890_v20  ;;  %v8557_v51 = vpack.c.bf16 %v8545_v48, %v8464_v56  ;;  %v4777_v56 = vld [vmem:[#allocation7 + $0xa0] sm:$0xff] }
 0x542   : > { %4198 = vmatmul.mubr.bf16.gmra.mrb[84].mxu1 %v8485_v17  ;;  %v4783_v1 = vpack.c.bf16 %v4777_v56, %v4490_v61  ;;  %v7044_v14 = vld [vmem:[%s8729_s7 + $0x280] sm:$0xff]  }
 0x543   : > { %6435 = vmatpush3.bf16.msra.mxu1 %v7002_v47  ;;  %v3824_v21 = vpop.permute.xlu1 %3823  ;;  %4696 = vmatprep.mubr.bf16.mxu1 %v4492_v43  ;;  %v3923_v19 = vld [vmem:[#allocation7] sm:$0xff]  ;;  %v7047_v47 = vld [vmem:[%s8729_s7 + $0x288] sm:$0xff]  }
 0x544   : > { %3841 = vst.msk [vmem:[#allocation7 + $0x90] sm:$0xff] %vm2237_vm7, %v3824_v21  ;;  %6436 = vmatprep.subr.bf16.mxu1 %v7004_v18  ;;  %v3935_v31 = vpack.c.bf16 %v3926_v2, %v3923_v19  ;;  %v7031_v2 = vld [vmem:[%s8729_s7 + $0x268] sm:$0xff]   ;;  %v4776_v13 = vld [vmem:[#allocation7 + $0x98] sm:$0xff]  ;;  %v7050_v21 = vld [vmem:[%s8729_s7 + $0x290] sm:$0xff]  }
 0x545   : > { %v7049_v18 = vld [vmem:[%s8729_s7 + $0x318] sm:$0xff]  }
 0x546   : > { %4414 = vmatmul.mubr.bf16.vlgmr.msra.gmra.mrb[80].mxu0 %v3935_v31 }
 0x547   : > { %6653 = vmatpush3.bf16.msra.mxu0 %v8441_v40  ;;  %6437 = vmatpush3.bf16.msra.mxu1 %v7005_v23  ;;  %v3826_v25 = vpop.permute.xlu1 %3825  ;;  %v7021_v40 = vld [vmem:[%s8729_s7 + $0x1d0] sm:$0xff]   ;;  %v8569_v49 = vld [vmem:[#allocation7 + $0x78] sm:$0xff] }
 0x548   : > { %4421 = vmatprep.mubr.bf16.mxu0 %v4492_v43  ;;  %6654 = vmatprep.subr.bf16.mxu0 %v7006_v12  ;;  %3842 = vst.msk [vmem:[#allocation7 + $0xa8] sm:$0xff] %vm2237_vm7, %v3826_v25  ;;  %v8576_v52 = vpack.c.bf16 %v8569_v49, %v8478_v15  ;;  %v4782_v15 = vpack.c.bf16 %v4776_v13, %v8545_v48  ;;  %v7048_v43 = vld [vmem:[%s8729_s7 + $0x2d0] sm:$0xff]   ;;  %v7051_v23 = vld [vmem:[%s8729_s7 + $0x2d8] sm:$0xff]   ;;  %v7055_v25 = vld [vmem:[%s8729_s7 + $0x2e8] sm:$0xff]  }
 0x549   : > { %6438 = vmatprep.subr.bf16.mxu1 %v7007_v27  ;;  %v7053_v27 = vld [vmem:[%s8729_s7 + $0x2e0] sm:$0xff]  }
 0x54b   : > { %6655 = vmatpush3.bf16.msra.mxu0 %v7006_v12  ;;  %6439 = vmatpush3.bf16.msra.mxu1 %v7008_v28  ;;  %v4775_v20 = vld [vmem:[#allocation7 + $0x90] sm:$0xff]  ;;  %v7052_v12 = vld [vmem:[%s8729_s7 + $0x298] sm:$0xff]   ;;  %v7054_v28 = vld [vmem:[%s8729_s7 + $0x2a0] sm:$0xff]  }
 0x54c   : > { %6656 = vmatprep.subr.bf16.mxu0 %v7009_v29  ;;  %6440 = vmatprep.subr.bf16.mxu1 %v7010_v32  ;;  %v4781_v19 = vpack.c.bf16 %v4775_v20, %v8569_v49  ;;  %v7057_v32 = vld [vmem:[%s8729_s7 + $0x2f0] sm:$0xff]  }
 0x54e   : > { %4422 = vmatmul.mubr.bf16.gmra.mrb[84].mxu0 %v3938_v33 }
 0x54f   : > { %6657 = vmatpush3.bf16.msra.mxu0 %v7009_v29  ;;  %6441 = vmatpush3.bf16.msra.mxu1 %v7011_v24  ;;  %v7056_v29 = vld [vmem:[%s8729_s7 + $0x2a8] sm:$0xff]   ;;  %v7059_v24 = vld [vmem:[%s8729_s7 + $0x2f8] sm:$0xff]  }
 0x550   : > { %6658 = vmatprep.subr.bf16.mxu0 %v7012_v35  ;;  %6442 = vmatprep.subr.bf16.mxu1 %v7013_v34 }
 0x551   : > { %6660 = vmatprep.mubr.msk.bf16.mxu0 %vm2123_vm5, %v3937_v36  ;;  %v5062_v36 = vld [vmem:[#allocation7 + $0xa8] sm:$0xff] }
 0x553   : > { %6659 = vmatpush3.bf16.msra.mxu0 %v7012_v35  ;;  %6443 = vmatpush3.bf16.msra.mxu1 %v7014_v38  ;;  %v5063_v35 = vld [vmem:[#allocation7 + $0xb0] sm:$0xff]  ;;  %v5068_v38 = vpack.c.bf16 %v5062_v36, %v4775_v20 }
 0x554   : > { %6444 = vmatprep.subr.bf16.mxu1 %v7015_v39  ;;  %6664 = vmatprep.subr.bf16.mxu0 %v7016_v41  ;;  %v5069_v34 = vpack.c.bf16 %v5063_v35, %v4776_v13 }
 0x556   : > { %6661 = vmatmul.mubr.msk.bf16.vlgmr.msra.gmra.mrb[76].mxu0 %vm2123_vm5, %v8370_v16 }
 0x557   : > { %6445 = vmatpush3.bf16.msra.mxu1 %v7017_v8  ;;  %6665 = vmatpush3.bf16.msra.mxu0 %v7016_v41 }
 0x558   : > { %6672 = vmatprep.mubr.msk.bf16.mxu0 %vm2123_vm5, %v8370_v16  ;;  %6666 = vmatprep.subr.bf16.mxu0 %v7018_v42  ;;  %v7023_v16 = vld [vmem:[%s8729_s7 + $0x1e8] sm:$0xff]  }
 0x559   : > { %6464 = vmatprep.subr.bf16.mxu1 %v7019_v37 }
 0x55a   : > { %4697 = vmatmul.mubr.bf16.vlgmr.msra.gmra.mrb[88].mxu1 %v3938_v33  ;;  %v7060_v33 = vld [vmem:[%s8729_s7 + $0x2b8] sm:$0xff]  }
 0x55b   : > { %4704 = vmatprep.mubr.bf16.mxu1 %v8557_v51  ;;  %6667 = vmatpush3.bf16.msra.mxu0 %v7018_v42 }
 0x55c   : > { %6465 = vmatpush3.bf16.msra.mxu1 %v7020_v50  ;;  %6668 = vmatprep.subr.bf16.mxu0 %v7021_v40 }
 0x55d   : > { %6466 = vmatprep.subr.bf16.mxu1 %v7022_v53 }
 0x55f   : > { %6669 = vmatpush3.bf16.msra.mxu0 %v7021_v40 }
 0x560   : > { %6467 = vmatpush3.bf16.msra.mxu1 %v7023_v16  ;;  %6670 = vmatprep.subr.bf16.mxu0 %v7024_v55 }
 0x561   : > { %6468 = vmatprep.subr.bf16.mxu1 %v7025_v58 }
 0x562   : > { %4705 = vmatmul.mubr.bf16.gmra.mrb[92].mxu1 %v8576_v52 }
 0x563   : > { %6671 = vmatpush3.bf16.msra.mxu0 %v7024_v55  ;;  %4983 = vmatprep.mubr.bf16.mxu1 %v8471_v9  ;;  %v7041_v9 = vld [vmem:[%s8729_s7 + $0x218] sm:$0xff]  }
 0x564   : > { %6469 = vmatpush3.bf16.msra.mxu1 %v7026_v54  ;;  %6676 = vmatprep.subr.bf16.mxu0 %v7028_v26 }
 0x565   : > { %6470 = vmatprep.subr.bf16.mxu1 %v7027_v44 }
 0x566   : > { %6673 = vmatmul.mubr.msk.bf16.vlgmr.msra.gmra.mrb[76].mxu0 %vm2123_vm5, %v4496_v45 }
 0x567   : > { %6677 = vmatpush3.bf16.msra.mxu0 %v7028_v26  ;;  %6684 = vmatprep.mubr.msk.bf16.mxu0 %vm2123_vm5, %v8385_v10  ;;  %v7035_v10 = vld [vmem:[%s8729_s7 + $0x208] sm:$0xff]  }
 0x568   : > { %6471 = vmatpush3.bf16.msra.mxu1 %v7029_v0  ;;  %6678 = vmatprep.subr.bf16.mxu0 %v7031_v2 }
 0x569   : > { %6472 = vmatprep.subr.bf16.mxu1 %v7030_v3 }
 0x56b   : > { %6679 = vmatpush3.bf16.msra.mxu0 %v7031_v2 }
 0x56c   : > { %6473 = vmatpush3.bf16.msra.mxu1 %v7032_v22  ;;  %6680 = vmatprep.subr.bf16.mxu0 %v7034_v59 }
 0x56d   : > { %6474 = vmatprep.subr.bf16.mxu1 %v7033_v46 }
 0x56f   : > { %6681 = vmatpush3.bf16.msra.mxu0 %v7034_v59 }
 0x570   : > { %6475 = vmatpush3.bf16.msra.mxu1 %v7035_v10  ;;  %6682 = vmatprep.subr.bf16.mxu0 %v7037_v63 }
 0x571   : > { %6476 = vmatprep.subr.bf16.mxu1 %v7036_v6 }
 0x573   : > { %6683 = vmatpush3.bf16.msra.mxu0 %v7037_v63 }
 0x574   : > { %6477 = vmatpush3.bf16.msra.mxu1 %v7038_v7  ;;  %6688 = vmatprep.subr.bf16.mxu0 %v7040_v62 }
 0x575   : > { %6478 = vmatprep.subr.bf16.mxu1 %v7039_v60 }
 0x576   : > { %6685 = vmatmul.mubr.msk.bf16.vlgmr.msra.gmra.mrb[76].mxu0 %vm2123_vm5, %v4783_v1 }
 0x577   : > { %6689 = vmatpush3.bf16.msra.mxu0 %v7040_v62  ;;  %6696 = vmatprep.mubr.msk.bf16.mxu0 %vm2123_vm5, %v4496_v45 }
 0x578   : > { %6479 = vmatpush3.bf16.msra.mxu1 %v7041_v9  ;;  %6690 = vmatprep.subr.bf16.mxu0 %v7043_v11 }
 0x579   : > { %6498 = vmatprep.subr.bf16.mxu1 %v7042_v57 }
 0x57b   : > { %4984 = vmatmul.mubr.bf16.vlgmr.msra.gmra.mrb[96].mxu1 %v8485_v17  ;;  %6691 = vmatpush3.bf16.msra.mxu0 %v7043_v11  ;;  %v5064_v17 = vld [vmem:[#allocation7 + $0xb8] sm:$0xff] }
 0x57c   : > { %4991 = vmatprep.mubr.bf16.mxu1 %v4782_v15  ;;  %6499 = vmatpush3.bf16.msra.mxu1 %v7044_v14  ;;  %v5070_v31 = vpack.c.bf16 %v5064_v17, %v4777_v56 }
 0x57d   : > { %6500 = vmatprep.subr.bf16.mxu1 %v7045_v5  ;;  %6692 = vmatprep.subr.bf16.mxu0 %v7046_v4 }
 0x57f   : > { %6693 = vmatpush3.bf16.msra.mxu0 %v7046_v4 }
 0x580   : > { %6501 = vmatpush3.bf16.msra.mxu1 %v7047_v47  ;;  %6694 = vmatprep.subr.bf16.mxu0 %v7049_v18 }
 0x581   : > { %6502 = vmatprep.subr.bf16.mxu1 %v7048_v43 }
 0x583   : > { %4992 = vmatmul.mubr.bf16.gmra.mrb[100].mxu1 %v4781_v19  ;;  %6695 = vmatpush3.bf16.msra.mxu0 %v7049_v18 }
 0x584   : > { %6503 = vmatpush3.bf16.msra.mxu1 %v7050_v21  ;;  %5270 = vmatprep.mubr.bf16.mxu1 %v8557_v51 }
 0x585   : > { %6504 = vmatprep.subr.bf16.mxu1 %v7051_v23 }
 0x586   : > { %6697 = vmatmul.mubr.msk.bf16.vlgmr.msra.gmra.mrb[76].mxu0 %vm2123_vm5, %v5070_v31 }
 0x588   : > { %6505 = vmatpush3.bf16.msra.mxu1 %v7052_v12 }
 0x589   : > { %6506 = vmatprep.subr.bf16.mxu1 %v7053_v27 }
 0x58c   : > { %6507 = vmatpush3.bf16.msra.mxu1 %v7054_v28 }
 0x58d   : > { %6508 = vmatprep.subr.bf16.mxu1 %v7055_v25 }
 0x590   : > { %6509 = vmatpush3.bf16.msra.mxu1 %v7056_v29 }
 0x591   : > { %6510 = vmatprep.subr.bf16.mxu1 %v7057_v32 }
 0x594   : > { %6511 = vmatpush3.bf16.msra.mxu1 %v7058_v30 }
 0x595   : > { %6512 = vmatprep.subr.bf16.mxu1 %v7059_v24 }
 0x598   : > { %6513 = vmatpush3.bf16.msra.mxu1 %v7060_v33 }
 0x59b   : > { %5271 = vmatmul.mubr.bf16.vlgmr.msra.gmra.mrb[104].mxu1 %v8576_v52 }
 0x59c   : > { %5278 = vmatprep.mubr.bf16.mxu1 %v5069_v34 }
 0x5a3   : > { %5279 = vmatmul.mubr.bf16.gmra.mrb[108].mxu1 %v5068_v38 }
 0x60c   : > { %v6378_v39 = vpop.f32.mrb[80].mxu1 }
 0x60d   : > { %v6379_v41 = vpop.f32.mrb[81].mxu1 }
 0x60e   : > { %v6380_v8 = vadd.f32 %v6379_v41, %v6378_v39  ;;  %v6381_v42 = vpop.f32.mrb[82].mxu1 }
 0x60f   : > { %v6382_v37 = vpop.f32.mrb[83].mxu1 }
 0x610   : > { %v6383_v48 = vadd.f32 %v6382_v37, %v6381_v42 }
 0x615   : > { %v6384_v50 = vpop.f32.mrb[84].mxu1 }
 0x616   : > { %v6385_v40 = vpop.f32.mrb[85].mxu1 }
 0x617   : > { %v6386_v51 = vadd.f32 %v6385_v40, %v6384_v50  ;;  %v6387_v53 = vpop.f32.mrb[86].mxu1  ;;  %v6164_v40 = vld [vmem:[%s8730_s8] ss:$0 sm:$0xff] }
 0x618   : > { %v6388_v16 = vpop.f32.mrb[87].mxu1 }
 0x619   : > { %v6389_v55 = vadd.f32 %v6388_v16, %v6387_v53  ;;  %v6412_v49 = vpop.f32.mrb[80].mxu0 }
 0x61a   : > { %v6413_v58 = vpop.f32.mrb[81].mxu0 }
 0x61b   : > { %v6414_v54 = vadd.f32 %v6413_v58, %v6412_v49  ;;  %v6415_v52 = vpop.f32.mrb[82].mxu0 }
 0x61c   : > { %v6416_v26 = vpop.f32.mrb[83].mxu0 }
 0x61d   : > { %v6725_v61 = vadd.f32 %v6414_v54, %v6380_v8  ;;  %v6417_v44 = vadd.f32 %v6416_v26, %v6415_v52 }
 0x61f   : > { %v6735_v45 = vadd.f32 %v6417_v44, %v6383_v48 }
 0x621   : > { %v6418_v0 = vpop.f32.mrb[84].mxu0 }
 0x622   : > { %v6419_v2 = vpop.f32.mrb[85].mxu0 }
 0x623   : > { %v6420_v3 = vadd.f32 %v6419_v2, %v6418_v0  ;;  %v6421_v22 = vpop.f32.mrb[86].mxu0 }
 0x624   : > { %v6422_v59 = vpop.f32.mrb[87].mxu0 }
 0x625   : > { %v6720_v46 = vadd.f32 %v6420_v3, %v6386_v51  ;;  %v6423_v10 = vadd.f32 %v6422_v59, %v6421_v22 }
 0x627   : > { %v6730_v63 = vadd.f32 %v6423_v10, %v6389_v55 }
 0x62d   : > { %v6446_v6 = vpop.f32.mrb[88].mxu1 }
 0x62e   : > { %v6447_v7 = vpop.f32.mrb[89].mxu1 }
 0x62f   : > { %v6448_v62 = vadd.f32 %v6447_v7, %v6446_v6  ;;  %v6449_v60 = vpop.f32.mrb[90].mxu1 }
 0x630   : > { %v6450_v56 = vpop.f32.mrb[91].mxu1 }
 0x631   : > { %v6726_v1 = vadd.f32 %v6725_v61, %v6448_v62  ;;  %v6451_v9 = vadd.f32 %v6450_v56, %v6449_v60 }
 0x633   : > { %v6736_v11 = vadd.f32 %v6735_v45, %v6451_v9 }
 0x635   : > { %v6452_v57 = vpop.f32.mrb[92].mxu1 }
 0x636   : > { %v6453_v13 = vpop.f32.mrb[93].mxu1 }
 0x637   : > { %v6454_v14 = vadd.f32 %v6453_v13, %v6452_v57  ;;  %v6455_v5 = vpop.f32.mrb[94].mxu1 }
 0x638   : > { %v6456_v4 = vpop.f32.mrb[95].mxu1 }
 0x639   : > { %v6721_v15 = vadd.f32 %v6720_v46, %v6454_v14  ;;  %v6457_v47 = vadd.f32 %v6456_v4, %v6455_v5  ;;  %v5372_v14 = vld [vmem:[%s8731_s9] sm:$0x3]  ;;  %v5373_v5 = vld [vmem:[%s8731_s9 + $0x2] sm:$0x3] }
 0x63b   : > { %v6731_v18 = vadd.f32 %v6730_v63, %v6457_v47 }
 0x64e   : > { %v6480_v43 = vpop.f32.mrb[96].mxu1 }
 0x64f   : > { %v6481_v20 = vpop.f32.mrb[97].mxu1 }
 0x650   : > { %v6482_v17 = vadd.f32 %v6481_v20, %v6480_v43  ;;  %v6483_v21 = vpop.f32.mrb[98].mxu1 }
 0x651   : > { %v6484_v19 = vpop.f32.mrb[99].mxu1 }
 0x652   : > { %v6727_v23 = vadd.f32 %v6726_v1, %v6482_v17  ;;  %v6485_v31 = vadd.f32 %v6484_v19, %v6483_v21 }
 0x654   : > { %v6737_v12 = vadd.f32 %v6736_v11, %v6485_v31 }
 0x656   : > { %v6486_v27 = vpop.f32.mrb[100].mxu1 }
 0x657   : > { %v6487_v28 = vpop.f32.mrb[101].mxu1 }
 0x658   : > { %v6488_v25 = vadd.f32 %v6487_v28, %v6486_v27  ;;  %v6489_v29 = vpop.f32.mrb[102].mxu1 }
 0x659   : > { %v6490_v32 = vpop.f32.mrb[103].mxu1  ;;  %v6698_v30 = vpop.f32.mrb[76].mxu0 }
 0x65a   : > { %v6722_v24 = vadd.f32 %v6721_v15, %v6488_v25  ;;  %v6491_v33 = vadd.f32 %v6490_v32, %v6489_v29  ;;  %v5321_v35 = vpop.f32.mrb[77].mxu0  ;;  %v5389_v29 = vld [vmem:[%s8732_s10] sm:$0x1] }
 0x65b   : > { %v6699_v34 = vpop.f32.mrb[78].mxu0 }
 0x65c   : > { %v6732_v36 = vadd.f32 %v6731_v18, %v6491_v33  ;;  %v5324_v38 = vpop.f32.mrb[79].mxu0 }
 0x66e   : > { %v6514_v39 = vpop.f32.mrb[104].mxu1 }
 0x66f   : > { %v6515_v41 = vpop.f32.mrb[105].mxu1 }
 0x670   : > { %v6516_v8 = vadd.f32 %v6515_v41, %v6514_v39  ;;  %v6517_v42 = vpop.f32.mrb[106].mxu1 }
 0x671   : > { %v6518_v37 = vpop.f32.mrb[107].mxu1 }
 0x672   : > { %v6728_v48 = vadd.f32 %v6727_v23, %v6516_v8  ;;  %v6519_v50 = vadd.f32 %v6518_v37, %v6517_v42 }
 0x674   : > { %v6729_v51 = vadd.f32 %v6728_v48, %v5321_v35  ;;  %v6738_v53 = vadd.f32 %v6737_v12, %v6519_v50 }
 0x676   : > { %v5347_v16 = vadd.f32 %v6729_v51, %v6164_v40  ;;  %v6739_v55 = vadd.f32 %v6738_v53, %v5324_v38  ;;  %v6520_v49 = vpop.f32.mrb[108].mxu1 }
 0x677   : > { %v6521_v58 = vpop.f32.mrb[109].mxu1 }
 0x678   : > { %v5351_v54 = vmax.f32 %v5347_v16, 0.0  ;;  %v5348_v52 = vadd.f32 %v6739_v55, %v6164_v40  ;;  %v6522_v26 = vadd.f32 %v6521_v58, %v6520_v49  ;;  %v6523_v61 = vpop.f32.mrb[110].mxu1 }
 0x679   : > { %v6524_v44 = vpop.f32.mrb[111].mxu1 }
 0x67a   : > { %v5352_v45 = vmax.f32 %v5348_v52, 0.0  ;;  %v6723_v0 = vadd.f32 %v6722_v24, %v6522_v26  ;;  %v6525_v2 = vadd.f32 %v6524_v44, %v6523_v61  ;;  %v5355_v3 = vsel %vm776_vm0, %v5351_v54, -inf }
 0x67c   : > { %v5356_v22 = vsel %vm776_vm0, %v5352_v45, -inf  ;;  %v6724_v59 = vadd.f32 %v6723_v0, %v6698_v30  ;;  %v6733_v46 = vadd.f32 %v6732_v36, %v6525_v2 }
 0x67d   : > { %v5357_v10 = vmax.f32 %v5355_v3, %v5356_v22 }
 0x67e   : > { %v5349_v63 = vadd.f32 %v6724_v59, %v6164_v40  ;;  %v6734_v6 = vadd.f32 %v6733_v46, %v6699_v34 }
 0x67f   : > { %5361 = vst.msk [vmem:[#allocation10] sm:$0xff] %vm776_vm0, %v5357_v10 }
 0x680   : > { %v5353_v7 = vmax.f32 %v5349_v63, 0.0  ;;  %v5350_v62 = vadd.f32 %v6734_v6, %v6164_v40 }
 0x682   : > { %v5354_v60 = vmax.f32 %v5350_v62, 0.0  ;;  %v5358_v56 = vsel %vm776_vm0, %v5353_v7, -inf }
 0x684   : > { %v5359_v1 = vsel %vm776_vm0, %v5354_v60, -inf }
 0x685   : > { %v5360_v9 = vmax.f32 %v5358_v56, %v5359_v1 }
 0x686   : > { %v5363_v11 = vld [vmem:[#allocation10] ss:$2 sm:$0x3]  ;;  %v5367_v57 = vld [vmem:[#allocation10 + $0x1] ss:$2 sm:$0x3] }
 0x687   : > { %5362 = vst.msk [vmem:[#allocation10 + $0x8] sm:$0xff] %vm776_vm0, %v5360_v9  ;;  %v5370_v13 = vmax.f32 %v5363_v11, %v5367_v57 }
 0x689   : > { %v5374_v18 = vmul.f32 %v5372_v14, %v5370_v13 }
 0x68b   : > { %v5377_v20 = vsel %vm5376_vm8, %v5374_v18, 0.0 }
 0x68e   : > { %v5365_v4 = vld [vmem:[#allocation10 + $0x8] ss:$2 sm:$0x3]  ;;  %v5369_v15 = vld [vmem:[#allocation10 + $0x9] ss:$2 sm:$0x3] }
 0x68f   : > { %v5371_v47 = vmax.f32 %v5365_v4, %v5369_v15 }
 0x691   : > { %v5375_v43 = vmul.f32 %v5373_v5, %v5371_v47 }
 0x693   : > { %v5378_v17 = vsel %vm5376_vm8, %v5375_v43, 0.0 }
 0x694   : > { %v5379_v21 = vadd.f32 %v5378_v17, %v5377_v20 }
 0x696   : > { %5380 = vadd.xlane.f32.xlu0 %v5379_v21 }
 0x723   : > { %v5381_v19 = vpop.xlane.xlu0 %5380 }
 0x724   : > { %v5382_v23 = vrot.slane %v5381_v19, 4 }
 0x726   : > { %v5383_v31 = vadd.f32 %v5382_v23, %v5381_v19 }
 0x728   : > { %v5384_v12 = vrot.slane %v5383_v31, 2 }
 0x72a   : > { %v5385_v27 = vadd.f32 %v5384_v12, %v5383_v31 }
 0x72c   : > { %v5386_v28 = vrot.slane %v5385_v27, 1 }
 0x72e   : > { %v5387_v25 = vadd.f32 %v5386_v28, %v5385_v27 }
 0x730   : > { %6772 = vpush %v5387_v25 }
 0x761   : > { %s6773_s21 = spop %6772 }
 0x762   : > { %v5390_v32 = vstv %s6773_s21 }
 0x763   : > { %v5391_v30 = vadd.f32 %v5390_v32, %v5389_v29 }
 0x765   : > { %5392 = vst [vmem:[%s382_s25] sm:$0x1] %v5391_v30 }
 0x766 PF: > { %s21_s17 = sadd.s32 1, %s7067_s17  }
 0x767   : > { %p18_p4 = scmp.ge.s32.totalorder %s21_s17, 4  }
 0x769   :  { %20 = sbr.rel (!%p18_p4) target bundleno = 1 (0x1), region = 134 }

</bundles_post_ra>
